<compile_context>
chip_gen: v5e
topology: v5e:2x2
jax: 0.10.0
libtpu: 0.0.40
codegen_flags: <defaults>
</compile_context>

<pallas_src>
import math

import jax
import jax.numpy as jnp
from jax.experimental import pallas as pl
from jax.experimental.pallas import tpu as pltpu

# ----------------------------- small synthetic config -----------------------------
B = 2            # batch
S = 8            # sequence length
H = 32           # hidden size ("electra.config.hidden_size")
VOCAB = 128
N_TYPES = 2
N_ELECTRA_LAYERS = 2
ELECTRA_HEADS = 2
ELECTRA_FFN = 64
COND_FFN = 64    # dim_feedforward of the two conditional TransformerEncoderLayers
ELECTRA_EPS = 1e-12
TORCH_EPS = 1e-5
MATMUL_DTYPE = jnp.bfloat16   # MXU operand dtype (f32 accumulation everywhere)

assert ELECTRA_FFN == COND_FFN, "layer stacking assumes equal FFN widths"

N_LAYERS_TOTAL = N_ELECTRA_LAYERS + 2          # 2 Electra + cond1 + cond2

# ---- packed small-parameter slab layout (rows of a (SP_ROWS, SP_W) f32 array) ----
SP_W = ELECTRA_FFN                              # 64 lanes; H-wide rows use lanes 0:H
ROW_ELN_G = 0
ROW_ELN_B = 1
SP_LAYER_BASE = 2
SP_ROWS_PER_LAYER = 10     # bq bk bv bo ln1_g ln1_b ln2_g ln2_b b1(F) b2
ROW_BCLSD = SP_LAYER_BASE + N_LAYERS_TOTAL * SP_ROWS_PER_LAYER   # 42
ROW_WCLSO = ROW_BCLSD + 1
ROW_WQA_S = ROW_BCLSD + 2
ROW_WQA_E = ROW_BCLSD + 3
ROW_BCLSO = ROW_BCLSD + 4
ROW_BQA_S = ROW_BCLSD + 5
ROW_BQA_E = ROW_BCLSD + 6
SP_ROWS = ROW_BQA_E + 1

OUT_W = 128       # lane-dense output slab width: [start(S) | end(S) | ver(1) | pad]


# ----------------------------- in-kernel math helpers -----------------------------
def _gelu(x):
    return jax.nn.gelu(x, approximate=True)


def _relu(x):
    return jnp.maximum(x, 0.0)


# ----------------------------- the single fused Pallas kernel ---------------------
def fused_forward_kernel(emb_ref, mask_ref, wsq_ref, w1_ref, w2_ref, sp_ref, out_ref):
    """Entire ElectraQAExtension forward; all activations & weights VMEM-resident.

    emb_ref  : (B*S, H)        f32   word+pos+type embeddings (flattened batch)
    mask_ref : (B*S, B*S)      f32   block-diagonal + key-padding additive bias
    wsq_ref  : (4*L+1, H, H)   bf16  [Wq*scale, Wk, Wv, Wo] per layer + cls dense
    w1_ref   : (L, H, F)       bf16  FFN in weights
    w2_ref   : (L, F, H)       bf16  FFN out weights
    sp_ref   : (SP_ROWS, F)    f32   packed LN params / biases / head rows / scalars
    out_ref  : (B, 128)        f32   [start(S) | end(S) | ver(1) | zeros]
    """
    bs, h_ = emb_ref.shape
    b_, s_ = B, S
    cdt = wsq_ref.dtype                         # bf16 MXU operand dtype
    mask2d = mask_ref[...]                      # (B*S, B*S)

    def ln(x, g_row, b_row, eps):
        g = sp_ref[g_row:g_row + 1, 0:h_]
        bb = sp_ref[b_row:b_row + 1, 0:h_]
        mu = jnp.mean(x, axis=-1, keepdims=True)
        var = jnp.mean((x - mu) ** 2, axis=-1, keepdims=True)
        return (x - mu) * jax.lax.rsqrt(var + eps) * g + bb

    def encoder_layer(x, l, num_heads, act, eps):
        """Post-norm transformer encoder layer on the flattened (B*S, H) slab."""
        base = SP_LAYER_BASE + l * SP_ROWS_PER_LAYER
        xc = x.astype(cdt)                                     # cast once
        # three (B*S,H)@(H,H) projections; scale already folded into Wq/bq
        q = jnp.dot(xc, wsq_ref[4 * l + 0],
                    preferred_element_type=jnp.float32) + sp_ref[base + 0:base + 1, 0:h_]
        k = jnp.dot(xc, wsq_ref[4 * l + 1],
                    preferred_element_type=jnp.float32) + sp_ref[base + 1:base + 2, 0:h_]
        v = jnp.dot(xc, wsq_ref[4 * l + 2],
                    preferred_element_type=jnp.float32) + sp_ref[base + 2:base + 3, 0:h_]
        qc, kc, vc = q.astype(cdt), k.astype(cdt), v.astype(cdt)

        dh = h_ // num_heads
        ctxs = []
        for hh in range(num_heads):                            # static (<=2) head loop
            lo = hh * dh
            # block-diagonal attention: one score matmul over the whole batch
            sc = jax.lax.dot_general(qc[:, lo:lo + dh], kc[:, lo:lo + dh],
                                     (((1,), (1,)), ((), ())),
                                     preferred_element_type=jnp.float32) + mask2d
            sc = sc - jnp.max(sc, axis=-1, keepdims=True)
            e = jnp.exp(sc)
            p = e * pl.reciprocal(jnp.sum(e, axis=-1, keepdims=True), approx=True)
            ctxs.append(jnp.dot(p.astype(cdt), vc[:, lo:lo + dh],
                                preferred_element_type=jnp.float32))   # (B*S, dh)
        ctx = ctxs[0] if num_heads == 1 else jnp.concatenate(ctxs, axis=-1)
        attn = jnp.dot(ctx.astype(cdt), wsq_ref[4 * l + 3],
                       preferred_element_type=jnp.float32) + sp_ref[base + 3:base + 4, 0:h_]

        h1 = ln(x + attn, base + 4, base + 5, eps)
        inner = act(jnp.dot(h1.astype(cdt), w1_ref[l],
                            preferred_element_type=jnp.float32)
                    + sp_ref[base + 8:base + 9, :])
        ff = jnp.dot(inner.astype(cdt), w2_ref[l],
                     preferred_element_type=jnp.float32) + sp_ref[base + 9:base + 10, 0:h_]
        return ln(h1 + ff, base + 6, base + 7, eps)

    # ---- Electra: embedding LayerNorm + encoder stack (GELU FFN, eps=1e-12) ----
    x = ln(emb_ref[...], ROW_ELN_G, ROW_ELN_B, ELECTRA_EPS)
    for l in range(N_ELECTRA_LAYERS):
        x = encoder_layer(x, l, ELECTRA_HEADS, _gelu, ELECTRA_EPS)

    # ---- verification head: CLS token -> dense -> GELU -> out_proj -> sigmoid ----
    # CLS gather as in-kernel one-hot selection matmul (no sublane relayout, no DMA).
    rows = jax.lax.broadcasted_iota(jnp.int32, (b_, bs), 0) * s_
    cols = jax.lax.broadcasted_iota(jnp.int32, (b_, bs), 1)
    clssel = (rows == cols).astype(jnp.float32)                         # (B, B*S)
    cls = jnp.dot(clssel, x, preferred_element_type=jnp.float32)        # (B, H)
    d = _gelu(jnp.dot(cls.astype(cdt), wsq_ref[4 * N_LAYERS_TOTAL],
                      preferred_element_type=jnp.float32)
              + sp_ref[ROW_BCLSD:ROW_BCLSD + 1, 0:h_])
    ver = jax.nn.sigmoid(
        jnp.sum(d * sp_ref[ROW_WCLSO:ROW_WCLSO + 1, 0:h_], axis=-1, keepdims=True)
        + sp_ref[ROW_BCLSO:ROW_BCLSO + 1, 0:1])                         # (B, 1)

    # ---- conditional layer 1 (ReLU FFN, 1 head, eps=1e-5) + qa_start ----
    h1 = encoder_layer(x, N_ELECTRA_LAYERS, 1, _relu, TORCH_EPS)
    start = (jnp.sum(h1.reshape(b_, s_, h_)
                     * sp_ref[ROW_WQA_S:ROW_WQA_S + 1, 0:h_][None], axis=-1)
             + sp_ref[ROW_BQA_S:ROW_BQA_S + 1, 0:1])                    # (B, S)

    # ---- conditional layer 2 + qa_end ----
    h2 = encoder_layer(h1, N_ELECTRA_LAYERS + 1, 1, _relu, TORCH_EPS)
    end = (jnp.sum(h2.reshape(b_, s_, h_)
                   * sp_ref[ROW_WQA_E:ROW_WQA_E + 1, 0:h_][None], axis=-1)
           + sp_ref[ROW_BQA_E:ROW_BQA_E + 1, 0:1])                      # (B, S)

    # ---- single lane-dense output store ----
    pad = jnp.zeros((b_, OUT_W - 2 * s_ - 1), jnp.float32)
    out_ref[...] = jnp.concatenate([start, end, ver, pad], axis=-1)


# ----------------------------- wrapper ----------------------------------------------
@jax.jit
def electra_qa_extension_forward(input_ids, attention_mask, token_type_ids, params):
    b_, s_ = input_ids.shape
    bs = b_ * s_

    # Embedding gathers are glue (outside the kernel); everything else runs fused.
    emb = (params['word'][input_ids]
           + params['pos'][None, :s_, :]
           + params['type'][token_type_ids])
    emb_flat = emb.reshape(bs, -1)

    # block-diagonal (per-example) + key-padding additive attention bias, (B*S, B*S)
    kp = (attention_mask.astype(jnp.float32) - 1.0) * 1e9                # (B, S)
    same = jnp.arange(b_)[:, None] == jnp.arange(b_)[None, :]            # (B, B)
    block = jnp.where(same, 0.0, -1e9)[:, None, :, None]                 # (B,1,B,1)
    mask2d = jnp.broadcast_to(block + kp[None, None, :, :],
                              (b_, s_, b_, s_)).reshape(bs, bs)

    vmem = pl.BlockSpec(memory_space=pltpu.MemorySpace.VMEM)
    out = pl.pallas_call(
        fused_forward_kernel,
        in_specs=[vmem] * 6,
        out_specs=vmem,
        out_shape=jax.ShapeDtypeStruct((b_, OUT_W), jnp.float32),
    )(emb_flat, mask2d, params['wsq'], params['w1'], params['w2'], params['sp'])

    start = out[:, 0:s_]
    end = out[:, s_:2 * s_]
    ver = out[:, 2 * s_:2 * s_ + 1]
    return start, end, ver


# ----------------------------- parameter init (deterministic) -----------------------
def _init_linear(key, din, dout):
    kw, kb = jax.random.split(key)
    w = jax.random.normal(kw, (din, dout), jnp.float32) * 0.02
    b = jax.random.normal(kb, (dout,), jnp.float32) * 0.02
    return w, b


def _init_encoder_layer(key, d, f, num_heads):
    ks = jax.random.split(key, 6)
    wq, bq = _init_linear(ks[0], d, d)
    wk, bk = _init_linear(ks[1], d, d)
    wv, bv = _init_linear(ks[2], d, d)
    wo, bo = _init_linear(ks[3], d, d)
    w1, b1 = _init_linear(ks[4], d, f)
    w2, b2 = _init_linear(ks[5], f, d)
    scale = 1.0 / math.sqrt(d // num_heads)       # folded into Wq AND bq
    return dict(wq=wq * scale, bq=bq * scale, wk=wk, bk=bk, wv=wv, bv=bv,
                wo=wo, bo=bo,
                ln1_g=jnp.ones((d,), jnp.float32), ln1_b=jnp.zeros((d,), jnp.float32),
                ln2_g=jnp.ones((d,), jnp.float32), ln2_b=jnp.zeros((d,), jnp.float32),
                w1=w1, b1=b1, w2=w2, b2=b2)


def _row(v):
    v = jnp.asarray(v, jnp.float32).reshape(-1)
    return jnp.pad(v, (0, SP_W - v.shape[0]))


def init_params(key):
    keys = jax.random.split(key, 12)
    layers = ([_init_encoder_layer(keys[3 + i], H, ELECTRA_FFN, ELECTRA_HEADS)
               for i in range(N_ELECTRA_LAYERS)]
              + [_init_encoder_layer(keys[5], H, COND_FFN, 1),    # conditional_layer1
                 _init_encoder_layer(keys[6], H, COND_FFN, 1)])   # conditional_layer2

    qa_sw, qa_sb = _init_linear(keys[7], H, 1)
    qa_ew, qa_eb = _init_linear(keys[8], H, 1)
    cls_wd, cls_bd = _init_linear(keys[9], H, H)
    cls_wo, cls_bo = _init_linear(keys[10], H, 1)

    # --- square (H,H) matmul weights: [Wq Wk Wv Wo] per layer, then classifier dense
    wsq = jnp.stack([l[k] for l in layers for k in ('wq', 'wk', 'wv', 'wo')]
                    + [cls_wd]).astype(MATMUL_DTYPE)              # (4L+1, H, H)

    # --- packed small f32 params slab (SP_ROWS, SP_W)
    rows = [_row(jnp.ones((H,))), _row(jnp.zeros((H,)))]          # embedding LN g, b
    for l in layers:
        rows += [_row(l['bq']), _row(l['bk']), _row(l['bv']), _row(l['bo']),
                 _row(l['ln1_g']), _row(l['ln1_b']), _row(l['ln2_g']), _row(l['ln2_b']),
                 _row(l['b1']), _row(l['b2'])]
    rows += [_row(cls_bd), _row(cls_wo[:, 0]), _row(qa_sw[:, 0]), _row(qa_ew[:, 0]),
             _row(jnp.full((SP_W,), cls_bo[0])),
             _row(jnp.full((SP_W,), qa_sb[0])),
             _row(jnp.full((SP_W,), qa_eb[0]))]
    sp = jnp.stack(rows)                                          # (SP_ROWS, SP_W)
    assert sp.shape == (SP_ROWS, SP_W)

    return dict(
        word=jax.random.normal(keys[0], (VOCAB, H), jnp.float32) * 0.02,
        pos=jax.random.normal(keys[1], (S, H), jnp.float32) * 0.02,
        type=jax.random.normal(keys[2], (N_TYPES, H), jnp.float32) * 0.02,
        wsq=wsq,
        w1=jnp.stack([l['w1'] for l in layers]).astype(MATMUL_DTYPE),   # (L, H, F)
        w2=jnp.stack([l['w2'] for l in layers]).astype(MATMUL_DTYPE),   # (L, F, H)
        sp=sp,
    )


# ----------------------------- main --------------------------------------------------
if __name__ == "__main__":
    key = jax.random.PRNGKey(0)
    k_par, k_ids = jax.random.split(key)
    params = init_params(k_par)

    input_ids = jax.random.randint(k_ids, (B, S), 0, VOCAB, dtype=jnp.int32)
    token_type_ids = jnp.concatenate(
        [jnp.zeros((B, S // 2), jnp.int32), jnp.ones((B, S // 2), jnp.int32)], axis=1)
    attention_mask = jnp.array([[1] * S, [1] * (S - 2) + [0, 0]], dtype=jnp.int32)

    start_logits, end_logits, verification_logits = electra_qa_extension_forward(
        input_ids, attention_mask, token_type_ids, params)
    jax.block_until_ready((start_logits, end_logits, verification_logits))

    assert start_logits.shape == (B, S)
    assert end_logits.shape == (B, S)
    assert verification_logits.shape == (B, 1)
    assert bool(jnp.isfinite(start_logits).all())
    assert bool(jnp.isfinite(end_logits).all())
    assert bool(jnp.isfinite(verification_logits).all())
    assert bool((verification_logits >= 0).all() and (verification_logits <= 1).all())

    print("KERNEL_OK")
</pallas_src>

<mosaic_0001>
module attributes {stable_mosaic.version = 11 : i64} {
  func.func @fused_forward_kernel(%arg0: memref<16x32xf32, #tpu.memory_space<vmem>>, %arg1: memref<16x16xf32, #tpu.memory_space<vmem>>, %arg2: memref<17x32x32xbf16, #tpu.memory_space<vmem>>, %arg3: memref<4x32x64xbf16, #tpu.memory_space<vmem>>, %arg4: memref<4x64x32xbf16, #tpu.memory_space<vmem>>, %arg5: memref<49x64xf32, #tpu.memory_space<vmem>>, %arg6: memref<2x128xf32, #tpu.memory_space<vmem>>) attributes {dimension_semantics = [], scalar_prefetch = 0 : i64, scratch_operands = 0 : i64, tpu.core_type = #tpu.core_type<tc>} {
    %c0 = arith.constant 0 : index
    %c0_0 = arith.constant 0 : index
    %0 = vector.load %arg1[%c0, %c0_0] : memref<16x16xf32, #tpu.memory_space<vmem>>, vector<16x16xf32>
    %c0_1 = arith.constant 0 : index
    %c0_2 = arith.constant 0 : index
    %1 = vector.load %arg0[%c0_1, %c0_2] : memref<16x32xf32, #tpu.memory_space<vmem>>, vector<16x32xf32>
    %c0_3 = arith.constant 0 : index
    %c0_4 = arith.constant 0 : index
    %2 = vector.load %arg5[%c0_3, %c0_4] : memref<49x64xf32, #tpu.memory_space<vmem>>, vector<1x32xf32>
    %c1 = arith.constant 1 : index
    %c0_5 = arith.constant 0 : index
    %3 = vector.load %arg5[%c1, %c0_5] : memref<49x64xf32, #tpu.memory_space<vmem>>, vector<1x32xf32>
    %cst = arith.constant dense<0.000000e+00> : vector<16xf32>
    %4 = vector.multi_reduction <add>, %1, %cst [1] : vector<16x32xf32> to vector<16xf32>
    %5 = vector.shape_cast %4 : vector<16xf32> to vector<16x1xf32>
    %cst_6 = arith.constant 3.200000e+01 : f32
    %6 = vector.broadcast %cst_6 : f32 to vector<16x1xf32>
    %7 = arith.divf %5, %6 : vector<16x1xf32>
    %8 = vector.broadcast %7 : vector<16x1xf32> to vector<16x32xf32>
    %9 = arith.subf %1, %8 : vector<16x32xf32>
    %10 = arith.mulf %9, %9 : vector<16x32xf32>
    %cst_7 = arith.constant dense<0.000000e+00> : vector<16xf32>
    %11 = vector.multi_reduction <add>, %10, %cst_7 [1] : vector<16x32xf32> to vector<16xf32>
    %12 = vector.shape_cast %11 : vector<16xf32> to vector<16x1xf32>
    %cst_8 = arith.constant 3.200000e+01 : f32
    %13 = vector.broadcast %cst_8 : f32 to vector<16x1xf32>
    %14 = arith.divf %12, %13 : vector<16x1xf32>
    %15 = vector.broadcast %7 : vector<16x1xf32> to vector<16x32xf32>
    %16 = arith.subf %1, %15 : vector<16x32xf32>
    %cst_9 = arith.constant 9.99999996E-13 : f32
    %17 = vector.broadcast %cst_9 : f32 to vector<16x1xf32>
    %18 = arith.addf %14, %17 : vector<16x1xf32>
    %19 = math.rsqrt %18 : vector<16x1xf32>
    %20 = vector.broadcast %19 : vector<16x1xf32> to vector<16x32xf32>
    %21 = arith.mulf %16, %20 : vector<16x32xf32>
    %22 = vector.broadcast %2 : vector<1x32xf32> to vector<16x32xf32>
    %23 = arith.mulf %21, %22 : vector<16x32xf32>
    %24 = vector.broadcast %3 : vector<1x32xf32> to vector<16x32xf32>
    %25 = arith.addf %23, %24 : vector<16x32xf32>
    %26 = arith.truncf %25 : vector<16x32xf32> to vector<16x32xbf16>
    %c0_10 = arith.constant 0 : index
    %c0_11 = arith.constant 0 : index
    %c0_12 = arith.constant 0 : index
    %27 = vector.load %arg2[%c0_10, %c0_11, %c0_12] : memref<17x32x32xbf16, #tpu.memory_space<vmem>>, vector<1x32x32xbf16>
    %28 = vector.shape_cast %27 : vector<1x32x32xbf16> to vector<32x32xbf16>
    %cst_13 = arith.constant dense<0.000000e+00> : vector<16x32xf32>
    %29 = tpu.matmul %26, %28, %cst_13 {dimension_numbers = #tpu.dot_dimension_numbers<[1], [0], [0], [1], [0, 0, 1, 1], [], []>} : vector<16x32xbf16>, vector<32x32xbf16>, vector<16x32xf32> -> vector<16x32xf32>
    %c2 = arith.constant 2 : index
    %c0_14 = arith.constant 0 : index
    %30 = vector.load %arg5[%c2, %c0_14] : memref<49x64xf32, #tpu.memory_space<vmem>>, vector<1x32xf32>
    %31 = vector.broadcast %30 : vector<1x32xf32> to vector<16x32xf32>
    %32 = arith.addf %29, %31 : vector<16x32xf32>
    %c1_15 = arith.constant 1 : index
    %c0_16 = arith.constant 0 : index
    %c0_17 = arith.constant 0 : index
    %33 = vector.load %arg2[%c1_15, %c0_16, %c0_17] : memref<17x32x32xbf16, #tpu.memory_space<vmem>>, vector<1x32x32xbf16>
    %34 = vector.shape_cast %33 : vector<1x32x32xbf16> to vector<32x32xbf16>
    %cst_18 = arith.constant dense<0.000000e+00> : vector<16x32xf32>
    %35 = tpu.matmul %26, %34, %cst_18 {dimension_numbers = #tpu.dot_dimension_numbers<[1], [0], [0], [1], [0, 0, 1, 1], [], []>} : vector<16x32xbf16>, vector<32x32xbf16>, vector<16x32xf32> -> vector<16x32xf32>
    %c3 = arith.constant 3 : index
    %c0_19 = arith.constant 0 : index
    %36 = vector.load %arg5[%c3, %c0_19] : memref<49x64xf32, #tpu.memory_space<vmem>>, vector<1x32xf32>
    %37 = vector.broadcast %36 : vector<1x32xf32> to vector<16x32xf32>
    %38 = arith.addf %35, %37 : vector<16x32xf32>
    %c2_20 = arith.constant 2 : index
    %c0_21 = arith.constant 0 : index
    %c0_22 = arith.constant 0 : index
    %39 = vector.load %arg2[%c2_20, %c0_21, %c0_22] : memref<17x32x32xbf16, #tpu.memory_space<vmem>>, vector<1x32x32xbf16>
    %40 = vector.shape_cast %39 : vector<1x32x32xbf16> to vector<32x32xbf16>
    %cst_23 = arith.constant dense<0.000000e+00> : vector<16x32xf32>
    %41 = tpu.matmul %26, %40, %cst_23 {dimension_numbers = #tpu.dot_dimension_numbers<[1], [0], [0], [1], [0, 0, 1, 1], [], []>} : vector<16x32xbf16>, vector<32x32xbf16>, vector<16x32xf32> -> vector<16x32xf32>
    %c4 = arith.constant 4 : index
    %c0_24 = arith.constant 0 : index
    %42 = vector.load %arg5[%c4, %c0_24] : memref<49x64xf32, #tpu.memory_space<vmem>>, vector<1x32xf32>
    %43 = vector.broadcast %42 : vector<1x32xf32> to vector<16x32xf32>
    %44 = arith.addf %41, %43 : vector<16x32xf32>
    %45 = arith.truncf %32 : vector<16x32xf32> to vector<16x32xbf16>
    %46 = arith.truncf %38 : vector<16x32xf32> to vector<16x32xbf16>
    %47 = arith.truncf %44 : vector<16x32xf32> to vector<16x32xbf16>
    %48 = vector.extract_strided_slice %45 {offsets = [0, 0], sizes = [16, 16], strides = [1, 1]} : vector<16x32xbf16> to vector<16x16xbf16>
    %49 = vector.extract_strided_slice %46 {offsets = [0, 0], sizes = [16, 16], strides = [1, 1]} : vector<16x32xbf16> to vector<16x16xbf16>
    %cst_25 = arith.constant dense<0.000000e+00> : vector<16x16xf32>
    %50 = tpu.matmul %48, %49, %cst_25 {dimension_numbers = #tpu.dot_dimension_numbers<[1], [1], [0], [0], [0, 0, 1, 0], [], []>} : vector<16x16xbf16>, vector<16x16xbf16>, vector<16x16xf32> -> vector<16x16xf32>
    %51 = arith.addf %50, %0 : vector<16x16xf32>
    %cst_26 = arith.constant dense<0xFF800000> : vector<16xf32>
    %52 = vector.multi_reduction <maximumf>, %51, %cst_26 [1] : vector<16x16xf32> to vector<16xf32>
    %53 = vector.shape_cast %52 : vector<16xf32> to vector<16x1xf32>
    %54 = vector.broadcast %53 : vector<16x1xf32> to vector<16x16xf32>
    %55 = arith.subf %51, %54 : vector<16x16xf32>
    %56 = math.exp %55 : vector<16x16xf32>
    %cst_27 = arith.constant dense<0.000000e+00> : vector<16xf32>
    %57 = vector.multi_reduction <add>, %56, %cst_27 [1] : vector<16x16xf32> to vector<16xf32>
    %58 = vector.shape_cast %57 : vector<16xf32> to vector<16x1xf32>
    %59 = tpu.reciprocal %58 {approx = true} : vector<16x1xf32> -> vector<16x1xf32>
    %60 = vector.broadcast %59 : vector<16x1xf32> to vector<16x16xf32>
    %61 = arith.mulf %56, %60 : vector<16x16xf32>
    %62 = arith.truncf %61 : vector<16x16xf32> to vector<16x16xbf16>
    %63 = vector.extract_strided_slice %47 {offsets = [0, 0], sizes = [16, 16], strides = [1, 1]} : vector<16x32xbf16> to vector<16x16xbf16>
    %cst_28 = arith.constant dense<0.000000e+00> : vector<16x16xf32>
    %64 = tpu.matmul %62, %63, %cst_28 {dimension_numbers = #tpu.dot_dimension_numbers<[1], [0], [0], [1], [0, 0, 1, 1], [], []>} : vector<16x16xbf16>, vector<16x16xbf16>, vector<16x16xf32> -> vector<16x16xf32>
    %65 = vector.extract_strided_slice %45 {offsets = [0, 16], sizes = [16, 16], strides = [1, 1]} : vector<16x32xbf16> to vector<16x16xbf16>
    %66 = vector.extract_strided_slice %46 {offsets = [0, 16], sizes = [16, 16], strides = [1, 1]} : vector<16x32xbf16> to vector<16x16xbf16>
    %cst_29 = arith.constant dense<0.000000e+00> : vector<16x16xf32>
    %67 = tpu.matmul %65, %66, %cst_29 {dimension_numbers = #tpu.dot_dimension_numbers<[1], [1], [0], [0], [0, 0, 1, 0], [], []>} : vector<16x16xbf16>, vector<16x16xbf16>, vector<16x16xf32> -> vector<16x16xf32>
    %68 = arith.addf %67, %0 : vector<16x16xf32>
    %cst_30 = arith.constant dense<0xFF800000> : vector<16xf32>
    %69 = vector.multi_reduction <maximumf>, %68, %cst_30 [1] : vector<16x16xf32> to vector<16xf32>
    %70 = vector.shape_cast %69 : vector<16xf32> to vector<16x1xf32>
    %71 = vector.broadcast %70 : vector<16x1xf32> to vector<16x16xf32>
    %72 = arith.subf %68, %71 : vector<16x16xf32>
    %73 = math.exp %72 : vector<16x16xf32>
    %cst_31 = arith.constant dense<0.000000e+00> : vector<16xf32>
    %74 = vector.multi_reduction <add>, %73, %cst_31 [1] : vector<16x16xf32> to vector<16xf32>
    %75 = vector.shape_cast %74 : vector<16xf32> to vector<16x1xf32>
    %76 = tpu.reciprocal %75 {approx = true} : vector<16x1xf32> -> vector<16x1xf32>
    %77 = vector.broadcast %76 : vector<16x1xf32> to vector<16x16xf32>
    %78 = arith.mulf %73, %77 : vector<16x16xf32>
    %79 = arith.truncf %78 : vector<16x16xf32> to vector<16x16xbf16>
    %80 = vector.extract_strided_slice %47 {offsets = [0, 16], sizes = [16, 16], strides = [1, 1]} : vector<16x32xbf16> to vector<16x16xbf16>
    %cst_32 = arith.constant dense<0.000000e+00> : vector<16x16xf32>
    %81 = tpu.matmul %79, %80, %cst_32 {dimension_numbers = #tpu.dot_dimension_numbers<[1], [0], [0], [1], [0, 0, 1, 1], [], []>} : vector<16x16xbf16>, vector<16x16xbf16>, vector<16x16xf32> -> vector<16x16xf32>
    %82 = tpu.concatenate %64, %81 in 1 : vector<16x16xf32>, vector<16x16xf32> -> vector<16x32xf32>
    %83 = arith.truncf %82 : vector<16x32xf32> to vector<16x32xbf16>
    %c3_33 = arith.constant 3 : index
    %c0_34 = arith.constant 0 : index
    %c0_35 = arith.constant 0 : index
    %84 = vector.load %arg2[%c3_33, %c0_34, %c0_35] : memref<17x32x32xbf16, #tpu.memory_space<vmem>>, vector<1x32x32xbf16>
    %85 = vector.shape_cast %84 : vector<1x32x32xbf16> to vector<32x32xbf16>
    %cst_36 = arith.constant dense<0.000000e+00> : vector<16x32xf32>
    %86 = tpu.matmul %83, %85, %cst_36 {dimension_numbers = #tpu.dot_dimension_numbers<[1], [0], [0], [1], [0, 0, 1, 1], [], []>} : vector<16x32xbf16>, vector<32x32xbf16>, vector<16x32xf32> -> vector<16x32xf32>
    %c5 = arith.constant 5 : index
    %c0_37 = arith.constant 0 : index
    %87 = vector.load %arg5[%c5, %c0_37] : memref<49x64xf32, #tpu.memory_space<vmem>>, vector<1x32xf32>
    %88 = vector.broadcast %87 : vector<1x32xf32> to vector<16x32xf32>
    %89 = arith.addf %86, %88 : vector<16x32xf32>
    %90 = arith.addf %25, %89 : vector<16x32xf32>
    %c6 = arith.constant 6 : index
    %c0_38 = arith.constant 0 : index
    %91 = vector.load %arg5[%c6, %c0_38] : memref<49x64xf32, #tpu.memory_space<vmem>>, vector<1x32xf32>
    %c7 = arith.constant 7 : index
    %c0_39 = arith.constant 0 : index
    %92 = vector.load %arg5[%c7, %c0_39] : memref<49x64xf32, #tpu.memory_space<vmem>>, vector<1x32xf32>
    %cst_40 = arith.constant dense<0.000000e+00> : vector<16xf32>
    %93 = vector.multi_reduction <add>, %90, %cst_40 [1] : vector<16x32xf32> to vector<16xf32>
    %94 = vector.shape_cast %93 : vector<16xf32> to vector<16x1xf32>
    %cst_41 = arith.constant 3.200000e+01 : f32
    %95 = vector.broadcast %cst_41 : f32 to vector<16x1xf32>
    %96 = arith.divf %94, %95 : vector<16x1xf32>
    %97 = vector.broadcast %96 : vector<16x1xf32> to vector<16x32xf32>
    %98 = arith.subf %90, %97 : vector<16x32xf32>
    %99 = arith.mulf %98, %98 : vector<16x32xf32>
    %cst_42 = arith.constant dense<0.000000e+00> : vector<16xf32>
    %100 = vector.multi_reduction <add>, %99, %cst_42 [1] : vector<16x32xf32> to vector<16xf32>
    %101 = vector.shape_cast %100 : vector<16xf32> to vector<16x1xf32>
    %cst_43 = arith.constant 3.200000e+01 : f32
    %102 = vector.broadcast %cst_43 : f32 to vector<16x1xf32>
    %103 = arith.divf %101, %102 : vector<16x1xf32>
    %104 = vector.broadcast %96 : vector<16x1xf32> to vector<16x32xf32>
    %105 = arith.subf %90, %104 : vector<16x32xf32>
    %cst_44 = arith.constant 9.99999996E-13 : f32
    %106 = vector.broadcast %cst_44 : f32 to vector<16x1xf32>
    %107 = arith.addf %103, %106 : vector<16x1xf32>
    %108 = math.rsqrt %107 : vector<16x1xf32>
    %109 = vector.broadcast %108 : vector<16x1xf32> to vector<16x32xf32>
    %110 = arith.mulf %105, %109 : vector<16x32xf32>
    %111 = vector.broadcast %91 : vector<1x32xf32> to vector<16x32xf32>
    %112 = arith.mulf %110, %111 : vector<16x32xf32>
    %113 = vector.broadcast %92 : vector<1x32xf32> to vector<16x32xf32>
    %114 = arith.addf %112, %113 : vector<16x32xf32>
    %115 = arith.truncf %114 : vector<16x32xf32> to vector<16x32xbf16>
    %c0_45 = arith.constant 0 : index
    %c0_46 = arith.constant 0 : index
    %c0_47 = arith.constant 0 : index
    %116 = vector.load %arg3[%c0_45, %c0_46, %c0_47] : memref<4x32x64xbf16, #tpu.memory_space<vmem>>, vector<1x32x64xbf16>
    %117 = vector.shape_cast %116 : vector<1x32x64xbf16> to vector<32x64xbf16>
    %cst_48 = arith.constant dense<0.000000e+00> : vector<16x64xf32>
    %118 = tpu.matmul %115, %117, %cst_48 {dimension_numbers = #tpu.dot_dimension_numbers<[1], [0], [0], [1], [0, 0, 1, 1], [], []>} : vector<16x32xbf16>, vector<32x64xbf16>, vector<16x64xf32> -> vector<16x64xf32>
    %c10 = arith.constant 10 : index
    %c0_49 = arith.constant 0 : index
    %119 = vector.load %arg5[%c10, %c0_49] : memref<49x64xf32, #tpu.memory_space<vmem>>, vector<1x64xf32>
    %120 = vector.broadcast %119 : vector<1x64xf32> to vector<16x64xf32>
    %121 = arith.addf %118, %120 : vector<16x64xf32>
    %122 = arith.mulf %121, %121 : vector<16x64xf32>
    %123 = arith.mulf %121, %122 : vector<16x64xf32>
    %cst_50 = arith.constant 4.471500e-02 : f32
    %124 = vector.broadcast %cst_50 : f32 to vector<16x64xf32>
    %125 = arith.mulf %124, %123 : vector<16x64xf32>
    %126 = arith.addf %121, %125 : vector<16x64xf32>
    %cst_51 = arith.constant 0.797884583 : f32
    %127 = vector.broadcast %cst_51 : f32 to vector<16x64xf32>
    %128 = arith.mulf %127, %126 : vector<16x64xf32>
    %129 = math.tanh %128 : vector<16x64xf32>
    %cst_52 = arith.constant 1.000000e+00 : f32
    %130 = vector.broadcast %cst_52 : f32 to vector<16x64xf32>
    %131 = arith.addf %130, %129 : vector<16x64xf32>
    %cst_53 = arith.constant 5.000000e-01 : f32
    %132 = vector.broadcast %cst_53 : f32 to vector<16x64xf32>
    %133 = arith.mulf %132, %131 : vector<16x64xf32>
    %134 = arith.mulf %121, %133 : vector<16x64xf32>
    %135 = arith.truncf %134 : vector<16x64xf32> to vector<16x64xbf16>
    %c0_54 = arith.constant 0 : index
    %c0_55 = arith.constant 0 : index
    %c0_56 = arith.constant 0 : index
    %136 = vector.load %arg4[%c0_54, %c0_55, %c0_56] : memref<4x64x32xbf16, #tpu.memory_space<vmem>>, vector<1x64x32xbf16>
    %137 = vector.shape_cast %136 : vector<1x64x32xbf16> to vector<64x32xbf16>
    %cst_57 = arith.constant dense<0.000000e+00> : vector<16x32xf32>
    %138 = tpu.matmul %135, %137, %cst_57 {dimension_numbers = #tpu.dot_dimension_numbers<[1], [0], [0], [1], [0, 0, 1, 1], [], []>} : vector<16x64xbf16>, vector<64x32xbf16>, vector<16x32xf32> -> vector<16x32xf32>
    %c11 = arith.constant 11 : index
    %c0_58 = arith.constant 0 : index
    %139 = vector.load %arg5[%c11, %c0_58] : memref<49x64xf32, #tpu.memory_space<vmem>>, vector<1x32xf32>
    %140 = vector.broadcast %139 : vector<1x32xf32> to vector<16x32xf32>
    %141 = arith.addf %138, %140 : vector<16x32xf32>
    %142 = arith.addf %114, %141 : vector<16x32xf32>
    %c8 = arith.constant 8 : index
    %c0_59 = arith.constant 0 : index
    %143 = vector.load %arg5[%c8, %c0_59] : memref<49x64xf32, #tpu.memory_space<vmem>>, vector<1x32xf32>
    %c9 = arith.constant 9 : index
    %c0_60 = arith.constant 0 : index
    %144 = vector.load %arg5[%c9, %c0_60] : memref<49x64xf32, #tpu.memory_space<vmem>>, vector<1x32xf32>
    %cst_61 = arith.constant dense<0.000000e+00> : vector<16xf32>
    %145 = vector.multi_reduction <add>, %142, %cst_61 [1] : vector<16x32xf32> to vector<16xf32>
    %146 = vector.shape_cast %145 : vector<16xf32> to vector<16x1xf32>
    %cst_62 = arith.constant 3.200000e+01 : f32
    %147 = vector.broadcast %cst_62 : f32 to vector<16x1xf32>
    %148 = arith.divf %146, %147 : vector<16x1xf32>
    %149 = vector.broadcast %148 : vector<16x1xf32> to vector<16x32xf32>
    %150 = arith.subf %142, %149 : vector<16x32xf32>
    %151 = arith.mulf %150, %150 : vector<16x32xf32>
    %cst_63 = arith.constant dense<0.000000e+00> : vector<16xf32>
    %152 = vector.multi_reduction <add>, %151, %cst_63 [1] : vector<16x32xf32> to vector<16xf32>
    %153 = vector.shape_cast %152 : vector<16xf32> to vector<16x1xf32>
    %cst_64 = arith.constant 3.200000e+01 : f32
    %154 = vector.broadcast %cst_64 : f32 to vector<16x1xf32>
    %155 = arith.divf %153, %154 : vector<16x1xf32>
    %156 = vector.broadcast %148 : vector<16x1xf32> to vector<16x32xf32>
    %157 = arith.subf %142, %156 : vector<16x32xf32>
    %cst_65 = arith.constant 9.99999996E-13 : f32
    %158 = vector.broadcast %cst_65 : f32 to vector<16x1xf32>
    %159 = arith.addf %155, %158 : vector<16x1xf32>
    %160 = math.rsqrt %159 : vector<16x1xf32>
    %161 = vector.broadcast %160 : vector<16x1xf32> to vector<16x32xf32>
    %162 = arith.mulf %157, %161 : vector<16x32xf32>
    %163 = vector.broadcast %143 : vector<1x32xf32> to vector<16x32xf32>
    %164 = arith.mulf %162, %163 : vector<16x32xf32>
    %165 = vector.broadcast %144 : vector<1x32xf32> to vector<16x32xf32>
    %166 = arith.addf %164, %165 : vector<16x32xf32>
    %167 = arith.truncf %166 : vector<16x32xf32> to vector<16x32xbf16>
    %c4_66 = arith.constant 4 : index
    %c0_67 = arith.constant 0 : index
    %c0_68 = arith.constant 0 : index
    %168 = vector.load %arg2[%c4_66, %c0_67, %c0_68] : memref<17x32x32xbf16, #tpu.memory_space<vmem>>, vector<1x32x32xbf16>
    %169 = vector.shape_cast %168 : vector<1x32x32xbf16> to vector<32x32xbf16>
    %cst_69 = arith.constant dense<0.000000e+00> : vector<16x32xf32>
    %170 = tpu.matmul %167, %169, %cst_69 {dimension_numbers = #tpu.dot_dimension_numbers<[1], [0], [0], [1], [0, 0, 1, 1], [], []>} : vector<16x32xbf16>, vector<32x32xbf16>, vector<16x32xf32> -> vector<16x32xf32>
    %c12 = arith.constant 12 : index
    %c0_70 = arith.constant 0 : index
    %171 = vector.load %arg5[%c12, %c0_70] : memref<49x64xf32, #tpu.memory_space<vmem>>, vector<1x32xf32>
    %172 = vector.broadcast %171 : vector<1x32xf32> to vector<16x32xf32>
    %173 = arith.addf %170, %172 : vector<16x32xf32>
    %c5_71 = arith.constant 5 : index
    %c0_72 = arith.constant 0 : index
    %c0_73 = arith.constant 0 : index
    %174 = vector.load %arg2[%c5_71, %c0_72, %c0_73] : memref<17x32x32xbf16, #tpu.memory_space<vmem>>, vector<1x32x32xbf16>
    %175 = vector.shape_cast %174 : vector<1x32x32xbf16> to vector<32x32xbf16>
    %cst_74 = arith.constant dense<0.000000e+00> : vector<16x32xf32>
    %176 = tpu.matmul %167, %175, %cst_74 {dimension_numbers = #tpu.dot_dimension_numbers<[1], [0], [0], [1], [0, 0, 1, 1], [], []>} : vector<16x32xbf16>, vector<32x32xbf16>, vector<16x32xf32> -> vector<16x32xf32>
    %c13 = arith.constant 13 : index
    %c0_75 = arith.constant 0 : index
    %177 = vector.load %arg5[%c13, %c0_75] : memref<49x64xf32, #tpu.memory_space<vmem>>, vector<1x32xf32>
    %178 = vector.broadcast %177 : vector<1x32xf32> to vector<16x32xf32>
    %179 = arith.addf %176, %178 : vector<16x32xf32>
    %c6_76 = arith.constant 6 : index
    %c0_77 = arith.constant 0 : index
    %c0_78 = arith.constant 0 : index
    %180 = vector.load %arg2[%c6_76, %c0_77, %c0_78] : memref<17x32x32xbf16, #tpu.memory_space<vmem>>, vector<1x32x32xbf16>
    %181 = vector.shape_cast %180 : vector<1x32x32xbf16> to vector<32x32xbf16>
    %cst_79 = arith.constant dense<0.000000e+00> : vector<16x32xf32>
    %182 = tpu.matmul %167, %181, %cst_79 {dimension_numbers = #tpu.dot_dimension_numbers<[1], [0], [0], [1], [0, 0, 1, 1], [], []>} : vector<16x32xbf16>, vector<32x32xbf16>, vector<16x32xf32> -> vector<16x32xf32>
    %c14 = arith.constant 14 : index
    %c0_80 = arith.constant 0 : index
    %183 = vector.load %arg5[%c14, %c0_80] : memref<49x64xf32, #tpu.memory_space<vmem>>, vector<1x32xf32>
    %184 = vector.broadcast %183 : vector<1x32xf32> to vector<16x32xf32>
    %185 = arith.addf %182, %184 : vector<16x32xf32>
    %186 = arith.truncf %173 : vector<16x32xf32> to vector<16x32xbf16>
    %187 = arith.truncf %179 : vector<16x32xf32> to vector<16x32xbf16>
    %188 = arith.truncf %185 : vector<16x32xf32> to vector<16x32xbf16>
    %189 = vector.extract_strided_slice %186 {offsets = [0, 0], sizes = [16, 16], strides = [1, 1]} : vector<16x32xbf16> to vector<16x16xbf16>
    %190 = vector.extract_strided_slice %187 {offsets = [0, 0], sizes = [16, 16], strides = [1, 1]} : vector<16x32xbf16> to vector<16x16xbf16>
    %cst_81 = arith.constant dense<0.000000e+00> : vector<16x16xf32>
    %191 = tpu.matmul %189, %190, %cst_81 {dimension_numbers = #tpu.dot_dimension_numbers<[1], [1], [0], [0], [0, 0, 1, 0], [], []>} : vector<16x16xbf16>, vector<16x16xbf16>, vector<16x16xf32> -> vector<16x16xf32>
    %192 = arith.addf %191, %0 : vector<16x16xf32>
    %cst_82 = arith.constant dense<0xFF800000> : vector<16xf32>
    %193 = vector.multi_reduction <maximumf>, %192, %cst_82 [1] : vector<16x16xf32> to vector<16xf32>
    %194 = vector.shape_cast %193 : vector<16xf32> to vector<16x1xf32>
    %195 = vector.broadcast %194 : vector<16x1xf32> to vector<16x16xf32>
    %196 = arith.subf %192, %195 : vector<16x16xf32>
    %197 = math.exp %196 : vector<16x16xf32>
    %cst_83 = arith.constant dense<0.000000e+00> : vector<16xf32>
    %198 = vector.multi_reduction <add>, %197, %cst_83 [1] : vector<16x16xf32> to vector<16xf32>
    %199 = vector.shape_cast %198 : vector<16xf32> to vector<16x1xf32>
    %200 = tpu.reciprocal %199 {approx = true} : vector<16x1xf32> -> vector<16x1xf32>
    %201 = vector.broadcast %200 : vector<16x1xf32> to vector<16x16xf32>
    %202 = arith.mulf %197, %201 : vector<16x16xf32>
    %203 = arith.truncf %202 : vector<16x16xf32> to vector<16x16xbf16>
    %204 = vector.extract_strided_slice %188 {offsets = [0, 0], sizes = [16, 16], strides = [1, 1]} : vector<16x32xbf16> to vector<16x16xbf16>
    %cst_84 = arith.constant dense<0.000000e+00> : vector<16x16xf32>
    %205 = tpu.matmul %203, %204, %cst_84 {dimension_numbers = #tpu.dot_dimension_numbers<[1], [0], [0], [1], [0, 0, 1, 1], [], []>} : vector<16x16xbf16>, vector<16x16xbf16>, vector<16x16xf32> -> vector<16x16xf32>
    %206 = vector.extract_strided_slice %186 {offsets = [0, 16], sizes = [16, 16], strides = [1, 1]} : vector<16x32xbf16> to vector<16x16xbf16>
    %207 = vector.extract_strided_slice %187 {offsets = [0, 16], sizes = [16, 16], strides = [1, 1]} : vector<16x32xbf16> to vector<16x16xbf16>
    %cst_85 = arith.constant dense<0.000000e+00> : vector<16x16xf32>
    %208 = tpu.matmul %206, %207, %cst_85 {dimension_numbers = #tpu.dot_dimension_numbers<[1], [1], [0], [0], [0, 0, 1, 0], [], []>} : vector<16x16xbf16>, vector<16x16xbf16>, vector<16x16xf32> -> vector<16x16xf32>
    %209 = arith.addf %208, %0 : vector<16x16xf32>
    %cst_86 = arith.constant dense<0xFF800000> : vector<16xf32>
    %210 = vector.multi_reduction <maximumf>, %209, %cst_86 [1] : vector<16x16xf32> to vector<16xf32>
    %211 = vector.shape_cast %210 : vector<16xf32> to vector<16x1xf32>
    %212 = vector.broadcast %211 : vector<16x1xf32> to vector<16x16xf32>
    %213 = arith.subf %209, %212 : vector<16x16xf32>
    %214 = math.exp %213 : vector<16x16xf32>
    %cst_87 = arith.constant dense<0.000000e+00> : vector<16xf32>
    %215 = vector.multi_reduction <add>, %214, %cst_87 [1] : vector<16x16xf32> to vector<16xf32>
    %216 = vector.shape_cast %215 : vector<16xf32> to vector<16x1xf32>
    %217 = tpu.reciprocal %216 {approx = true} : vector<16x1xf32> -> vector<16x1xf32>
    %218 = vector.broadcast %217 : vector<16x1xf32> to vector<16x16xf32>
    %219 = arith.mulf %214, %218 : vector<16x16xf32>
    %220 = arith.truncf %219 : vector<16x16xf32> to vector<16x16xbf16>
    %221 = vector.extract_strided_slice %188 {offsets = [0, 16], sizes = [16, 16], strides = [1, 1]} : vector<16x32xbf16> to vector<16x16xbf16>
    %cst_88 = arith.constant dense<0.000000e+00> : vector<16x16xf32>
    %222 = tpu.matmul %220, %221, %cst_88 {dimension_numbers = #tpu.dot_dimension_numbers<[1], [0], [0], [1], [0, 0, 1, 1], [], []>} : vector<16x16xbf16>, vector<16x16xbf16>, vector<16x16xf32> -> vector<16x16xf32>
    %223 = tpu.concatenate %205, %222 in 1 : vector<16x16xf32>, vector<16x16xf32> -> vector<16x32xf32>
    %224 = arith.truncf %223 : vector<16x32xf32> to vector<16x32xbf16>
    %c7_89 = arith.constant 7 : index
    %c0_90 = arith.constant 0 : index
    %c0_91 = arith.constant 0 : index
    %225 = vector.load %arg2[%c7_89, %c0_90, %c0_91] : memref<17x32x32xbf16, #tpu.memory_space<vmem>>, vector<1x32x32xbf16>
    %226 = vector.shape_cast %225 : vector<1x32x32xbf16> to vector<32x32xbf16>
    %cst_92 = arith.constant dense<0.000000e+00> : vector<16x32xf32>
    %227 = tpu.matmul %224, %226, %cst_92 {dimension_numbers = #tpu.dot_dimension_numbers<[1], [0], [0], [1], [0, 0, 1, 1], [], []>} : vector<16x32xbf16>, vector<32x32xbf16>, vector<16x32xf32> -> vector<16x32xf32>
    %c15 = arith.constant 15 : index
    %c0_93 = arith.constant 0 : index
    %228 = vector.load %arg5[%c15, %c0_93] : memref<49x64xf32, #tpu.memory_space<vmem>>, vector<1x32xf32>
    %229 = vector.broadcast %228 : vector<1x32xf32> to vector<16x32xf32>
    %230 = arith.addf %227, %229 : vector<16x32xf32>
    %231 = arith.addf %166, %230 : vector<16x32xf32>
    %c16 = arith.constant 16 : index
    %c0_94 = arith.constant 0 : index
    %232 = vector.load %arg5[%c16, %c0_94] : memref<49x64xf32, #tpu.memory_space<vmem>>, vector<1x32xf32>
    %c17 = arith.constant 17 : index
    %c0_95 = arith.constant 0 : index
    %233 = vector.load %arg5[%c17, %c0_95] : memref<49x64xf32, #tpu.memory_space<vmem>>, vector<1x32xf32>
    %cst_96 = arith.constant dense<0.000000e+00> : vector<16xf32>
    %234 = vector.multi_reduction <add>, %231, %cst_96 [1] : vector<16x32xf32> to vector<16xf32>
    %235 = vector.shape_cast %234 : vector<16xf32> to vector<16x1xf32>
    %cst_97 = arith.constant 3.200000e+01 : f32
    %236 = vector.broadcast %cst_97 : f32 to vector<16x1xf32>
    %237 = arith.divf %235, %236 : vector<16x1xf32>
    %238 = vector.broadcast %237 : vector<16x1xf32> to vector<16x32xf32>
    %239 = arith.subf %231, %238 : vector<16x32xf32>
    %240 = arith.mulf %239, %239 : vector<16x32xf32>
    %cst_98 = arith.constant dense<0.000000e+00> : vector<16xf32>
    %241 = vector.multi_reduction <add>, %240, %cst_98 [1] : vector<16x32xf32> to vector<16xf32>
    %242 = vector.shape_cast %241 : vector<16xf32> to vector<16x1xf32>
    %cst_99 = arith.constant 3.200000e+01 : f32
    %243 = vector.broadcast %cst_99 : f32 to vector<16x1xf32>
    %244 = arith.divf %242, %243 : vector<16x1xf32>
    %245 = vector.broadcast %237 : vector<16x1xf32> to vector<16x32xf32>
    %246 = arith.subf %231, %245 : vector<16x32xf32>
    %cst_100 = arith.constant 9.99999996E-13 : f32
    %247 = vector.broadcast %cst_100 : f32 to vector<16x1xf32>
    %248 = arith.addf %244, %247 : vector<16x1xf32>
    %249 = math.rsqrt %248 : vector<16x1xf32>
    %250 = vector.broadcast %249 : vector<16x1xf32> to vector<16x32xf32>
    %251 = arith.mulf %246, %250 : vector<16x32xf32>
    %252 = vector.broadcast %232 : vector<1x32xf32> to vector<16x32xf32>
    %253 = arith.mulf %251, %252 : vector<16x32xf32>
    %254 = vector.broadcast %233 : vector<1x32xf32> to vector<16x32xf32>
    %255 = arith.addf %253, %254 : vector<16x32xf32>
    %256 = arith.truncf %255 : vector<16x32xf32> to vector<16x32xbf16>
    %c1_101 = arith.constant 1 : index
    %c0_102 = arith.constant 0 : index
    %c0_103 = arith.constant 0 : index
    %257 = vector.load %arg3[%c1_101, %c0_102, %c0_103] : memref<4x32x64xbf16, #tpu.memory_space<vmem>>, vector<1x32x64xbf16>
    %258 = vector.shape_cast %257 : vector<1x32x64xbf16> to vector<32x64xbf16>
    %cst_104 = arith.constant dense<0.000000e+00> : vector<16x64xf32>
    %259 = tpu.matmul %256, %258, %cst_104 {dimension_numbers = #tpu.dot_dimension_numbers<[1], [0], [0], [1], [0, 0, 1, 1], [], []>} : vector<16x32xbf16>, vector<32x64xbf16>, vector<16x64xf32> -> vector<16x64xf32>
    %c20 = arith.constant 20 : index
    %c0_105 = arith.constant 0 : index
    %260 = vector.load %arg5[%c20, %c0_105] : memref<49x64xf32, #tpu.memory_space<vmem>>, vector<1x64xf32>
    %261 = vector.broadcast %260 : vector<1x64xf32> to vector<16x64xf32>
    %262 = arith.addf %259, %261 : vector<16x64xf32>
    %263 = arith.mulf %262, %262 : vector<16x64xf32>
    %264 = arith.mulf %262, %263 : vector<16x64xf32>
    %cst_106 = arith.constant 4.471500e-02 : f32
    %265 = vector.broadcast %cst_106 : f32 to vector<16x64xf32>
    %266 = arith.mulf %265, %264 : vector<16x64xf32>
    %267 = arith.addf %262, %266 : vector<16x64xf32>
    %cst_107 = arith.constant 0.797884583 : f32
    %268 = vector.broadcast %cst_107 : f32 to vector<16x64xf32>
    %269 = arith.mulf %268, %267 : vector<16x64xf32>
    %270 = math.tanh %269 : vector<16x64xf32>
    %cst_108 = arith.constant 1.000000e+00 : f32
    %271 = vector.broadcast %cst_108 : f32 to vector<16x64xf32>
    %272 = arith.addf %271, %270 : vector<16x64xf32>
    %cst_109 = arith.constant 5.000000e-01 : f32
    %273 = vector.broadcast %cst_109 : f32 to vector<16x64xf32>
    %274 = arith.mulf %273, %272 : vector<16x64xf32>
    %275 = arith.mulf %262, %274 : vector<16x64xf32>
    %276 = arith.truncf %275 : vector<16x64xf32> to vector<16x64xbf16>
    %c1_110 = arith.constant 1 : index
    %c0_111 = arith.constant 0 : index
    %c0_112 = arith.constant 0 : index
    %277 = vector.load %arg4[%c1_110, %c0_111, %c0_112] : memref<4x64x32xbf16, #tpu.memory_space<vmem>>, vector<1x64x32xbf16>
    %278 = vector.shape_cast %277 : vector<1x64x32xbf16> to vector<64x32xbf16>
    %cst_113 = arith.constant dense<0.000000e+00> : vector<16x32xf32>
    %279 = tpu.matmul %276, %278, %cst_113 {dimension_numbers = #tpu.dot_dimension_numbers<[1], [0], [0], [1], [0, 0, 1, 1], [], []>} : vector<16x64xbf16>, vector<64x32xbf16>, vector<16x32xf32> -> vector<16x32xf32>
    %c21 = arith.constant 21 : index
    %c0_114 = arith.constant 0 : index
    %280 = vector.load %arg5[%c21, %c0_114] : memref<49x64xf32, #tpu.memory_space<vmem>>, vector<1x32xf32>
    %281 = vector.broadcast %280 : vector<1x32xf32> to vector<16x32xf32>
    %282 = arith.addf %279, %281 : vector<16x32xf32>
    %283 = arith.addf %255, %282 : vector<16x32xf32>
    %c18 = arith.constant 18 : index
    %c0_115 = arith.constant 0 : index
    %284 = vector.load %arg5[%c18, %c0_115] : memref<49x64xf32, #tpu.memory_space<vmem>>, vector<1x32xf32>
    %c19 = arith.constant 19 : index
    %c0_116 = arith.constant 0 : index
    %285 = vector.load %arg5[%c19, %c0_116] : memref<49x64xf32, #tpu.memory_space<vmem>>, vector<1x32xf32>
    %cst_117 = arith.constant dense<0.000000e+00> : vector<16xf32>
    %286 = vector.multi_reduction <add>, %283, %cst_117 [1] : vector<16x32xf32> to vector<16xf32>
    %287 = vector.shape_cast %286 : vector<16xf32> to vector<16x1xf32>
    %cst_118 = arith.constant 3.200000e+01 : f32
    %288 = vector.broadcast %cst_118 : f32 to vector<16x1xf32>
    %289 = arith.divf %287, %288 : vector<16x1xf32>
    %290 = vector.broadcast %289 : vector<16x1xf32> to vector<16x32xf32>
    %291 = arith.subf %283, %290 : vector<16x32xf32>
    %292 = arith.mulf %291, %291 : vector<16x32xf32>
    %cst_119 = arith.constant dense<0.000000e+00> : vector<16xf32>
    %293 = vector.multi_reduction <add>, %292, %cst_119 [1] : vector<16x32xf32> to vector<16xf32>
    %294 = vector.shape_cast %293 : vector<16xf32> to vector<16x1xf32>
    %cst_120 = arith.constant 3.200000e+01 : f32
    %295 = vector.broadcast %cst_120 : f32 to vector<16x1xf32>
    %296 = arith.divf %294, %295 : vector<16x1xf32>
    %297 = vector.broadcast %289 : vector<16x1xf32> to vector<16x32xf32>
    %298 = arith.subf %283, %297 : vector<16x32xf32>
    %cst_121 = arith.constant 9.99999996E-13 : f32
    %299 = vector.broadcast %cst_121 : f32 to vector<16x1xf32>
    %300 = arith.addf %296, %299 : vector<16x1xf32>
    %301 = math.rsqrt %300 : vector<16x1xf32>
    %302 = vector.broadcast %301 : vector<16x1xf32> to vector<16x32xf32>
    %303 = arith.mulf %298, %302 : vector<16x32xf32>
    %304 = vector.broadcast %284 : vector<1x32xf32> to vector<16x32xf32>
    %305 = arith.mulf %303, %304 : vector<16x32xf32>
    %306 = vector.broadcast %285 : vector<1x32xf32> to vector<16x32xf32>
    %307 = arith.addf %305, %306 : vector<16x32xf32>
    %308 = tpu.iota {dimensions = array<i32: 0>} : vector<2x16xi32>
    %c8_i32 = arith.constant 8 : i32
    %309 = vector.broadcast %c8_i32 : i32 to vector<2x16xi32>
    %310 = arith.muli %308, %309 : vector<2x16xi32>
    %311 = tpu.iota {dimensions = array<i32: 1>} : vector<2x16xi32>
    %312 = arith.cmpi eq, %310, %311 : vector<2x16xi32>
    %313 = arith.extui %312 : vector<2x16xi1> to vector<2x16xi32>
    %314 = arith.sitofp %313 : vector<2x16xi32> to vector<2x16xf32>
    %cst_122 = arith.constant dense<0.000000e+00> : vector<2x32xf32>
    %315 = tpu.matmul %314, %307, %cst_122 {dimension_numbers = #tpu.dot_dimension_numbers<[1], [0], [0], [1], [0, 0, 1, 1], [], []>} : vector<2x16xf32>, vector<16x32xf32>, vector<2x32xf32> -> vector<2x32xf32>
    %316 = arith.truncf %315 : vector<2x32xf32> to vector<2x32xbf16>
    %c16_123 = arith.constant 16 : index
    %c0_124 = arith.constant 0 : index
    %c0_125 = arith.constant 0 : index
    %317 = vector.load %arg2[%c16_123, %c0_124, %c0_125] : memref<17x32x32xbf16, #tpu.memory_space<vmem>>, vector<1x32x32xbf16>
    %318 = vector.shape_cast %317 : vector<1x32x32xbf16> to vector<32x32xbf16>
    %cst_126 = arith.constant dense<0.000000e+00> : vector<2x32xf32>
    %319 = tpu.matmul %316, %318, %cst_126 {dimension_numbers = #tpu.dot_dimension_numbers<[1], [0], [0], [1], [0, 0, 1, 1], [], []>} : vector<2x32xbf16>, vector<32x32xbf16>, vector<2x32xf32> -> vector<2x32xf32>
    %c42 = arith.constant 42 : index
    %c0_127 = arith.constant 0 : index
    %320 = vector.load %arg5[%c42, %c0_127] : memref<49x64xf32, #tpu.memory_space<vmem>>, vector<1x32xf32>
    %321 = vector.broadcast %320 : vector<1x32xf32> to vector<2x32xf32>
    %322 = arith.addf %319, %321 : vector<2x32xf32>
    %323 = arith.mulf %322, %322 : vector<2x32xf32>
    %324 = arith.mulf %322, %323 : vector<2x32xf32>
    %cst_128 = arith.constant 4.471500e-02 : f32
    %325 = vector.broadcast %cst_128 : f32 to vector<2x32xf32>
    %326 = arith.mulf %325, %324 : vector<2x32xf32>
    %327 = arith.addf %322, %326 : vector<2x32xf32>
    %cst_129 = arith.constant 0.797884583 : f32
    %328 = vector.broadcast %cst_129 : f32 to vector<2x32xf32>
    %329 = arith.mulf %328, %327 : vector<2x32xf32>
    %330 = math.tanh %329 : vector<2x32xf32>
    %cst_130 = arith.constant 1.000000e+00 : f32
    %331 = vector.broadcast %cst_130 : f32 to vector<2x32xf32>
    %332 = arith.addf %331, %330 : vector<2x32xf32>
    %cst_131 = arith.constant 5.000000e-01 : f32
    %333 = vector.broadcast %cst_131 : f32 to vector<2x32xf32>
    %334 = arith.mulf %333, %332 : vector<2x32xf32>
    %335 = arith.mulf %322, %334 : vector<2x32xf32>
    %c43 = arith.constant 43 : index
    %c0_132 = arith.constant 0 : index
    %336 = vector.load %arg5[%c43, %c0_132] : memref<49x64xf32, #tpu.memory_space<vmem>>, vector<1x32xf32>
    %337 = vector.broadcast %336 : vector<1x32xf32> to vector<2x32xf32>
    %338 = arith.mulf %335, %337 : vector<2x32xf32>
    %cst_133 = arith.constant dense<0.000000e+00> : vector<2xf32>
    %339 = vector.multi_reduction <add>, %338, %cst_133 [1] : vector<2x32xf32> to vector<2xf32>
    %340 = vector.shape_cast %339 : vector<2xf32> to vector<2x1xf32>
    %c46 = arith.constant 46 : index
    %c0_134 = arith.constant 0 : index
    %341 = vector.load %arg5[%c46, %c0_134] : memref<49x64xf32, #tpu.memory_space<vmem>>, vector<1x1xf32>
    %342 = vector.broadcast %341 : vector<1x1xf32> to vector<2x1xf32>
    %343 = arith.addf %340, %342 : vector<2x1xf32>
    %344 = arith.negf %343 : vector<2x1xf32>
    %345 = math.exp %344 : vector<2x1xf32>
    %cst_135 = arith.constant 1.000000e+00 : f32
    %346 = vector.broadcast %cst_135 : f32 to vector<2x1xf32>
    %347 = arith.addf %346, %345 : vector<2x1xf32>
    %348 = arith.divf %346, %347 : vector<2x1xf32>
    %349 = arith.truncf %307 : vector<16x32xf32> to vector<16x32xbf16>
    %c8_136 = arith.constant 8 : index
    %c0_137 = arith.constant 0 : index
    %c0_138 = arith.constant 0 : index
    %350 = vector.load %arg2[%c8_136, %c0_137, %c0_138] : memref<17x32x32xbf16, #tpu.memory_space<vmem>>, vector<1x32x32xbf16>
    %351 = vector.shape_cast %350 : vector<1x32x32xbf16> to vector<32x32xbf16>
    %cst_139 = arith.constant dense<0.000000e+00> : vector<16x32xf32>
    %352 = tpu.matmul %349, %351, %cst_139 {dimension_numbers = #tpu.dot_dimension_numbers<[1], [0], [0], [1], [0, 0, 1, 1], [], []>} : vector<16x32xbf16>, vector<32x32xbf16>, vector<16x32xf32> -> vector<16x32xf32>
    %c22 = arith.constant 22 : index
    %c0_140 = arith.constant 0 : index
    %353 = vector.load %arg5[%c22, %c0_140] : memref<49x64xf32, #tpu.memory_space<vmem>>, vector<1x32xf32>
    %354 = vector.broadcast %353 : vector<1x32xf32> to vector<16x32xf32>
    %355 = arith.addf %352, %354 : vector<16x32xf32>
    %c9_141 = arith.constant 9 : index
    %c0_142 = arith.constant 0 : index
    %c0_143 = arith.constant 0 : index
    %356 = vector.load %arg2[%c9_141, %c0_142, %c0_143] : memref<17x32x32xbf16, #tpu.memory_space<vmem>>, vector<1x32x32xbf16>
    %357 = vector.shape_cast %356 : vector<1x32x32xbf16> to vector<32x32xbf16>
    %cst_144 = arith.constant dense<0.000000e+00> : vector<16x32xf32>
    %358 = tpu.matmul %349, %357, %cst_144 {dimension_numbers = #tpu.dot_dimension_numbers<[1], [0], [0], [1], [0, 0, 1, 1], [], []>} : vector<16x32xbf16>, vector<32x32xbf16>, vector<16x32xf32> -> vector<16x32xf32>
    %c23 = arith.constant 23 : index
    %c0_145 = arith.constant 0 : index
    %359 = vector.load %arg5[%c23, %c0_145] : memref<49x64xf32, #tpu.memory_space<vmem>>, vector<1x32xf32>
    %360 = vector.broadcast %359 : vector<1x32xf32> to vector<16x32xf32>
    %361 = arith.addf %358, %360 : vector<16x32xf32>
    %c10_146 = arith.constant 10 : index
    %c0_147 = arith.constant 0 : index
    %c0_148 = arith.constant 0 : index
    %362 = vector.load %arg2[%c10_146, %c0_147, %c0_148] : memref<17x32x32xbf16, #tpu.memory_space<vmem>>, vector<1x32x32xbf16>
    %363 = vector.shape_cast %362 : vector<1x32x32xbf16> to vector<32x32xbf16>
    %cst_149 = arith.constant dense<0.000000e+00> : vector<16x32xf32>
    %364 = tpu.matmul %349, %363, %cst_149 {dimension_numbers = #tpu.dot_dimension_numbers<[1], [0], [0], [1], [0, 0, 1, 1], [], []>} : vector<16x32xbf16>, vector<32x32xbf16>, vector<16x32xf32> -> vector<16x32xf32>
    %c24 = arith.constant 24 : index
    %c0_150 = arith.constant 0 : index
    %365 = vector.load %arg5[%c24, %c0_150] : memref<49x64xf32, #tpu.memory_space<vmem>>, vector<1x32xf32>
    %366 = vector.broadcast %365 : vector<1x32xf32> to vector<16x32xf32>
    %367 = arith.addf %364, %366 : vector<16x32xf32>
    %368 = arith.truncf %355 : vector<16x32xf32> to vector<16x32xbf16>
    %369 = arith.truncf %361 : vector<16x32xf32> to vector<16x32xbf16>
    %370 = arith.truncf %367 : vector<16x32xf32> to vector<16x32xbf16>
    %cst_151 = arith.constant dense<0.000000e+00> : vector<16x16xf32>
    %371 = tpu.matmul %368, %369, %cst_151 {dimension_numbers = #tpu.dot_dimension_numbers<[1], [1], [0], [0], [0, 0, 1, 0], [], []>} : vector<16x32xbf16>, vector<16x32xbf16>, vector<16x16xf32> -> vector<16x16xf32>
    %372 = arith.addf %371, %0 : vector<16x16xf32>
    %cst_152 = arith.constant dense<0xFF800000> : vector<16xf32>
    %373 = vector.multi_reduction <maximumf>, %372, %cst_152 [1] : vector<16x16xf32> to vector<16xf32>
    %374 = vector.shape_cast %373 : vector<16xf32> to vector<16x1xf32>
    %375 = vector.broadcast %374 : vector<16x1xf32> to vector<16x16xf32>
    %376 = arith.subf %372, %375 : vector<16x16xf32>
    %377 = math.exp %376 : vector<16x16xf32>
    %cst_153 = arith.constant dense<0.000000e+00> : vector<16xf32>
    %378 = vector.multi_reduction <add>, %377, %cst_153 [1] : vector<16x16xf32> to vector<16xf32>
    %379 = vector.shape_cast %378 : vector<16xf32> to vector<16x1xf32>
    %380 = tpu.reciprocal %379 {approx = true} : vector<16x1xf32> -> vector<16x1xf32>
    %381 = vector.broadcast %380 : vector<16x1xf32> to vector<16x16xf32>
    %382 = arith.mulf %377, %381 : vector<16x16xf32>
    %383 = arith.truncf %382 : vector<16x16xf32> to vector<16x16xbf16>
    %cst_154 = arith.constant dense<0.000000e+00> : vector<16x32xf32>
    %384 = tpu.matmul %383, %370, %cst_154 {dimension_numbers = #tpu.dot_dimension_numbers<[1], [0], [0], [1], [0, 0, 1, 1], [], []>} : vector<16x16xbf16>, vector<16x32xbf16>, vector<16x32xf32> -> vector<16x32xf32>
    %385 = arith.truncf %384 : vector<16x32xf32> to vector<16x32xbf16>
    %c11_155 = arith.constant 11 : index
    %c0_156 = arith.constant 0 : index
    %c0_157 = arith.constant 0 : index
    %386 = vector.load %arg2[%c11_155, %c0_156, %c0_157] : memref<17x32x32xbf16, #tpu.memory_space<vmem>>, vector<1x32x32xbf16>
    %387 = vector.shape_cast %386 : vector<1x32x32xbf16> to vector<32x32xbf16>
    %cst_158 = arith.constant dense<0.000000e+00> : vector<16x32xf32>
    %388 = tpu.matmul %385, %387, %cst_158 {dimension_numbers = #tpu.dot_dimension_numbers<[1], [0], [0], [1], [0, 0, 1, 1], [], []>} : vector<16x32xbf16>, vector<32x32xbf16>, vector<16x32xf32> -> vector<16x32xf32>
    %c25 = arith.constant 25 : index
    %c0_159 = arith.constant 0 : index
    %389 = vector.load %arg5[%c25, %c0_159] : memref<49x64xf32, #tpu.memory_space<vmem>>, vector<1x32xf32>
    %390 = vector.broadcast %389 : vector<1x32xf32> to vector<16x32xf32>
    %391 = arith.addf %388, %390 : vector<16x32xf32>
    %392 = arith.addf %307, %391 : vector<16x32xf32>
    %c26 = arith.constant 26 : index
    %c0_160 = arith.constant 0 : index
    %393 = vector.load %arg5[%c26, %c0_160] : memref<49x64xf32, #tpu.memory_space<vmem>>, vector<1x32xf32>
    %c27 = arith.constant 27 : index
    %c0_161 = arith.constant 0 : index
    %394 = vector.load %arg5[%c27, %c0_161] : memref<49x64xf32, #tpu.memory_space<vmem>>, vector<1x32xf32>
    %cst_162 = arith.constant dense<0.000000e+00> : vector<16xf32>
    %395 = vector.multi_reduction <add>, %392, %cst_162 [1] : vector<16x32xf32> to vector<16xf32>
    %396 = vector.shape_cast %395 : vector<16xf32> to vector<16x1xf32>
    %cst_163 = arith.constant 3.200000e+01 : f32
    %397 = vector.broadcast %cst_163 : f32 to vector<16x1xf32>
    %398 = arith.divf %396, %397 : vector<16x1xf32>
    %399 = vector.broadcast %398 : vector<16x1xf32> to vector<16x32xf32>
    %400 = arith.subf %392, %399 : vector<16x32xf32>
    %401 = arith.mulf %400, %400 : vector<16x32xf32>
    %cst_164 = arith.constant dense<0.000000e+00> : vector<16xf32>
    %402 = vector.multi_reduction <add>, %401, %cst_164 [1] : vector<16x32xf32> to vector<16xf32>
    %403 = vector.shape_cast %402 : vector<16xf32> to vector<16x1xf32>
    %cst_165 = arith.constant 3.200000e+01 : f32
    %404 = vector.broadcast %cst_165 : f32 to vector<16x1xf32>
    %405 = arith.divf %403, %404 : vector<16x1xf32>
    %406 = vector.broadcast %398 : vector<16x1xf32> to vector<16x32xf32>
    %407 = arith.subf %392, %406 : vector<16x32xf32>
    %cst_166 = arith.constant 9.99999974E-6 : f32
    %408 = vector.broadcast %cst_166 : f32 to vector<16x1xf32>
    %409 = arith.addf %405, %408 : vector<16x1xf32>
    %410 = math.rsqrt %409 : vector<16x1xf32>
    %411 = vector.broadcast %410 : vector<16x1xf32> to vector<16x32xf32>
    %412 = arith.mulf %407, %411 : vector<16x32xf32>
    %413 = vector.broadcast %393 : vector<1x32xf32> to vector<16x32xf32>
    %414 = arith.mulf %412, %413 : vector<16x32xf32>
    %415 = vector.broadcast %394 : vector<1x32xf32> to vector<16x32xf32>
    %416 = arith.addf %414, %415 : vector<16x32xf32>
    %417 = arith.truncf %416 : vector<16x32xf32> to vector<16x32xbf16>
    %c2_167 = arith.constant 2 : index
    %c0_168 = arith.constant 0 : index
    %c0_169 = arith.constant 0 : index
    %418 = vector.load %arg3[%c2_167, %c0_168, %c0_169] : memref<4x32x64xbf16, #tpu.memory_space<vmem>>, vector<1x32x64xbf16>
    %419 = vector.shape_cast %418 : vector<1x32x64xbf16> to vector<32x64xbf16>
    %cst_170 = arith.constant dense<0.000000e+00> : vector<16x64xf32>
    %420 = tpu.matmul %417, %419, %cst_170 {dimension_numbers = #tpu.dot_dimension_numbers<[1], [0], [0], [1], [0, 0, 1, 1], [], []>} : vector<16x32xbf16>, vector<32x64xbf16>, vector<16x64xf32> -> vector<16x64xf32>
    %c30 = arith.constant 30 : index
    %c0_171 = arith.constant 0 : index
    %421 = vector.load %arg5[%c30, %c0_171] : memref<49x64xf32, #tpu.memory_space<vmem>>, vector<1x64xf32>
    %422 = vector.broadcast %421 : vector<1x64xf32> to vector<16x64xf32>
    %423 = arith.addf %420, %422 : vector<16x64xf32>
    %cst_172 = arith.constant 0.000000e+00 : f32
    %424 = vector.broadcast %cst_172 : f32 to vector<16x64xf32>
    %425 = arith.maximumf %423, %424 : vector<16x64xf32>
    %426 = arith.truncf %425 : vector<16x64xf32> to vector<16x64xbf16>
    %c2_173 = arith.constant 2 : index
    %c0_174 = arith.constant 0 : index
    %c0_175 = arith.constant 0 : index
    %427 = vector.load %arg4[%c2_173, %c0_174, %c0_175] : memref<4x64x32xbf16, #tpu.memory_space<vmem>>, vector<1x64x32xbf16>
    %428 = vector.shape_cast %427 : vector<1x64x32xbf16> to vector<64x32xbf16>
    %cst_176 = arith.constant dense<0.000000e+00> : vector<16x32xf32>
    %429 = tpu.matmul %426, %428, %cst_176 {dimension_numbers = #tpu.dot_dimension_numbers<[1], [0], [0], [1], [0, 0, 1, 1], [], []>} : vector<16x64xbf16>, vector<64x32xbf16>, vector<16x32xf32> -> vector<16x32xf32>
    %c31 = arith.constant 31 : index
    %c0_177 = arith.constant 0 : index
    %430 = vector.load %arg5[%c31, %c0_177] : memref<49x64xf32, #tpu.memory_space<vmem>>, vector<1x32xf32>
    %431 = vector.broadcast %430 : vector<1x32xf32> to vector<16x32xf32>
    %432 = arith.addf %429, %431 : vector<16x32xf32>
    %433 = arith.addf %416, %432 : vector<16x32xf32>
    %c28 = arith.constant 28 : index
    %c0_178 = arith.constant 0 : index
    %434 = vector.load %arg5[%c28, %c0_178] : memref<49x64xf32, #tpu.memory_space<vmem>>, vector<1x32xf32>
    %c29 = arith.constant 29 : index
    %c0_179 = arith.constant 0 : index
    %435 = vector.load %arg5[%c29, %c0_179] : memref<49x64xf32, #tpu.memory_space<vmem>>, vector<1x32xf32>
    %cst_180 = arith.constant dense<0.000000e+00> : vector<16xf32>
    %436 = vector.multi_reduction <add>, %433, %cst_180 [1] : vector<16x32xf32> to vector<16xf32>
    %437 = vector.shape_cast %436 : vector<16xf32> to vector<16x1xf32>
    %cst_181 = arith.constant 3.200000e+01 : f32
    %438 = vector.broadcast %cst_181 : f32 to vector<16x1xf32>
    %439 = arith.divf %437, %438 : vector<16x1xf32>
    %440 = vector.broadcast %439 : vector<16x1xf32> to vector<16x32xf32>
    %441 = arith.subf %433, %440 : vector<16x32xf32>
    %442 = arith.mulf %441, %441 : vector<16x32xf32>
    %cst_182 = arith.constant dense<0.000000e+00> : vector<16xf32>
    %443 = vector.multi_reduction <add>, %442, %cst_182 [1] : vector<16x32xf32> to vector<16xf32>
    %444 = vector.shape_cast %443 : vector<16xf32> to vector<16x1xf32>
    %cst_183 = arith.constant 3.200000e+01 : f32
    %445 = vector.broadcast %cst_183 : f32 to vector<16x1xf32>
    %446 = arith.divf %444, %445 : vector<16x1xf32>
    %447 = vector.broadcast %439 : vector<16x1xf32> to vector<16x32xf32>
    %448 = arith.subf %433, %447 : vector<16x32xf32>
    %cst_184 = arith.constant 9.99999974E-6 : f32
    %449 = vector.broadcast %cst_184 : f32 to vector<16x1xf32>
    %450 = arith.addf %446, %449 : vector<16x1xf32>
    %451 = math.rsqrt %450 : vector<16x1xf32>
    %452 = vector.broadcast %451 : vector<16x1xf32> to vector<16x32xf32>
    %453 = arith.mulf %448, %452 : vector<16x32xf32>
    %454 = vector.broadcast %434 : vector<1x32xf32> to vector<16x32xf32>
    %455 = arith.mulf %453, %454 : vector<16x32xf32>
    %456 = vector.broadcast %435 : vector<1x32xf32> to vector<16x32xf32>
    %457 = arith.addf %455, %456 : vector<16x32xf32>
    %458 = vector.shape_cast %457 : vector<16x32xf32> to vector<2x8x32xf32>
    %c44 = arith.constant 44 : index
    %c0_185 = arith.constant 0 : index
    %459 = vector.load %arg5[%c44, %c0_185] : memref<49x64xf32, #tpu.memory_space<vmem>>, vector<1x32xf32>
    %460 = vector.shape_cast %459 : vector<1x32xf32> to vector<1x1x32xf32>
    %461 = vector.broadcast %460 : vector<1x1x32xf32> to vector<2x8x32xf32>
    %462 = arith.mulf %458, %461 : vector<2x8x32xf32>
    %cst_186 = arith.constant dense<0.000000e+00> : vector<2x8xf32>
    %463 = vector.multi_reduction <add>, %462, %cst_186 [2] : vector<2x8x32xf32> to vector<2x8xf32>
    %c47 = arith.constant 47 : index
    %c0_187 = arith.constant 0 : index
    %464 = vector.load %arg5[%c47, %c0_187] : memref<49x64xf32, #tpu.memory_space<vmem>>, vector<1x1xf32>
    %465 = vector.broadcast %464 : vector<1x1xf32> to vector<2x8xf32>
    %466 = arith.addf %463, %465 : vector<2x8xf32>
    %467 = arith.truncf %457 : vector<16x32xf32> to vector<16x32xbf16>
    %c12_188 = arith.constant 12 : index
    %c0_189 = arith.constant 0 : index
    %c0_190 = arith.constant 0 : index
    %468 = vector.load %arg2[%c12_188, %c0_189, %c0_190] : memref<17x32x32xbf16, #tpu.memory_space<vmem>>, vector<1x32x32xbf16>
    %469 = vector.shape_cast %468 : vector<1x32x32xbf16> to vector<32x32xbf16>
    %cst_191 = arith.constant dense<0.000000e+00> : vector<16x32xf32>
    %470 = tpu.matmul %467, %469, %cst_191 {dimension_numbers = #tpu.dot_dimension_numbers<[1], [0], [0], [1], [0, 0, 1, 1], [], []>} : vector<16x32xbf16>, vector<32x32xbf16>, vector<16x32xf32> -> vector<16x32xf32>
    %c32 = arith.constant 32 : index
    %c0_192 = arith.constant 0 : index
    %471 = vector.load %arg5[%c32, %c0_192] : memref<49x64xf32, #tpu.memory_space<vmem>>, vector<1x32xf32>
    %472 = vector.broadcast %471 : vector<1x32xf32> to vector<16x32xf32>
    %473 = arith.addf %470, %472 : vector<16x32xf32>
    %c13_193 = arith.constant 13 : index
    %c0_194 = arith.constant 0 : index
    %c0_195 = arith.constant 0 : index
    %474 = vector.load %arg2[%c13_193, %c0_194, %c0_195] : memref<17x32x32xbf16, #tpu.memory_space<vmem>>, vector<1x32x32xbf16>
    %475 = vector.shape_cast %474 : vector<1x32x32xbf16> to vector<32x32xbf16>
    %cst_196 = arith.constant dense<0.000000e+00> : vector<16x32xf32>
    %476 = tpu.matmul %467, %475, %cst_196 {dimension_numbers = #tpu.dot_dimension_numbers<[1], [0], [0], [1], [0, 0, 1, 1], [], []>} : vector<16x32xbf16>, vector<32x32xbf16>, vector<16x32xf32> -> vector<16x32xf32>
    %c33 = arith.constant 33 : index
    %c0_197 = arith.constant 0 : index
    %477 = vector.load %arg5[%c33, %c0_197] : memref<49x64xf32, #tpu.memory_space<vmem>>, vector<1x32xf32>
    %478 = vector.broadcast %477 : vector<1x32xf32> to vector<16x32xf32>
    %479 = arith.addf %476, %478 : vector<16x32xf32>
    %c14_198 = arith.constant 14 : index
    %c0_199 = arith.constant 0 : index
    %c0_200 = arith.constant 0 : index
    %480 = vector.load %arg2[%c14_198, %c0_199, %c0_200] : memref<17x32x32xbf16, #tpu.memory_space<vmem>>, vector<1x32x32xbf16>
    %481 = vector.shape_cast %480 : vector<1x32x32xbf16> to vector<32x32xbf16>
    %cst_201 = arith.constant dense<0.000000e+00> : vector<16x32xf32>
    %482 = tpu.matmul %467, %481, %cst_201 {dimension_numbers = #tpu.dot_dimension_numbers<[1], [0], [0], [1], [0, 0, 1, 1], [], []>} : vector<16x32xbf16>, vector<32x32xbf16>, vector<16x32xf32> -> vector<16x32xf32>
    %c34 = arith.constant 34 : index
    %c0_202 = arith.constant 0 : index
    %483 = vector.load %arg5[%c34, %c0_202] : memref<49x64xf32, #tpu.memory_space<vmem>>, vector<1x32xf32>
    %484 = vector.broadcast %483 : vector<1x32xf32> to vector<16x32xf32>
    %485 = arith.addf %482, %484 : vector<16x32xf32>
    %486 = arith.truncf %473 : vector<16x32xf32> to vector<16x32xbf16>
    %487 = arith.truncf %479 : vector<16x32xf32> to vector<16x32xbf16>
    %488 = arith.truncf %485 : vector<16x32xf32> to vector<16x32xbf16>
    %cst_203 = arith.constant dense<0.000000e+00> : vector<16x16xf32>
    %489 = tpu.matmul %486, %487, %cst_203 {dimension_numbers = #tpu.dot_dimension_numbers<[1], [1], [0], [0], [0, 0, 1, 0], [], []>} : vector<16x32xbf16>, vector<16x32xbf16>, vector<16x16xf32> -> vector<16x16xf32>
    %490 = arith.addf %489, %0 : vector<16x16xf32>
    %cst_204 = arith.constant dense<0xFF800000> : vector<16xf32>
    %491 = vector.multi_reduction <maximumf>, %490, %cst_204 [1] : vector<16x16xf32> to vector<16xf32>
    %492 = vector.shape_cast %491 : vector<16xf32> to vector<16x1xf32>
    %493 = vector.broadcast %492 : vector<16x1xf32> to vector<16x16xf32>
    %494 = arith.subf %490, %493 : vector<16x16xf32>
    %495 = math.exp %494 : vector<16x16xf32>
    %cst_205 = arith.constant dense<0.000000e+00> : vector<16xf32>
    %496 = vector.multi_reduction <add>, %495, %cst_205 [1] : vector<16x16xf32> to vector<16xf32>
    %497 = vector.shape_cast %496 : vector<16xf32> to vector<16x1xf32>
    %498 = tpu.reciprocal %497 {approx = true} : vector<16x1xf32> -> vector<16x1xf32>
    %499 = vector.broadcast %498 : vector<16x1xf32> to vector<16x16xf32>
    %500 = arith.mulf %495, %499 : vector<16x16xf32>
    %501 = arith.truncf %500 : vector<16x16xf32> to vector<16x16xbf16>
    %cst_206 = arith.constant dense<0.000000e+00> : vector<16x32xf32>
    %502 = tpu.matmul %501, %488, %cst_206 {dimension_numbers = #tpu.dot_dimension_numbers<[1], [0], [0], [1], [0, 0, 1, 1], [], []>} : vector<16x16xbf16>, vector<16x32xbf16>, vector<16x32xf32> -> vector<16x32xf32>
    %503 = arith.truncf %502 : vector<16x32xf32> to vector<16x32xbf16>
    %c15_207 = arith.constant 15 : index
    %c0_208 = arith.constant 0 : index
    %c0_209 = arith.constant 0 : index
    %504 = vector.load %arg2[%c15_207, %c0_208, %c0_209] : memref<17x32x32xbf16, #tpu.memory_space<vmem>>, vector<1x32x32xbf16>
    %505 = vector.shape_cast %504 : vector<1x32x32xbf16> to vector<32x32xbf16>
    %cst_210 = arith.constant dense<0.000000e+00> : vector<16x32xf32>
    %506 = tpu.matmul %503, %505, %cst_210 {dimension_numbers = #tpu.dot_dimension_numbers<[1], [0], [0], [1], [0, 0, 1, 1], [], []>} : vector<16x32xbf16>, vector<32x32xbf16>, vector<16x32xf32> -> vector<16x32xf32>
    %c35 = arith.constant 35 : index
    %c0_211 = arith.constant 0 : index
    %507 = vector.load %arg5[%c35, %c0_211] : memref<49x64xf32, #tpu.memory_space<vmem>>, vector<1x32xf32>
    %508 = vector.broadcast %507 : vector<1x32xf32> to vector<16x32xf32>
    %509 = arith.addf %506, %508 : vector<16x32xf32>
    %510 = arith.addf %457, %509 : vector<16x32xf32>
    %c36 = arith.constant 36 : index
    %c0_212 = arith.constant 0 : index
    %511 = vector.load %arg5[%c36, %c0_212] : memref<49x64xf32, #tpu.memory_space<vmem>>, vector<1x32xf32>
    %c37 = arith.constant 37 : index
    %c0_213 = arith.constant 0 : index
    %512 = vector.load %arg5[%c37, %c0_213] : memref<49x64xf32, #tpu.memory_space<vmem>>, vector<1x32xf32>
    %cst_214 = arith.constant dense<0.000000e+00> : vector<16xf32>
    %513 = vector.multi_reduction <add>, %510, %cst_214 [1] : vector<16x32xf32> to vector<16xf32>
    %514 = vector.shape_cast %513 : vector<16xf32> to vector<16x1xf32>
    %cst_215 = arith.constant 3.200000e+01 : f32
    %515 = vector.broadcast %cst_215 : f32 to vector<16x1xf32>
    %516 = arith.divf %514, %515 : vector<16x1xf32>
    %517 = vector.broadcast %516 : vector<16x1xf32> to vector<16x32xf32>
    %518 = arith.subf %510, %517 : vector<16x32xf32>
    %519 = arith.mulf %518, %518 : vector<16x32xf32>
    %cst_216 = arith.constant dense<0.000000e+00> : vector<16xf32>
    %520 = vector.multi_reduction <add>, %519, %cst_216 [1] : vector<16x32xf32> to vector<16xf32>
    %521 = vector.shape_cast %520 : vector<16xf32> to vector<16x1xf32>
    %cst_217 = arith.constant 3.200000e+01 : f32
    %522 = vector.broadcast %cst_217 : f32 to vector<16x1xf32>
    %523 = arith.divf %521, %522 : vector<16x1xf32>
    %524 = vector.broadcast %516 : vector<16x1xf32> to vector<16x32xf32>
    %525 = arith.subf %510, %524 : vector<16x32xf32>
    %cst_218 = arith.constant 9.99999974E-6 : f32
    %526 = vector.broadcast %cst_218 : f32 to vector<16x1xf32>
    %527 = arith.addf %523, %526 : vector<16x1xf32>
    %528 = math.rsqrt %527 : vector<16x1xf32>
    %529 = vector.broadcast %528 : vector<16x1xf32> to vector<16x32xf32>
    %530 = arith.mulf %525, %529 : vector<16x32xf32>
    %531 = vector.broadcast %511 : vector<1x32xf32> to vector<16x32xf32>
    %532 = arith.mulf %530, %531 : vector<16x32xf32>
    %533 = vector.broadcast %512 : vector<1x32xf32> to vector<16x32xf32>
    %534 = arith.addf %532, %533 : vector<16x32xf32>
    %535 = arith.truncf %534 : vector<16x32xf32> to vector<16x32xbf16>
    %c3_219 = arith.constant 3 : index
    %c0_220 = arith.constant 0 : index
    %c0_221 = arith.constant 0 : index
    %536 = vector.load %arg3[%c3_219, %c0_220, %c0_221] : memref<4x32x64xbf16, #tpu.memory_space<vmem>>, vector<1x32x64xbf16>
    %537 = vector.shape_cast %536 : vector<1x32x64xbf16> to vector<32x64xbf16>
    %cst_222 = arith.constant dense<0.000000e+00> : vector<16x64xf32>
    %538 = tpu.matmul %535, %537, %cst_222 {dimension_numbers = #tpu.dot_dimension_numbers<[1], [0], [0], [1], [0, 0, 1, 1], [], []>} : vector<16x32xbf16>, vector<32x64xbf16>, vector<16x64xf32> -> vector<16x64xf32>
    %c40 = arith.constant 40 : index
    %c0_223 = arith.constant 0 : index
    %539 = vector.load %arg5[%c40, %c0_223] : memref<49x64xf32, #tpu.memory_space<vmem>>, vector<1x64xf32>
    %540 = vector.broadcast %539 : vector<1x64xf32> to vector<16x64xf32>
    %541 = arith.addf %538, %540 : vector<16x64xf32>
    %cst_224 = arith.constant 0.000000e+00 : f32
    %542 = vector.broadcast %cst_224 : f32 to vector<16x64xf32>
    %543 = arith.maximumf %541, %542 : vector<16x64xf32>
    %544 = arith.truncf %543 : vector<16x64xf32> to vector<16x64xbf16>
    %c3_225 = arith.constant 3 : index
    %c0_226 = arith.constant 0 : index
    %c0_227 = arith.constant 0 : index
    %545 = vector.load %arg4[%c3_225, %c0_226, %c0_227] : memref<4x64x32xbf16, #tpu.memory_space<vmem>>, vector<1x64x32xbf16>
    %546 = vector.shape_cast %545 : vector<1x64x32xbf16> to vector<64x32xbf16>
    %cst_228 = arith.constant dense<0.000000e+00> : vector<16x32xf32>
    %547 = tpu.matmul %544, %546, %cst_228 {dimension_numbers = #tpu.dot_dimension_numbers<[1], [0], [0], [1], [0, 0, 1, 1], [], []>} : vector<16x64xbf16>, vector<64x32xbf16>, vector<16x32xf32> -> vector<16x32xf32>
    %c41 = arith.constant 41 : index
    %c0_229 = arith.constant 0 : index
    %548 = vector.load %arg5[%c41, %c0_229] : memref<49x64xf32, #tpu.memory_space<vmem>>, vector<1x32xf32>
    %549 = vector.broadcast %548 : vector<1x32xf32> to vector<16x32xf32>
    %550 = arith.addf %547, %549 : vector<16x32xf32>
    %551 = arith.addf %534, %550 : vector<16x32xf32>
    %c38 = arith.constant 38 : index
    %c0_230 = arith.constant 0 : index
    %552 = vector.load %arg5[%c38, %c0_230] : memref<49x64xf32, #tpu.memory_space<vmem>>, vector<1x32xf32>
    %c39 = arith.constant 39 : index
    %c0_231 = arith.constant 0 : index
    %553 = vector.load %arg5[%c39, %c0_231] : memref<49x64xf32, #tpu.memory_space<vmem>>, vector<1x32xf32>
    %cst_232 = arith.constant dense<0.000000e+00> : vector<16xf32>
    %554 = vector.multi_reduction <add>, %551, %cst_232 [1] : vector<16x32xf32> to vector<16xf32>
    %555 = vector.shape_cast %554 : vector<16xf32> to vector<16x1xf32>
    %cst_233 = arith.constant 3.200000e+01 : f32
    %556 = vector.broadcast %cst_233 : f32 to vector<16x1xf32>
    %557 = arith.divf %555, %556 : vector<16x1xf32>
    %558 = vector.broadcast %557 : vector<16x1xf32> to vector<16x32xf32>
    %559 = arith.subf %551, %558 : vector<16x32xf32>
    %560 = arith.mulf %559, %559 : vector<16x32xf32>
    %cst_234 = arith.constant dense<0.000000e+00> : vector<16xf32>
    %561 = vector.multi_reduction <add>, %560, %cst_234 [1] : vector<16x32xf32> to vector<16xf32>
    %562 = vector.shape_cast %561 : vector<16xf32> to vector<16x1xf32>
    %cst_235 = arith.constant 3.200000e+01 : f32
    %563 = vector.broadcast %cst_235 : f32 to vector<16x1xf32>
    %564 = arith.divf %562, %563 : vector<16x1xf32>
    %565 = vector.broadcast %557 : vector<16x1xf32> to vector<16x32xf32>
    %566 = arith.subf %551, %565 : vector<16x32xf32>
    %cst_236 = arith.constant 9.99999974E-6 : f32
    %567 = vector.broadcast %cst_236 : f32 to vector<16x1xf32>
    %568 = arith.addf %564, %567 : vector<16x1xf32>
    %569 = math.rsqrt %568 : vector<16x1xf32>
    %570 = vector.broadcast %569 : vector<16x1xf32> to vector<16x32xf32>
    %571 = arith.mulf %566, %570 : vector<16x32xf32>
    %572 = vector.broadcast %552 : vector<1x32xf32> to vector<16x32xf32>
    %573 = arith.mulf %571, %572 : vector<16x32xf32>
    %574 = vector.broadcast %553 : vector<1x32xf32> to vector<16x32xf32>
    %575 = arith.addf %573, %574 : vector<16x32xf32>
    %576 = vector.shape_cast %575 : vector<16x32xf32> to vector<2x8x32xf32>
    %c45 = arith.constant 45 : index
    %c0_237 = arith.constant 0 : index
    %577 = vector.load %arg5[%c45, %c0_237] : memref<49x64xf32, #tpu.memory_space<vmem>>, vector<1x32xf32>
    %578 = vector.shape_cast %577 : vector<1x32xf32> to vector<1x1x32xf32>
    %579 = vector.broadcast %578 : vector<1x1x32xf32> to vector<2x8x32xf32>
    %580 = arith.mulf %576, %579 : vector<2x8x32xf32>
    %cst_238 = arith.constant dense<0.000000e+00> : vector<2x8xf32>
    %581 = vector.multi_reduction <add>, %580, %cst_238 [2] : vector<2x8x32xf32> to vector<2x8xf32>
    %c48 = arith.constant 48 : index
    %c0_239 = arith.constant 0 : index
    %582 = vector.load %arg5[%c48, %c0_239] : memref<49x64xf32, #tpu.memory_space<vmem>>, vector<1x1xf32>
    %583 = vector.broadcast %582 : vector<1x1xf32> to vector<2x8xf32>
    %584 = arith.addf %581, %583 : vector<2x8xf32>
    %cst_240 = arith.constant 0.000000e+00 : f32
    %585 = vector.broadcast %cst_240 : f32 to vector<2x111xf32>
    %586 = tpu.concatenate %466, %584, %348, %585 in 1 : vector<2x8xf32>, vector<2x8xf32>, vector<2x1xf32>, vector<2x111xf32> -> vector<2x128xf32>
    %c0_241 = arith.constant 0 : index
    %c0_242 = arith.constant 0 : index
    %587 = vector.load %arg6[%c0_241, %c0_242] : memref<2x128xf32, #tpu.memory_space<vmem>>, vector<2x128xf32>
    tpu.vector_store %arg6[%c0_241, %c0_242], %586 {strides = array<i32>} : memref<2x128xf32, #tpu.memory_space<vmem>>, vector<2x128xf32>,
    return
  }
}

</mosaic_0001>

<bundles_post_ra>
// kernel: electra_qa_extension_forward.1
= control target key start
LH: loop header
LB: loop body
LE: loop exit
PB: predicated region body
PF: predicated region fallthrough
CT: control target
= control target key end

     0   :  { %vm30_vm0 = vcmask 261120   ;;  %v2687_v4 = vmov 32.0   ;;  %vm206_vm8 = vcmask 130048   ;;  %s2688_s22 = smov 112   ;;  %s2689_s28 = smov 16   ;;  %vm530_vm15 = vcmask 523264   ;;  %s3303_s0 = inlined_call_operand.vmem [shape: f32[16,32], index: 0, kind: input, shape index: {}]   ;;  %s3304_s5 = inlined_call_operand.vmem [shape: f32[49,64], index: 5, kind: input, shape index: {}]   ;;  %s3305_s2 = inlined_call_operand.vmem [shape: bf16[17,32,32], index: 2, kind: input, shape index: {}]   ;;  %s3306_s1 = inlined_call_operand.vmem [shape: f32[16,16], index: 1, kind: input, shape index: {}]   ;;  %s3307_s3 = inlined_call_operand.vmem [shape: bf16[4,32,64], index: 3, kind: input, shape index: {}]   ;;  %s3308_s4 = inlined_call_operand.vmem [shape: bf16[4,64,32], index: 4, kind: input, shape index: {}]   ;;  %s3309_s6 = inlined_call_operand.vmem [shape: f32[2,128], index: 6, kind: output, shape index: {}]  }
   0x1   :  { %v26_v0 = vld [vmem:[%s3303_s0] sm:$0xff]  ;;  %v27_v2 = vld [vmem:[%s3303_s0 + $0x8] sm:$0xff]  ;;  %2585 = vrcp.f32 %v2687_v4  ;;  %v2465_v22 = vld [vmem:[%s3305_s2 + $0x18] sm:$0xff] }
   0x2   :  { %v31_v1 = vsel %vm30_vm0, %v26_v0, 0.0  ;;  %v34_v3 = vsel %vm30_vm0, %v27_v2, 0.0  ;;  %v2463_v21 = vld [vmem:[%s3305_s2 + $0x8] sm:$0xff]  ;;  %149 = vmatpush.bf16.msra.mxu1 %v2465_v22  ;;  %v2462_v25 = vld [vmem:[%s3305_s2] sm:$0xff]  ;;  %v2464_v26 = vld [vmem:[%s3305_s2 + $0x10] sm:$0xff] }
   0x3   :  { %32 = vadd.xlane.f32.xlu0 %v31_v1  ;;  %v2467_v23 = vld [vmem:[%s3305_s2 + $0x28] sm:$0xff]  ;;  %116 = vmatpush.bf16.msra.mxu0 %v2463_v21  ;;  %v2466_v28 = vld [vmem:[%s3305_s2 + $0x20] sm:$0xff] }
   0x4   :  { %182 = vmatpush.bf16.msra.mxu2 %v2467_v23  ;;  %v2538_v46 = vld [vmem:[%s3304_s5] ss:$0 sm:$0xff]  ;;  %v2539_v51 = vld [vmem:[%s3304_s5 + $0x1] ss:$0 sm:$0xff]  ;;  %v2541_v58 = vld [vmem:[%s3304_s5 + $0x3] ss:$0 sm:$0xff] }
   0x5   :  { %v2542_v61 = vld [vmem:[%s3304_s5 + $0x4] ss:$0 sm:$0xff] }
   0x6   :  { %150 = vmatpush.bf16.msra.mxu1 %v2464_v26 }
   0x7   :  { %v2586_v5 = vpop.eup %2585  ;;  %117 = vmatpush.bf16.msra.mxu0 %v2462_v25 }
   0x8   :  { %v38_v6 = vmul.f32 32.0, %v2586_v5  ;;  %vm42_vm1 = vweird.f32 %v2586_v5  ;;  %183 = vmatpush.bf16.msra.mxu2 %v2466_v28 }
   0xa   :  { %v39_v7 = vsub.f32 1.0, %v38_v6 }
   0xb   :  { %35 = vadd.xlane.f32.xlu0 %v34_v3 }
   0xc   :  { %v40_v8 = vmul.f32 %v2586_v5, %v39_v7 }
   0xe   :  { %v41_v9 = vadd.f32 %v2586_v5, %v40_v8 }
  0x10   :  { %v2734_v10 = vsel %vm42_vm1, %v2586_v5, %v41_v9 }
  0x76   :  { %v33_v11 = vpop.xlane.xlu0 %32 }
  0x77   :  { %v44_v12 = vmul.f32 %v2734_v10, %v33_v11 }
  0x79   :  { %v46_v13 = vsub.f32 %v26_v0, %v44_v12  ;;  %v2540_v0 = vld [vmem:[%s3304_s5 + $0x2] ss:$0 sm:$0xff] }
  0x7b   :  { %v48_v14 = vmul.f32 %v46_v13, %v46_v13 }
  0x7d   :  { %v50_v15 = vsel %vm30_vm0, %v48_v14, 0.0 }
  0x7e   :  { %51 = vadd.xlane.f32.xlu1 %v50_v15  ;;  %v36_v16 = vpop.xlane.xlu0 %35 }
  0x7f   :  { %v45_v17 = vmul.f32 %v2734_v10, %v36_v16 }
  0x81   :  { %v47_v18 = vsub.f32 %v27_v2, %v45_v17 }
  0x83   :  { %v49_v19 = vmul.f32 %v47_v18, %v47_v18 }
  0x85   :  { %v53_v20 = vsel %vm30_vm0, %v49_v19, 0.0 }
  0x86   :  { %54 = vadd.xlane.f32.xlu1 %v53_v20 }
  0xf1   :  { %v52_v24 = vpop.xlane.xlu1 %51 }
  0xf2   :  { %v56_v27 = vmul.f32 %v52_v24, %v2734_v10 }
  0xf4   :  { %v58_v29 = vadd.f32 1e-12, %v56_v27  ;;  %v2793_v27 = vld [vmem:[%s3306_s1] sm:$0xff] }
  0xf6   :  { %2587 = vrsqrt.f32 %v58_v29  ;;  %vm66_vm3 = vweird.f32 %v58_v29 }
  0xf9   :  { %v55_v30 = vpop.xlane.xlu1 %54 }
  0xfa   :  { %v57_v31 = vmul.f32 %v55_v30, %v2734_v10 }
  0xfc   :  { %v2588_v32 = vpop.eup %2587  ;;  %v59_v33 = vadd.f32 1e-12, %v57_v31 }
  0xfd   :  { %v61_v34 = vmul.f32 %v2588_v32, %v58_v29  ;;  %vm67_vm2 = vweird.f32 %v2588_v32 }
  0xfe   :  { %2589 = vrsqrt.f32 %v59_v33  ;;  %vm68_vm4 = vmor %vm66_vm3, %vm67_vm2  ;;  %vm76_vm6 = vweird.f32 %v59_v33 }
  0xff   :  { %v62_v35 = vmul.f32 %v2588_v32, %v61_v34  ;;  %v2802_v34 = vld [vmem:[%s3306_s1 + $0x8] sm:$0xff] }
 0x101   :  { %v63_v36 = vmul.f32 0.5, %v62_v35 }
 0x103   :  { %v64_v37 = vsub.f32 1.5, %v63_v36 }
 0x104   :  { %v2590_v38 = vpop.eup %2589 }
 0x105   :  { %v65_v39 = vmul.f32 %v2588_v32, %v64_v37  ;;  %v71_v40 = vmul.f32 %v2590_v38, %v59_v33  ;;  %vm77_vm5 = vweird.f32 %v2590_v38 }
 0x106   :  { %vm78_vm7 = vmor %vm76_vm6, %vm77_vm5 }
 0x107   :  { %v72_v41 = vmul.f32 %v2590_v38, %v71_v40  ;;  %v69_v42 = vsel %vm68_vm4, %v2588_v32, %v65_v39 }
 0x108   :  { %v80_v45 = vmul.f32 %v69_v42, %v46_v13 }
 0x109   :  { %v73_v43 = vmul.f32 0.5, %v72_v41 }
 0x10a   :  { %v83_v50 = vmul.f32 %v2538_v46, %v80_v45 }
 0x10b   :  { %v74_v44 = vsub.f32 1.5, %v73_v43 }
 0x10c   :  { %v2766_v53 = vadd.f32 %v2539_v51, %v83_v50 }
 0x10d   :  { %v75_v47 = vmul.f32 %v2590_v38, %v74_v44 }
 0x10f   :  { %v79_v48 = vsel %vm78_vm7, %v2590_v38, %v75_v47 }
 0x110   :  { %v81_v49 = vmul.f32 %v79_v48, %v47_v18 }
 0x112   :  { %v84_v52 = vmul.f32 %v2538_v46, %v81_v49 }
 0x114   :  { %v2768_v54 = vadd.f32 %v2539_v51, %v84_v52 }
 0x116   :  { %v88_v55 = vpack.c.bf16 %v2768_v54, %v2766_v53 }
 0x118   :  { %2098 = vmatmul.msk.bf16.vlgmr.msra.gmra.mxu0 %vm30_vm0, %v88_v55  ;;  %2111 = vmatmul.msk.bf16.vlgmr.msra.gmra.mxu1 %vm30_vm0, %v88_v55 }
 0x119   :  { %2124 = vmatmul.msk.bf16.vlgmr.msra.gmra.mxu2 %vm30_vm0, %v88_v55 }
 0x195   :  { %v119_v56 = vpop.f32.mrf.mxu0  ;;  %v152_v57 = vpop.f32.mrf.mxu1 }
 0x196   :  { %v153_v59 = vadd.f32 %v2541_v58, %v152_v57  ;;  %v120_v6 = vadd.f32 %v2540_v0, %v119_v56 }
 0x198   :  { %v192_v1 = vpack.c.bf16 %v153_v59, %v153_v59  ;;  %v190_v15 = vpack.c.bf16 %v120_v6, %v120_v6 }
 0x19a   :  { %v203_v7 = vunpack.c.l.b16 %v192_v1  ;;  %v198_v21 = vunpack.c.l.b16 %v190_v15  ;;  %v2469_v15 = vld [vmem:[%s3305_s2 + $0x38] sm:$0xff] }
 0x19c   :  { %v185_v60 = vpop.f32.mrf.mxu2 }
 0x19d   :  { %v121_v62 = vpop.f32.mrf.mxu0  ;;  %v154_v63 = vpop.f32.mrf.mxu1  ;;  %v186_v5 = vadd.f32 %v2542_v61, %v185_v60 }
 0x19e   :  { %v155_v2 = vadd.f32 %v2541_v58, %v154_v63  ;;  %v122_v3 = vadd.f32 %v2540_v0, %v121_v62 }
 0x19f   :  { %v194_v13 = vpack.c.bf16 %v186_v5, %v186_v5 }
 0x1a0   :  { %v193_v4 = vpack.c.bf16 %v155_v2, %v155_v2  ;;  %v191_v9 = vpack.c.bf16 %v122_v3, %v122_v3 }
 0x1a1   :  { %v252_v19 = vunpack.c.l.b16 %v194_v13 }
 0x1a2   :  { %v204_v8 = vunpack.c.l.b16 %v193_v4  ;;  %v199_v18 = vunpack.c.l.b16 %v191_v9 }
 0x1a4   :  { %v187_v11 = vpop.f32.mrf.mxu2  ;;  %v205_v12 = vpack.c.b16 %v204_v8, %v203_v7  ;;  %v200_v23 = vpack.c.b16 %v199_v18, %v198_v21 }
 0x1a5   :  { %v188_v14 = vadd.f32 %v2542_v61, %v187_v11 }
 0x1a6   :  { %275 = vrot.lane.b32.xlu2 %v205_v12, %s2688_s22  ;;  %v211_v16 = vsel %vm206_vm8, %v205_v12, 0 }
 0x1a7   :  { %v195_v17 = vpack.c.bf16 %v188_v14, %v188_v14  ;;  %220 = vmatpush.bf16.xpose.msra.mxu3 %v211_v16 }
 0x1a9   :  { %v253_v20 = vunpack.c.l.b16 %v195_v17 }
 0x1ab   :  { %v254_v22 = vpack.c.b16 %v253_v20, %v252_v19  ;;  %v2468_v19 = vld [vmem:[%s3305_s2 + $0x30] sm:$0xff] }
 0x1ad   :  { %266 = vmatpush.bf16.msrb.mxu0 %v254_v22 }
 0x1ae   :  { %273 = vrot.lane.b32.xlu2 %v200_v23, %s2688_s22  ;;  %2125 = vmatmul.msk.bf16.vlgmr.msra.gmra.mxu3 %vm206_vm8, %v200_v23 }
 0x1af   :  { %379 = vmatpush.bf16.msrb.mxu3 %v2469_v15 }
 0x1b3   :  { %380 = vmatpush.bf16.msrb.mxu3 %v2468_v19  ;;  %v2473_v19 = vld [vmem:[%s3308_s4 + $0x8] sm:$0xff] }
 0x200   :  { %v276_v24 = vpop.permute.xlu2 %275 }
 0x201   :  { %v281_v25 = vsel %vm206_vm8, %v276_v24, 0 }
 0x202   :  { %290 = vmatpush.bf16.xpose.msrb.mxu1 %v281_v25 }
 0x208   :  { %v274_v26 = vpop.permute.xlu2 %273 }
 0x209   :  { %2127 = vmatmul.msk.bf16.vlgmr.msrb.gmra.mxu1 %vm206_vm8, %v274_v26 }
 0x231   :  { %v222_v28 = vpop.f32.mrf.mxu3 }
 0x232   :  { %v223_v29 = vadd.f32 %v222_v28, %v2793_v27 }
 0x234   :  { %v227_v30 = vsel %vm206_vm8, %v223_v29, -inf }
 0x235   :  { %228 = vmax.xlane.f32.xlu2 %v227_v30 }
 0x239   :  { %v224_v35 = vpop.f32.mrf.mxu3 }
 0x23a   :  { %v225_v36 = vadd.f32 %v224_v35, %v2802_v34 }
 0x23c   :  { %v230_v40 = vsel %vm206_vm8, %v225_v36, -inf }
 0x286   :  { %v292_v31 = vpop.f32.mrf.mxu1 }
 0x287   :  { %v293_v32 = vadd.f32 %v292_v31, %v2793_v27 }
 0x289   :  { %v297_v33 = vsel %vm206_vm8, %v293_v32, -inf }
 0x28a   :  { %298 = vmax.xlane.f32.xlu0 %v297_v33 }
 0x28e   :  { %v294_v37 = vpop.f32.mrf.mxu1 }
 0x28f   :  { %v295_v38 = vadd.f32 %v294_v37, %v2802_v34 }
 0x291   :  { %v300_v39 = vsel %vm206_vm8, %v295_v38, -inf }
 0x292   :  { %301 = vmax.xlane.f32.xlu1 %v300_v39  ;;  %231 = vmax.xlane.f32.xlu0 %v230_v40 }
 0x2a8   :  { %v229_v44 = vpop.xlane.xlu2 %228 }
 0x2a9   :  { %v233_v48 = vsub.f32 %v223_v29, %v229_v44  ;;  %v2543_v29 = vld [vmem:[%s3304_s5 + $0x5] ss:$0 sm:$0xff] }
 0x2ab   :  { %v235_v51 = vmul.f32 1.442695, %v233_v48 }
 0x2fd   :  { %v299_v41 = vpop.xlane.xlu0 %298 }
 0x2fe   :  { %v303_v42 = vsub.f32 %v293_v32, %v299_v41 }
 0x300   :  { %v305_v43 = vmul.f32 1.442695, %v303_v42 }
 0x302   :  { %2591 = vpow2.f32 %v305_v43 }
 0x305   :  { %v302_v45 = vpop.xlane.xlu1 %301  ;;  %v232_v52 = vpop.xlane.xlu0 %231 }
 0x306   :  { %v304_v46 = vsub.f32 %v295_v38, %v302_v45  ;;  %v234_v56 = vsub.f32 %v225_v36, %v232_v52 }
 0x308   :  { %v2592_v47 = vpop.eup %2591  ;;  %v307_v49 = vmul.f32 1.442695, %v304_v46  ;;  %v237_v58 = vmul.f32 1.442695, %v234_v56 }
 0x309   :  { %v309_v50 = vsel %vm206_vm8, %v2592_v47, 0.0 }
 0x30a   :  { %2593 = vpow2.f32 %v307_v49  ;;  %310 = vadd.xlane.f32.xlu1 %v309_v50 }
 0x30b   :  { %2595 = vpow2.f32 %v235_v51  ;;  %v2470_v51 = vld [vmem:[%s3307_s3] sm:$0xff] }
 0x30c   :  { %2597 = vpow2.f32 %v237_v58 }
 0x310   :  { %v2594_v55 = vpop.eup %2593 }
 0x311   :  { %v312_v57 = vsel %vm206_vm8, %v2594_v55, 0.0  ;;  %v2596_v59 = vpop.eup %2595 }
 0x312   :  { %313 = vadd.xlane.f32.xlu0 %v312_v57  ;;  %v239_v60 = vsel %vm206_vm8, %v2596_v59, 0.0  ;;  %v2598_v61 = vpop.eup %2597 }
 0x313   :  { %v242_v62 = vsel %vm206_vm8, %v2598_v61, 0.0 }
 0x31a   :  { %240 = vadd.xlane.f32.xlu0 %v239_v60 }
 0x322   :  { %243 = vadd.xlane.f32.xlu0 %v242_v62 }
 0x323   :  { %320 = vrot.lane.b32.xlu1 %v254_v22, %s2688_s22 }
 0x37d   :  { %v311_v0 = vpop.xlane.xlu1 %310 }
 0x385   :  { %v314_v63 = vpop.xlane.xlu0 %313 }
 0x386   :  { %2599 = vrcp.f32 %v314_v63 }
 0x387   :  { %2601 = vrcp.f32 %v311_v0 }
 0x38c   :  { %v2600_v2 = vpop.eup %2599 }
 0x38d   :  { %v241_v1 = vpop.xlane.xlu0 %240  ;;  %v2602_v3 = vpop.eup %2601  ;;  %v318_v4 = vmul.f32 %v2600_v2, %v2594_v55 }
 0x38e   :  { %2603 = vrcp.f32 %v241_v1  ;;  %v317_v5 = vmul.f32 %v2602_v3, %v2592_v47 }
 0x390   :  { %v319_v8 = vpack.c.bf16 %v318_v4, %v317_v5  ;;  %v2544_v5 = vld [vmem:[%s3304_s5 + $0x6] ss:$0 sm:$0xff] }
 0x394   :  { %v2604_v9 = vpop.eup %2603 }
 0x395   :  { %v321_v6 = vpop.permute.xlu1 %320  ;;  %v244_v7 = vpop.xlane.xlu0 %243  ;;  %v247_v12 = vmul.f32 %v2604_v9, %v2596_v59  ;;  %v2545_v9 = vld [vmem:[%s3304_s5 + $0x7] ss:$0 sm:$0xff] }
 0x396   :  { %2605 = vrcp.f32 %v244_v7  ;;  %333 = vmatpush.bf16.msrb.mxu2 %v321_v6 }
 0x399   :  { %2128 = vmatmul.msk.bf16.vlgmr.msrb.gmra.mxu2 %vm206_vm8, %v319_v8 }
 0x39c   :  { %v2606_v11 = vpop.eup %2605 }
 0x39d   :  { %v248_v13 = vmul.f32 %v2606_v11, %v2598_v61 }
 0x39f   :  { %v249_v14 = vpack.c.bf16 %v248_v13, %v247_v12 }
 0x3a1   :  { %2126 = vmatmul.msk.bf16.vlgmr.msrb.gmra.mxu0 %vm206_vm8, %v249_v14 }
 0x41c   :  { %v335_v16 = vpop.f32.mrf.mxu2 }
 0x41e   :  { %v268_v20 = vpop.f32.mrf.mxu0 }
 0x424   :  { %v337_v17 = vpop.f32.mrf.mxu2 }
 0x425   :  { %v2528_v18 = vpack.i.bf16 %v337_v17, %v335_v16  ;;  %v2475_v17 = vld [vmem:[%s3308_s4 + $0x18] sm:$0xff] }
 0x426   :  { %v270_v24 = vpop.f32.mrf.mxu0  ;;  %538 = vmatpush.bf16.msra.mxu1 %v2475_v17 }
 0x427   :  { %2529 = vrot.lane.b32.xlu0 %v2528_v18, %s2689_s28  ;;  %v2474_v18 = vld [vmem:[%s3308_s4 + $0x10] sm:$0xff] }
 0x42a   :  { %539 = vmatpush.bf16.msra.mxu1 %v2474_v18 }
 0x42e   :  { %540 = vmatpush.bf16.msra.mxu1 %v2473_v19 }
 0x499   :  { %v2530_v21 = vpop.permute.xlu0 %2529 }
 0x49a   :  { %v2532_v22 = vunpack.i.h.bf16 %v2530_v21  ;;  %v2531_v23 = vunpack.i.l.bf16 %v2530_v21 }
 0x49c   :  { %v349_v25 = vsel %vm206_vm8, %v270_v24, %v2532_v22  ;;  %v348_v26 = vsel %vm206_vm8, %v268_v20, %v2531_v23  ;;  %v2546_v20 = vld [vmem:[%s3304_s5 + $0xa] ss:$0 sm:$0xff]  ;;  %v2472_v22 = vld [vmem:[%s3308_s4] sm:$0xff] }
 0x49d   :  { %v350_v28 = vpack.c.bf16 %v349_v25, %v348_v26  ;;  %541 = vmatpush.bf16.msra.mxu1 %v2472_v22 }
 0x49f   :  { %2141 = vmatmul.msk.bf16.vlgmr.msrb.gmra.mxu3 %vm30_vm0, %v350_v28 }
 0x522   :  { %v382_v30 = vpop.f32.mrf.mxu3 }
 0x523   :  { %v383_v31 = vadd.f32 %v2543_v29, %v382_v30 }
 0x525   :  { %v387_v32 = vadd.f32 %v383_v31, %v2766_v53 }
 0x527   :  { %v391_v33 = vsel %vm30_vm0, %v387_v32, 0.0 }
 0x528   :  { %392 = vadd.xlane.f32.xlu1 %v391_v33 }
 0x52a   :  { %v384_v35 = vpop.f32.mrf.mxu3 }
 0x52b   :  { %v385_v36 = vadd.f32 %v2543_v29, %v384_v35 }
 0x52d   :  { %v388_v37 = vadd.f32 %v385_v36, %v2768_v54  ;;  %v2471_v54 = vld [vmem:[%s3307_s3 + $0x8] sm:$0xff] }
 0x52e   :  { %469 = vmatpush.bf16.msra.mxu0 %v2471_v54 }
 0x52f   :  { %v394_v38 = vsel %vm30_vm0, %v388_v37, 0.0 }
 0x530   :  { %395 = vadd.xlane.f32.xlu2 %v394_v38 }
 0x532   :  { %470 = vmatpush.bf16.msra.mxu0 %v2470_v51 }
 0x59b   :  { %v393_v39 = vpop.xlane.xlu1 %392 }
 0x59c   :  { %v397_v40 = vmul.f32 %v393_v39, %v2734_v10 }
 0x59e   :  { %v399_v41 = vsub.f32 %v387_v32, %v397_v40 }
 0x5a0   :  { %v401_v42 = vmul.f32 %v399_v41, %v399_v41 }
 0x5a2   :  { %v403_v43 = vsel %vm30_vm0, %v401_v42, 0.0 }
 0x5a3   :  { %v396_v44 = vpop.xlane.xlu2 %395  ;;  %404 = vadd.xlane.f32.xlu2 %v403_v43 }
 0x5a4   :  { %v398_v53 = vmul.f32 %v396_v44, %v2734_v10 }
 0x5a6   :  { %v400_v45 = vsub.f32 %v388_v37, %v398_v53 }
 0x5a8   :  { %v402_v46 = vmul.f32 %v400_v45, %v400_v45 }
 0x5aa   :  { %v406_v47 = vsel %vm30_vm0, %v402_v46, 0.0  ;;  %v2547_v46 = vld [vmem:[%s3304_s5 + $0xb] ss:$0 sm:$0xff] }
 0x5ab   :  { %407 = vadd.xlane.f32.xlu2 %v406_v47 }
 0x616   :  { %v405_v48 = vpop.xlane.xlu2 %404 }
 0x617   :  { %v409_v49 = vmul.f32 %v405_v48, %v2734_v10 }
 0x619   :  { %v411_v50 = vadd.f32 1e-12, %v409_v49 }
 0x61b   :  { %2607 = vrsqrt.f32 %v411_v50  ;;  %vm419_vm10 = vweird.f32 %v411_v50 }
 0x61e   :  { %v408_v52 = vpop.xlane.xlu2 %407 }
 0x61f   :  { %v410_v55 = vmul.f32 %v408_v52, %v2734_v10 }
 0x621   :  { %v2608_v56 = vpop.eup %2607  ;;  %v412_v57 = vadd.f32 1e-12, %v410_v55 }
 0x622   :  { %v414_v58 = vmul.f32 %v2608_v56, %v411_v50  ;;  %vm420_vm9 = vweird.f32 %v2608_v56 }
 0x623   :  { %2609 = vrsqrt.f32 %v412_v57  ;;  %vm421_vm11 = vmor %vm419_vm10, %vm420_vm9  ;;  %vm429_vm13 = vweird.f32 %v412_v57 }
 0x624   :  { %v415_v59 = vmul.f32 %v2608_v56, %v414_v58 }
 0x626   :  { %v416_v60 = vmul.f32 0.5, %v415_v59 }
 0x628   :  { %v417_v61 = vsub.f32 1.5, %v416_v60 }
 0x629   :  { %v2610_v62 = vpop.eup %2609 }
 0x62a   :  { %v418_v63 = vmul.f32 %v2608_v56, %v417_v61  ;;  %v424_v0 = vmul.f32 %v2610_v62, %v412_v57  ;;  %vm430_vm12 = vweird.f32 %v2610_v62 }
 0x62b   :  { %vm431_vm14 = vmor %vm429_vm13, %vm430_vm12 }
 0x62c   :  { %v425_v1 = vmul.f32 %v2610_v62, %v424_v0  ;;  %v422_v2 = vsel %vm421_vm11, %v2608_v56, %v418_v63 }
 0x62d   :  { %v433_v6 = vmul.f32 %v422_v2, %v399_v41  ;;  %v2477_v2 = vld [vmem:[%s3305_s2 + $0x48] sm:$0xff] }
 0x62e   :  { %v426_v3 = vmul.f32 0.5, %v425_v1  ;;  %631 = vmatpush.bf16.msra.mxu2 %v2477_v2 }
 0x62f   :  { %v436_v11 = vmul.f32 %v2544_v5, %v433_v6 }
 0x630   :  { %v427_v4 = vsub.f32 1.5, %v426_v3  ;;  %v2479_v3 = vld [vmem:[%s3305_s2 + $0x58] sm:$0xff] }
 0x631   :  { %v439_v14 = vadd.f32 %v2545_v9, %v436_v11  ;;  %664 = vmatpush.bf16.msra.mxu3 %v2479_v3  ;;  %v2480_v11 = vld [vmem:[%s3305_s2 + $0x60] sm:$0xff] }
 0x632   :  { %v428_v7 = vmul.f32 %v2610_v62, %v427_v4  ;;  %v2481_v4 = vld [vmem:[%s3305_s2 + $0x68] sm:$0xff] }
 0x633   :  { %697 = vmatpush.bf16.msrb.mxu0 %v2481_v4 }
 0x634   :  { %v432_v8 = vsel %vm431_vm14, %v2610_v62, %v428_v7 }
 0x635   :  { %v434_v12 = vmul.f32 %v432_v8, %v400_v45  ;;  %v2476_v8 = vld [vmem:[%s3305_s2 + $0x40] sm:$0xff] }
 0x636   :  { %632 = vmatpush.bf16.msra.mxu2 %v2476_v8 }
 0x637   :  { %v437_v13 = vmul.f32 %v2544_v5, %v434_v12  ;;  %698 = vmatpush.bf16.msrb.mxu0 %v2480_v11 }
 0x639   :  { %v440_v15 = vadd.f32 %v2545_v9, %v437_v13  ;;  %v2478_v9 = vld [vmem:[%s3305_s2 + $0x50] sm:$0xff] }
 0x63a   :  { %665 = vmatpush.bf16.msra.mxu3 %v2478_v9 }
 0x63b   :  { %v441_v16 = vpack.c.bf16 %v440_v15, %v439_v14 }
 0x63d   :  { %2150 = vmatmul.msk.bf16.vlgmr.msra.gmra.mxu0 %vm30_vm0, %v441_v16 }
 0x6ba   :  { %v472_v21 = vpop.f32.mrf.mxu0 }
 0x6bb   :  { %v473_v23 = vadd.f32 %v2546_v20, %v472_v21 }
 0x6bd   :  { %v477_v24 = vmul.f32 %v473_v23, %v473_v23 }
 0x6bf   :  { %v479_v25 = vmul.f32 %v477_v24, %v473_v23 }
 0x6c1   :  { %v481_v26 = vmul.f32 0.044715, %v479_v25 }
 0x6c2   :  { %v474_v28 = vpop.f32.mrf.mxu0 }
 0x6c3   :  { %v483_v29 = vadd.f32 %v481_v26, %v473_v23  ;;  %v475_v30 = vadd.f32 %v2546_v20, %v474_v28  ;;  %v2548_v28 = vld [vmem:[%s3304_s5 + $0x8] ss:$0 sm:$0xff] }
 0x6c5   :  { %v485_v31 = vmul.f32 0.7978846, %v483_v29  ;;  %v478_v32 = vmul.f32 %v475_v30, %v475_v30 }
 0x6c7   :  { %v480_v33 = vmul.f32 %v478_v32, %v475_v30  ;;  %2611 = vtanh.f32 %v485_v31  ;;  %v2549_v32 = vld [vmem:[%s3304_s5 + $0x9] ss:$0 sm:$0xff] }
 0x6c9   :  { %v482_v35 = vmul.f32 0.044715, %v480_v33 }
 0x6cb   :  { %v484_v36 = vadd.f32 %v482_v35, %v475_v30 }
 0x6cd   :  { %v486_v37 = vmul.f32 0.7978846, %v484_v36  ;;  %v2612_v38 = vpop.eup %2611 }
 0x6ce   :  { %v489_v39 = vadd.f32 1.0, %v2612_v38 }
 0x6cf   :  { %2613 = vtanh.f32 %v486_v37 }
 0x6d0   :  { %v491_v41 = vmul.f32 0.5, %v489_v39 }
 0x6d2   :  { %v493_v44 = vmul.f32 %v491_v41, %v473_v23  ;;  %v2550_v41 = vld [vmem:[%s3304_s5 + $0xe] ss:$0 sm:$0xff] }
 0x6d5   :  { %v2614_v40 = vpop.eup %2613 }
 0x6d6   :  { %v490_v42 = vadd.f32 1.0, %v2614_v40 }
 0x6d8   :  { %v492_v43 = vmul.f32 0.5, %v490_v42 }
 0x6da   :  { %v494_v53 = vmul.f32 %v492_v43, %v475_v30 }
 0x6dc   :  { %v495_v45 = vpack.c.bf16 %v494_v53, %v493_v44  ;;  %v2551_v53 = vld [vmem:[%s3304_s5 + $0xc] ss:$0 sm:$0xff] }
 0x6de   :  { %2167 = vmatmul.msk.bf16.vlgmr.msra.gmra.mxu1 %vm530_vm15, %v495_v45  ;;  %v2552_v45 = vld [vmem:[%s3304_s5 + $0xd] ss:$0 sm:$0xff] }
 0x75b   :  { %v543_v47 = vpop.f32.mrf.mxu1 }
 0x75c   :  { %v544_v54 = vadd.f32 %v2547_v46, %v543_v47 }
 0x75e   :  { %v548_v48 = vadd.f32 %v544_v54, %v439_v14 }
 0x760   :  { %v552_v49 = vsel %vm30_vm0, %v548_v48, 0.0 }
 0x761   :  { %553 = vadd.xlane.f32.xlu0 %v552_v49 }
 0x763   :  { %v545_v50 = vpop.f32.mrf.mxu1 }
 0x764   :  { %v546_v51 = vadd.f32 %v2547_v46, %v545_v50 }
 0x766   :  { %v549_v52 = vadd.f32 %v546_v51, %v440_v15 }
 0x768   :  { %v555_v55 = vsel %vm30_vm0, %v549_v52, 0.0 }
 0x769   :  { %556 = vadd.xlane.f32.xlu2 %v555_v55 }
 0x7d4   :  { %v554_v56 = vpop.xlane.xlu0 %553 }
 0x7d5   :  { %v558_v57 = vmul.f32 %v554_v56, %v2734_v10 }
 0x7d7   :  { %v560_v58 = vsub.f32 %v548_v48, %v558_v57 }
 0x7d9   :  { %v562_v59 = vmul.f32 %v560_v58, %v560_v58 }
 0x7db   :  { %v564_v60 = vsel %vm30_vm0, %v562_v59, 0.0 }
 0x7dc   :  { %v557_v61 = vpop.xlane.xlu2 %556  ;;  %565 = vadd.xlane.f32.xlu2 %v564_v60 }
 0x7dd   :  { %v559_v62 = vmul.f32 %v557_v61, %v2734_v10 }
 0x7df   :  { %v561_v63 = vsub.f32 %v549_v52, %v559_v62 }
 0x7e1   :  { %v563_v0 = vmul.f32 %v561_v63, %v561_v63 }
 0x7e3   :  { %v567_v1 = vsel %vm30_vm0, %v563_v0, 0.0 }
 0x7e4   :  { %568 = vadd.xlane.f32.xlu2 %v567_v1 }
 0x84f   :  { %v566_v5 = vpop.xlane.xlu2 %565 }
 0x850   :  { %v570_v6 = vmul.f32 %v566_v5, %v2734_v10 }
 0x852   :  { %v572_v7 = vadd.f32 1e-12, %v570_v6 }
 0x854   :  { %2615 = vrsqrt.f32 %v572_v7  ;;  %vm580_vm2 = vweird.f32 %v572_v7 }
 0x857   :  { %v569_v12 = vpop.xlane.xlu2 %568 }
 0x858   :  { %v571_v13 = vmul.f32 %v569_v12, %v2734_v10 }
 0x85a   :  { %v2616_v14 = vpop.eup %2615  ;;  %v573_v15 = vadd.f32 1e-12, %v571_v13 }
 0x85b   :  { %v575_v16 = vmul.f32 %v2616_v14, %v572_v7  ;;  %vm581_vm1 = vweird.f32 %v2616_v14 }
 0x85c   :  { %2617 = vrsqrt.f32 %v573_v15  ;;  %vm582_vm3 = vmor %vm580_vm2, %vm581_vm1  ;;  %vm590_vm5 = vweird.f32 %v573_v15 }
 0x85d   :  { %v576_v17 = vmul.f32 %v2616_v14, %v575_v16 }
 0x85f   :  { %v577_v18 = vmul.f32 0.5, %v576_v17 }
 0x861   :  { %v578_v19 = vsub.f32 1.5, %v577_v18 }
 0x862   :  { %v2618_v20 = vpop.eup %2617 }
 0x863   :  { %v579_v21 = vmul.f32 %v2616_v14, %v578_v19  ;;  %v585_v22 = vmul.f32 %v2618_v20, %v573_v15  ;;  %vm591_vm4 = vweird.f32 %v2618_v20 }
 0x864   :  { %vm592_vm6 = vmor %vm590_vm5, %vm591_vm4 }
 0x865   :  { %v586_v23 = vmul.f32 %v2618_v20, %v585_v22  ;;  %v583_v24 = vsel %vm582_vm3, %v2616_v14, %v579_v21 }
 0x866   :  { %v594_v29 = vmul.f32 %v583_v24, %v560_v58 }
 0x867   :  { %v587_v25 = vmul.f32 0.5, %v586_v23 }
 0x868   :  { %v597_v33 = vmul.f32 %v2548_v28, %v594_v29 }
 0x869   :  { %v588_v26 = vsub.f32 1.5, %v587_v25 }
 0x86a   :  { %v2902_v37 = vadd.f32 %v2549_v32, %v597_v33 }
 0x86b   :  { %v589_v30 = vmul.f32 %v2618_v20, %v588_v26 }
 0x86d   :  { %v593_v31 = vsel %vm592_vm6, %v2618_v20, %v589_v30 }
 0x86e   :  { %v595_v35 = vmul.f32 %v593_v31, %v561_v63 }
 0x870   :  { %v598_v36 = vmul.f32 %v2548_v28, %v595_v35 }
 0x872   :  { %v2904_v38 = vadd.f32 %v2549_v32, %v598_v36 }
 0x874   :  { %v602_v39 = vpack.c.bf16 %v2904_v38, %v2902_v37 }
 0x876   :  { %2180 = vmatmul.msk.bf16.vlgmr.msra.gmra.mxu2 %vm30_vm0, %v602_v39  ;;  %2193 = vmatmul.msk.bf16.vlgmr.msra.gmra.mxu3 %vm30_vm0, %v602_v39 }
 0x877   :  { %2206 = vmatmul.msk.bf16.vlgmr.msrb.gmra.mxu0 %vm30_vm0, %v602_v39 }
 0x8f4   :  { %v700_v40 = vpop.f32.mrf.mxu0 }
 0x8f5   :  { %v701_v42 = vadd.f32 %v2550_v41, %v700_v40 }
 0x8f7   :  { %v709_v47 = vpack.c.bf16 %v701_v42, %v701_v42 }
 0x8f9   :  { %v634_v43 = vpop.f32.mrf.mxu2  ;;  %v667_v44 = vpop.f32.mrf.mxu3  ;;  %v766_v51 = vunpack.c.l.b16 %v709_v47 }
 0x8fa   :  { %v635_v48 = vadd.f32 %v2551_v53, %v634_v43  ;;  %v668_v49 = vadd.f32 %v2552_v45, %v667_v44 }
 0x8fc   :  { %v702_v46 = vpop.f32.mrf.mxu0  ;;  %v705_v57 = vpack.c.bf16 %v635_v48, %v635_v48  ;;  %v707_v58 = vpack.c.bf16 %v668_v49, %v668_v49 }
 0x8fd   :  { %v703_v54 = vadd.f32 %v2550_v41, %v702_v46 }
 0x8fe   :  { %v713_v0 = vunpack.c.l.b16 %v705_v57  ;;  %v718_v1 = vunpack.c.l.b16 %v707_v58 }
 0x8ff   :  { %v710_v50 = vpack.c.bf16 %v703_v54, %v703_v54 }
 0x901   :  { %v767_v52 = vunpack.c.l.b16 %v710_v50  ;;  %v636_v55 = vpop.f32.mrf.mxu2  ;;  %v669_v56 = vpop.f32.mrf.mxu3 }
 0x902   :  { %v637_v59 = vadd.f32 %v2551_v53, %v636_v55  ;;  %v670_v60 = vadd.f32 %v2552_v45, %v669_v56 }
 0x903   :  { %v768_v61 = vpack.c.b16 %v767_v52, %v766_v51 }
 0x904   :  { %v706_v62 = vpack.c.bf16 %v637_v59, %v637_v59  ;;  %v708_v63 = vpack.c.bf16 %v670_v60, %v670_v60 }
 0x905   :  { %780 = vmatpush.bf16.msrb.mxu2 %v768_v61 }
 0x906   :  { %v714_v2 = vunpack.c.l.b16 %v706_v62  ;;  %v719_v3 = vunpack.c.l.b16 %v708_v63  ;;  %v2483_v63 = vld [vmem:[%s3305_s2 + $0x78] sm:$0xff] }
 0x908   :  { %v715_v4 = vpack.c.b16 %v714_v2, %v713_v0  ;;  %v720_v5 = vpack.c.b16 %v719_v3, %v718_v1  ;;  %v2482_v0 = vld [vmem:[%s3305_s2 + $0x70] sm:$0xff] }
 0x90a   :  { %789 = vrot.lane.b32.xlu1 %v720_v5, %s2688_s22  ;;  %787 = vrot.lane.b32.xlu2 %v715_v4, %s2688_s22  ;;  %v725_v6 = vsel %vm206_vm8, %v720_v5, 0 }
 0x90b   :  { %734 = vmatpush.bf16.xpose.msrb.mxu1 %v725_v6 }
 0x912   :  { %2207 = vmatmul.msk.bf16.vlgmr.msrb.gmra.mxu1 %vm206_vm8, %v715_v4 }
 0x913   :  { %893 = vmatpush.bf16.msra.mxu1 %v2483_v63  ;;  %v2556_v63 = vld [vmem:[%s3304_s5 + $0x14] ss:$0 sm:$0xff] }
 0x917   :  { %894 = vmatpush.bf16.msra.mxu1 %v2482_v0 }
 0x964   :  { %v788_v9 = vpop.permute.xlu2 %787 }
 0x97c   :  { %v790_v7 = vpop.permute.xlu1 %789 }
 0x97d   :  { %v795_v8 = vsel %vm206_vm8, %v790_v7, 0 }
 0x97e   :  { %804 = vmatpush.bf16.xpose.msrb.mxu3 %v795_v8 }
 0x985   :  { %2209 = vmatmul.msk.bf16.vlgmr.msrb.gmra.mxu3 %vm206_vm8, %v788_v9  ;;  %v2553_v9 = vld [vmem:[%s3304_s5 + $0xf] ss:$0 sm:$0xff] }
 0x98f   :  { %v736_v11 = vpop.f32.mrf.mxu1 }
 0x990   :  { %v737_v18 = vadd.f32 %v736_v11, %v2793_v27 }
 0x992   :  { %v741_v22 = vsel %vm206_vm8, %v737_v18, -inf }
 0x997   :  { %v738_v12 = vpop.f32.mrf.mxu1 }
 0x998   :  { %v739_v13 = vadd.f32 %v738_v12, %v2802_v34 }
 0x99a   :  { %v744_v14 = vsel %vm206_vm8, %v739_v13, -inf }
 0x99b   :  { %745 = vmax.xlane.f32.xlu2 %v744_v14 }
 0xa08   :  { %v806_v15 = vpop.f32.mrf.mxu3 }
 0xa09   :  { %v807_v16 = vadd.f32 %v806_v15, %v2793_v27 }
 0xa0b   :  { %v811_v17 = vsel %vm206_vm8, %v807_v16, -inf }
 0xa0c   :  { %812 = vmax.xlane.f32.xlu0 %v811_v17 }
 0xa0e   :  { %v746_v40 = vpop.xlane.xlu2 %745 }
 0xa0f   :  { %v748_v41 = vsub.f32 %v739_v13, %v746_v40 }
 0xa10   :  { %v808_v19 = vpop.f32.mrf.mxu3 }
 0xa11   :  { %v809_v20 = vadd.f32 %v808_v19, %v2802_v34  ;;  %v751_v42 = vmul.f32 1.442695, %v748_v41 }
 0xa13   :  { %v814_v21 = vsel %vm206_vm8, %v809_v20, -inf }
 0xa14   :  { %815 = vmax.xlane.f32.xlu1 %v814_v21  ;;  %742 = vmax.xlane.f32.xlu0 %v741_v22 }
 0xa7f   :  { %v813_v23 = vpop.xlane.xlu0 %812 }
 0xa80   :  { %v817_v24 = vsub.f32 %v807_v16, %v813_v23 }
 0xa82   :  { %v819_v25 = vmul.f32 1.442695, %v817_v24 }
 0xa84   :  { %2619 = vpow2.f32 %v819_v25 }
 0xa87   :  { %v816_v26 = vpop.xlane.xlu1 %815  ;;  %v743_v28 = vpop.xlane.xlu0 %742 }
 0xa88   :  { %v818_v29 = vsub.f32 %v809_v20, %v816_v26  ;;  %v747_v30 = vsub.f32 %v737_v18, %v743_v28 }
 0xa8a   :  { %v2620_v31 = vpop.eup %2619  ;;  %v821_v32 = vmul.f32 1.442695, %v818_v29  ;;  %v749_v27 = vmul.f32 1.442695, %v747_v30 }
 0xa8b   :  { %v823_v33 = vsel %vm206_vm8, %v2620_v31, 0.0 }
 0xa8c   :  { %2621 = vpow2.f32 %v821_v32  ;;  %824 = vadd.xlane.f32.xlu0 %v823_v33  ;;  %v2484_v32 = vld [vmem:[%s3307_s3 + $0x10] sm:$0xff] }
 0xa8d   :  { %2623 = vpow2.f32 %v749_v27 }
 0xa8e   :  { %2625 = vpow2.f32 %v751_v42 }
 0xa92   :  { %v2622_v34 = vpop.eup %2621 }
 0xa93   :  { %v2624_v35 = vpop.eup %2623  ;;  %v826_v36 = vsel %vm206_vm8, %v2622_v34, 0.0 }
 0xa94   :  { %827 = vadd.xlane.f32.xlu0 %v826_v36  ;;  %v753_v39 = vsel %vm206_vm8, %v2624_v35, 0.0  ;;  %v2626_v43 = vpop.eup %2625 }
 0xa95   :  { %754 = vadd.xlane.f32.xlu1 %v753_v39  ;;  %v756_v44 = vsel %vm206_vm8, %v2626_v43, 0.0 }
 0xaa8   :  { %834 = vrot.lane.b32.xlu0 %v768_v61, %s2688_s22 }
 0xad2   :  { %757 = vadd.xlane.f32.xlu0 %v756_v44 }
 0xaff   :  { %v825_v53 = vpop.xlane.xlu0 %824 }
 0xb07   :  { %v828_v45 = vpop.xlane.xlu0 %827 }
 0xb08   :  { %2627 = vrcp.f32 %v828_v45  ;;  %v755_v51 = vpop.xlane.xlu1 %754 }
 0xb09   :  { %2629 = vrcp.f32 %v825_v53 }
 0xb0a   :  { %2631 = vrcp.f32 %v755_v51  ;;  %v2555_v51 = vld [vmem:[%s3304_s5 + $0x11] ss:$0 sm:$0xff] }
 0xb0e   :  { %v2628_v46 = vpop.eup %2627 }
 0xb0f   :  { %v2630_v47 = vpop.eup %2629  ;;  %v832_v54 = vmul.f32 %v2628_v46, %v2622_v34 }
 0xb10   :  { %v831_v48 = vmul.f32 %v2630_v47, %v2620_v31  ;;  %v2632_v55 = vpop.eup %2631 }
 0xb11   :  { %v761_v57 = vmul.f32 %v2632_v55, %v2624_v35 }
 0xb12   :  { %v833_v50 = vpack.c.bf16 %v832_v54, %v831_v48  ;;  %v2554_v54 = vld [vmem:[%s3304_s5 + $0x10] ss:$0 sm:$0xff] }
 0xb1a   :  { %v835_v49 = vpop.permute.xlu0 %834 }
 0xb1b   :  { %847 = vmatpush.bf16.msra.mxu0 %v835_v49 }
 0xb1e   :  { %2210 = vmatmul.msk.bf16.vlgmr.msra.gmra.mxu0 %vm206_vm8, %v833_v50 }
 0xb45   :  { %v758_v52 = vpop.xlane.xlu0 %757 }
 0xb46   :  { %2633 = vrcp.f32 %v758_v52 }
 0xb4c   :  { %v2634_v56 = vpop.eup %2633 }
 0xb4d   :  { %v762_v58 = vmul.f32 %v2634_v56, %v2626_v43 }
 0xb4f   :  { %v763_v59 = vpack.c.bf16 %v762_v58, %v761_v57 }
 0xb51   :  { %2208 = vmatmul.msk.bf16.vlgmr.msrb.gmra.mxu2 %vm206_vm8, %v763_v59 }
 0xb9b   :  { %v849_v60 = vpop.f32.mrf.mxu0 }
 0xba3   :  { %v851_v61 = vpop.f32.mrf.mxu0 }
 0xba4   :  { %v2533_v62 = vpack.i.bf16 %v851_v61, %v849_v60  ;;  %v2489_v60 = vld [vmem:[%s3308_s4 + $0x38] sm:$0xff]  ;;  %v2488_v61 = vld [vmem:[%s3308_s4 + $0x30] sm:$0xff] }
 0xba5   :  { %1053 = vmatpush.bf16.msra.mxu3 %v2489_v60 }
 0xba6   :  { %2534 = vrot.lane.b32.xlu2 %v2533_v62, %s2689_s28  ;;  %v2487_v62 = vld [vmem:[%s3308_s4 + $0x28] sm:$0xff] }
 0xba9   :  { %1054 = vmatpush.bf16.msra.mxu3 %v2488_v61 }
 0xbad   :  { %1055 = vmatpush.bf16.msra.mxu3 %v2487_v62 }
 0xbd4   :  { %v782_v1 = vpop.f32.mrf.mxu2 }
 0xbdc   :  { %v784_v5 = vpop.f32.mrf.mxu2 }
 0xc00   :  { %v2535_v2 = vpop.permute.xlu2 %2534 }
 0xc01   :  { %v2537_v3 = vunpack.i.h.bf16 %v2535_v2  ;;  %v2536_v4 = vunpack.i.l.bf16 %v2535_v2 }
 0xc03   :  { %v862_v6 = vsel %vm206_vm8, %v782_v1, %v2536_v4  ;;  %v863_v7 = vsel %vm206_vm8, %v784_v5, %v2537_v3  ;;  %v2486_v1 = vld [vmem:[%s3308_s4 + $0x20] sm:$0xff] }
 0xc04   :  { %v864_v8 = vpack.c.bf16 %v863_v7, %v862_v6  ;;  %1056 = vmatpush.bf16.msra.mxu3 %v2486_v1 }
 0xc06   :  { %2223 = vmatmul.msk.bf16.vlgmr.msra.gmra.mxu1 %vm30_vm0, %v864_v8 }
 0xc83   :  { %v896_v11 = vpop.f32.mrf.mxu1 }
 0xc84   :  { %v897_v12 = vadd.f32 %v2553_v9, %v896_v11 }
 0xc86   :  { %v901_v13 = vadd.f32 %v897_v12, %v2902_v37 }
 0xc88   :  { %v905_v14 = vsel %vm30_vm0, %v901_v13, 0.0 }
 0xc89   :  { %906 = vadd.xlane.f32.xlu1 %v905_v14 }
 0xc8b   :  { %v898_v15 = vpop.f32.mrf.mxu1 }
 0xc8c   :  { %v899_v16 = vadd.f32 %v2553_v9, %v898_v15 }
 0xc8e   :  { %v902_v17 = vadd.f32 %v899_v16, %v2904_v38  ;;  %v2485_v38 = vld [vmem:[%s3307_s3 + $0x18] sm:$0xff] }
 0xc8f   :  { %984 = vmatpush.bf16.msra.mxu2 %v2485_v38 }
 0xc90   :  { %v908_v18 = vsel %vm30_vm0, %v902_v17, 0.0 }
 0xc91   :  { %909 = vadd.xlane.f32.xlu1 %v908_v18 }
 0xc93   :  { %985 = vmatpush.bf16.msra.mxu2 %v2484_v32 }
 0xcfc   :  { %v907_v19 = vpop.xlane.xlu1 %906 }
 0xcfd   :  { %v911_v20 = vmul.f32 %v907_v19, %v2734_v10 }
 0xcff   :  { %v913_v21 = vsub.f32 %v901_v13, %v911_v20 }
 0xd01   :  { %v915_v22 = vmul.f32 %v913_v21, %v913_v21 }
 0xd03   :  { %v917_v23 = vsel %vm30_vm0, %v915_v22, 0.0 }
 0xd04   :  { %918 = vadd.xlane.f32.xlu1 %v917_v23  ;;  %v910_v24 = vpop.xlane.xlu1 %909 }
 0xd05   :  { %v912_v37 = vmul.f32 %v910_v24, %v2734_v10 }
 0xd07   :  { %v914_v25 = vsub.f32 %v902_v17, %v912_v37  ;;  %v2557_v37 = vld [vmem:[%s3304_s5 + $0x15] ss:$0 sm:$0xff] }
 0xd09   :  { %v916_v26 = vmul.f32 %v914_v25, %v914_v25 }
 0xd0b   :  { %v920_v28 = vsel %vm30_vm0, %v916_v26, 0.0 }
 0xd0c   :  { %921 = vadd.xlane.f32.xlu2 %v920_v28 }
 0xd77   :  { %v919_v29 = vpop.xlane.xlu1 %918 }
 0xd78   :  { %v923_v30 = vmul.f32 %v919_v29, %v2734_v10 }
 0xd7a   :  { %v925_v31 = vadd.f32 1e-12, %v923_v30 }
 0xd7c   :  { %2635 = vrsqrt.f32 %v925_v31  ;;  %vm933_vm9 = vweird.f32 %v925_v31 }
 0xd7f   :  { %v922_v27 = vpop.xlane.xlu2 %921 }
 0xd80   :  { %v924_v33 = vmul.f32 %v922_v27, %v2734_v10 }
 0xd82   :  { %v2636_v34 = vpop.eup %2635  ;;  %v926_v35 = vadd.f32 1e-12, %v924_v33 }
 0xd83   :  { %v928_v36 = vmul.f32 %v2636_v34, %v925_v31  ;;  %vm934_vm7 = vweird.f32 %v2636_v34 }
 0xd84   :  { %2637 = vrsqrt.f32 %v926_v35  ;;  %vm935_vm10 = vmor %vm933_vm9, %vm934_vm7  ;;  %vm943_vm12 = vweird.f32 %v926_v35 }
 0xd85   :  { %v929_v39 = vmul.f32 %v2636_v34, %v928_v36 }
 0xd87   :  { %v930_v40 = vmul.f32 0.5, %v929_v39 }
 0xd89   :  { %v931_v41 = vsub.f32 1.5, %v930_v40 }
 0xd8a   :  { %v2638_v42 = vpop.eup %2637 }
 0xd8b   :  { %v932_v43 = vmul.f32 %v2636_v34, %v931_v41  ;;  %v938_v44 = vmul.f32 %v2638_v42, %v926_v35  ;;  %vm944_vm11 = vweird.f32 %v2638_v42 }
 0xd8c   :  { %vm945_vm13 = vmor %vm943_vm12, %vm944_vm11 }
 0xd8d   :  { %v939_v53 = vmul.f32 %v2638_v42, %v938_v44  ;;  %v936_v45 = vsel %vm935_vm10, %v2636_v34, %v932_v43  ;;  %v2493_v44 = vld [vmem:[%s3305_s2 + $0x88] sm:$0xff] }
 0xd8e   :  { %v947_v48 = vmul.f32 %v936_v45, %v913_v21  ;;  %1251 = vmatpush.bf16.msrb.mxu2 %v2493_v44 }
 0xd8f   :  { %v940_v46 = vmul.f32 0.5, %v939_v53  ;;  %v2495_v53 = vld [vmem:[%s3305_s2 + $0x98] sm:$0xff] }
 0xd90   :  { %v950_v52 = vmul.f32 %v2554_v54, %v947_v48  ;;  %1284 = vmatpush.bf16.msrb.mxu3 %v2495_v53 }
 0xd91   :  { %v941_v47 = vsub.f32 1.5, %v940_v46 }
 0xd92   :  { %v953_v57 = vadd.f32 %v2555_v51, %v950_v52 }
 0xd93   :  { %v942_v49 = vmul.f32 %v2638_v42, %v941_v47  ;;  %v2492_v47 = vld [vmem:[%s3305_s2 + $0x80] sm:$0xff] }
 0xd94   :  { %1252 = vmatpush.bf16.msrb.mxu2 %v2492_v47  ;;  %v3066_v47 = vld [vmem:[%s3306_s1] sm:$0xff] }
 0xd95   :  { %v946_v50 = vsel %vm945_vm13, %v2638_v42, %v942_v49 }
 0xd96   :  { %v948_v55 = vmul.f32 %v946_v50, %v914_v25 }
 0xd98   :  { %v951_v56 = vmul.f32 %v2554_v54, %v948_v55  ;;  %v2494_v54 = vld [vmem:[%s3305_s2 + $0x90] sm:$0xff] }
 0xd99   :  { %1285 = vmatpush.bf16.msrb.mxu3 %v2494_v54 }
 0xd9a   :  { %v954_v58 = vadd.f32 %v2555_v51, %v951_v56 }
 0xd9c   :  { %v955_v59 = vpack.c.bf16 %v954_v58, %v953_v57 }
 0xd9e   :  { %2236 = vmatmul.msk.bf16.vlgmr.msra.gmra.mxu2 %vm30_vm0, %v955_v59 }
 0xe21   :  { %v987_v0 = vpop.f32.mrf.mxu2 }
 0xe22   :  { %v988_v2 = vadd.f32 %v2556_v63, %v987_v0  ;;  %v1117_v0 = vlaneseq }
 0xe24   :  { %v992_v3 = vmul.f32 %v988_v2, %v988_v2 }
 0xe26   :  { %v994_v4 = vmul.f32 %v992_v3, %v988_v2 }
 0xe28   :  { %v996_v5 = vmul.f32 0.044715, %v994_v4  ;;  %v1118_v4 = vshrl.u32 %v1117_v0, 7 }
 0xe29   :  { %v989_v6 = vpop.f32.mrf.mxu2 }
 0xe2a   :  { %v998_v7 = vadd.f32 %v996_v5, %v988_v2  ;;  %v990_v8 = vadd.f32 %v2556_v63, %v989_v6  ;;  %v2558_v5 = vld [vmem:[%s3304_s5 + $0x12] ss:$0 sm:$0xff] }
 0xe2c   :  { %v1000_v9 = vmul.f32 0.7978846, %v998_v7  ;;  %v993_v11 = vmul.f32 %v990_v8, %v990_v8 }
 0xe2e   :  { %v995_v12 = vmul.f32 %v993_v11, %v990_v8  ;;  %2639 = vtanh.f32 %v1000_v9  ;;  %v1119_v9 = vmul.u32 8, %v1118_v4  ;;  %v3022_v11 = vand.u32 127, %v1117_v0 }
 0xe30   :  { %v997_v13 = vmul.f32 0.044715, %v995_v12  ;;  %vm1122_vm6 = vcmp.eq.s32.totalorder %v1119_v9, %v3022_v11  ;;  %v2498_v9 = vld [vmem:[%s3305_s2 + $0xb0] sm:$0xff] }
 0xe32   :  { %v999_v14 = vadd.f32 %v997_v13, %v990_v8  ;;  %v2559_v13 = vld [vmem:[%s3304_s5 + $0x13] ss:$0 sm:$0xff] }
 0xe34   :  { %v1001_v15 = vmul.f32 0.7978846, %v999_v14  ;;  %v2640_v16 = vpop.eup %2639 }
 0xe35   :  { %v1004_v17 = vadd.f32 1.0, %v2640_v16 }
 0xe36   :  { %2641 = vtanh.f32 %v1001_v15 }
 0xe37   :  { %v1006_v19 = vmul.f32 0.5, %v1004_v17 }
 0xe39   :  { %v1008_v22 = vmul.f32 %v1006_v19, %v988_v2  ;;  %v2690_v19 = vmov 0.0  }
 0xe3c   :  { %v2642_v18 = vpop.eup %2641 }
 0xe3d   :  { %v1005_v20 = vadd.f32 1.0, %v2642_v18 }
 0xe3f   :  { %v1007_v21 = vmul.f32 0.5, %v1005_v20  ;;  %v2262_v20 = vsel %vm1122_vm6, 1.0, %v2690_v19 }
 0xe41   :  { %v1009_v23 = vmul.f32 %v1007_v21, %v990_v8  ;;  %v2497_v21 = vld [vmem:[%s3305_s2 + $0xa8] sm:$0xff] }
 0xe43   :  { %v1010_v24 = vpack.c.bf16 %v1009_v23, %v1008_v22  ;;  %v2496_v22 = vld [vmem:[%s3305_s2 + $0xa0] sm:$0xff] }
 0xe44   :  { %v2490_v23 = vld [vmem:[%s3305_s2 + $0x100] sm:$0xff] }
 0xe45   :  { %2261 = vmatmul.msk.bf16.vlgmr.msra.gmra.mxu3 %vm530_vm15, %v1010_v24 }
 0xec8   :  { %v1058_v25 = vpop.f32.mrf.mxu3 }
 0xec9   :  { %v1059_v26 = vadd.f32 %v2557_v37, %v1058_v25 }
 0xecb   :  { %v1063_v28 = vadd.f32 %v1059_v26, %v953_v57 }
 0xecd   :  { %v1067_v38 = vsel %vm30_vm0, %v1063_v28, 0.0 }
 0xece   :  { %1068 = vadd.xlane.f32.xlu1 %v1067_v38  ;;  %v2561_v38 = vld [vmem:[%s3304_s5 + $0x17] ss:$0 sm:$0xff] }
 0xed0   :  { %v1060_v29 = vpop.f32.mrf.mxu3 }
 0xed1   :  { %v1061_v30 = vadd.f32 %v2557_v37, %v1060_v29  ;;  %v2562_v29 = vld [vmem:[%s3304_s5 + $0x18] ss:$0 sm:$0xff] }
 0xed3   :  { %v1064_v31 = vadd.f32 %v1061_v30, %v954_v58  ;;  %v2491_v58 = vld [vmem:[%s3305_s2 + $0x108] sm:$0xff] }
 0xed4   :  { %1177 = vmatpush.bf16.msrb.mxu1 %v2491_v58 }
 0xed5   :  { %v1070_v32 = vsel %vm30_vm0, %v1064_v31, 0.0 }
 0xed6   :  { %1071 = vadd.xlane.f32.xlu1 %v1070_v32 }
 0xed8   :  { %1178 = vmatpush.bf16.msrb.mxu1 %v2490_v23 }
 0xf41   :  { %v1069_v27 = vpop.xlane.xlu1 %1068 }
 0xf42   :  { %v1073_v33 = vmul.f32 %v1069_v27, %v2734_v10 }
 0xf44   :  { %v1075_v34 = vsub.f32 %v1063_v28, %v1073_v33 }
 0xf46   :  { %v1077_v35 = vmul.f32 %v1075_v34, %v1075_v34 }
 0xf48   :  { %v1079_v36 = vsel %vm30_vm0, %v1077_v35, 0.0 }
 0xf49   :  { %1080 = vadd.xlane.f32.xlu0 %v1079_v36  ;;  %v1072_v39 = vpop.xlane.xlu1 %1071 }
 0xf4a   :  { %v1074_v40 = vmul.f32 %v1072_v39, %v2734_v10  ;;  %v2560_v39 = vld [vmem:[%s3304_s5 + $0x16] ss:$0 sm:$0xff] }
 0xf4c   :  { %v1076_v41 = vsub.f32 %v1064_v31, %v1074_v40 }
 0xf4e   :  { %v1078_v42 = vmul.f32 %v1076_v41, %v1076_v41 }
 0xf50   :  { %v1082_v43 = vsel %vm30_vm0, %v1078_v42, 0.0 }
 0xf51   :  { %1083 = vadd.xlane.f32.xlu1 %v1082_v43 }
 0xfbc   :  { %v1081_v45 = vpop.xlane.xlu0 %1080 }
 0xfbd   :  { %v1085_v46 = vmul.f32 %v1081_v45, %v2734_v10 }
 0xfbf   :  { %v1087_v48 = vadd.f32 1e-12, %v1085_v46 }
 0xfc1   :  { %2643 = vrsqrt.f32 %v1087_v48  ;;  %vm1095_vm1 = vweird.f32 %v1087_v48 }
 0xfc4   :  { %v1084_v49 = vpop.xlane.xlu1 %1083 }
 0xfc5   :  { %v1086_v50 = vmul.f32 %v1084_v49, %v2734_v10 }
 0xfc7   :  { %v2644_v51 = vpop.eup %2643  ;;  %v1088_v52 = vadd.f32 1e-12, %v1086_v50  ;;  %v3073_v50 = vld [vmem:[%s3306_s1 + $0x8] sm:$0xff] }
 0xfc8   :  { %v1090_v55 = vmul.f32 %v2644_v51, %v1087_v48  ;;  %vm1096_vm14 = vweird.f32 %v2644_v51 }
 0xfc9   :  { %2645 = vrsqrt.f32 %v1088_v52  ;;  %vm1097_vm2 = vmor %vm1095_vm1, %vm1096_vm14  ;;  %vm1105_vm4 = vweird.f32 %v1088_v52 }
 0xfca   :  { %v1091_v56 = vmul.f32 %v2644_v51, %v1090_v55 }
 0xfcc   :  { %v1092_v57 = vmul.f32 0.5, %v1091_v56 }
 0xfce   :  { %v1093_v59 = vsub.f32 1.5, %v1092_v57 }
 0xfcf   :  { %v2646_v60 = vpop.eup %2645 }
 0xfd0   :  { %v1094_v61 = vmul.f32 %v2644_v51, %v1093_v59  ;;  %v1100_v62 = vmul.f32 %v2646_v60, %v1088_v52  ;;  %vm1106_vm3 = vweird.f32 %v2646_v60 }
 0xfd1   :  { %vm1107_vm5 = vmor %vm1105_vm4, %vm1106_vm3 }
 0xfd2   :  { %v1101_v63 = vmul.f32 %v2646_v60, %v1100_v62  ;;  %v1098_v1 = vsel %vm1097_vm2, %v2644_v51, %v1094_v61 }
 0xfd3   :  { %v1109_v6 = vmul.f32 %v1098_v1, %v1075_v34 }
 0xfd4   :  { %v1102_v2 = vmul.f32 0.5, %v1101_v63 }
 0xfd5   :  { %v1112_v14 = vmul.f32 %v2558_v5, %v1109_v6 }
 0xfd6   :  { %v1103_v3 = vsub.f32 1.5, %v1102_v2 }
 0xfd7   :  { %v3030_v17 = vadd.f32 %v2559_v13, %v1112_v14 }
 0xfd8   :  { %v1104_v7 = vmul.f32 %v2646_v60, %v1103_v3 }
 0xfda   :  { %v1108_v8 = vsel %vm1107_vm5, %v2646_v60, %v1104_v7 }
 0xfdb   :  { %v1110_v12 = vmul.f32 %v1108_v8, %v1076_v41  ;;  %v2499_v8 = vld [vmem:[%s3305_s2 + $0xb8] sm:$0xff] }
 0xfdc   :  { %1417 = vmatpush.bf16.msra.mxu3 %v2499_v8 }
 0xfdd   :  { %v1113_v15 = vmul.f32 %v2558_v5, %v1110_v12 }
 0xfdf   :  { %v3028_v16 = vadd.f32 %v2559_v13, %v1113_v15  ;;  %v2564_v15 = vld [vmem:[%s3304_s5 + $0x19] ss:$0 sm:$0xff] }
 0xfe0   :  { %1418 = vmatpush.bf16.msra.mxu3 %v2498_v9  ;;  %v2567_v9 = vld [vmem:[%s3304_s5 + $0x1e] ss:$0 sm:$0xff] }
 0xfe1   :  { %1142 = vmatpush.msrb.mxu0 %v3028_v16  ;;  %v1222_v18 = vpack.c.bf16 %v3028_v16, %v3030_v17 }
 0xfe3   :  { %1143 = vmatpush.msrb.mxu0 %v3030_v17  ;;  %2290 = vmatmul.msk.bf16.vlgmr.msrb.gmra.mxu2 %vm30_vm0, %v1222_v18 }
 0xfe4   :  { %2303 = vmatmul.msk.bf16.vlgmr.msrb.gmra.mxu3 %vm30_vm0, %v1222_v18  ;;  %2263 = vmatmul.msk.f32.vlgmr.msrb.gmra.mxu0 %vm206_vm8, %v2262_v20 }
 0xfe5   :  { %1317 = vmatpush.bf16.msra.mxu0 %v2497_v21 }
 0xfe9   :  { %1318 = vmatpush.bf16.msra.mxu0 %v2496_v22 }
 0xfec   :  { %2316 = vmatmul.msk.bf16.vlgmr.msra.gmra.mxu0 %vm30_vm0, %v1222_v18 }
0x1061   :  { %v1145_v24 = vpop.f32.mrf.mxu0 }
0x1062   :  { %v1148_v37 = vpack.c.bf16 %v1145_v24, %v1145_v24 }
0x1064   :  { %2276 = vmatmul.msk.bf16.vlgmr.msrb.gmra.mxu1 %vm30_vm0, %v1148_v37 }
0x1066   :  { %v1254_v26 = vpop.f32.mrf.mxu2 }
0x1067   :  { %v1287_v25 = vpop.f32.mrf.mxu3  ;;  %v1255_v43 = vadd.f32 %v2560_v39, %v1254_v26 }
0x1068   :  { %v1288_v31 = vadd.f32 %v2561_v38, %v1287_v25 }
0x1069   :  { %v1320_v28 = vpop.f32.mrf.mxu0 }
0x106a   :  { %v1321_v33 = vadd.f32 %v2562_v29, %v1320_v28 }
0x106e   :  { %v1256_v36 = vpop.f32.mrf.mxu2 }
0x106f   :  { %v1289_v30 = vpop.f32.mrf.mxu3  ;;  %v1257_v42 = vadd.f32 %v2560_v39, %v1256_v36 }
0x1070   :  { %v1290_v32 = vadd.f32 %v2561_v38, %v1289_v30 }
0x1071   :  { %v1322_v27 = vpop.f32.mrf.mxu0  ;;  %v1325_v44 = vpack.c.bf16 %v1257_v42, %v1255_v43 }
0x1072   :  { %v1326_v34 = vpack.c.bf16 %v1290_v32, %v1288_v31  ;;  %v1323_v35 = vadd.f32 %v2562_v29, %v1322_v27 }
0x1074   :  { %v1327_v40 = vpack.c.bf16 %v1323_v35, %v1321_v33  ;;  %v1332_v41 = vsel %vm30_vm0, %v1326_v34, 0  ;;  %v2500_v35 = vld [vmem:[%s3307_s3 + $0x20] sm:$0xff] }
0x1075   :  { %1341 = vmatpush.bf16.xpose.msra.mxu1 %v1332_v41 }
0x1076   :  { %1381 = vmatpush.bf16.msra.mxu2 %v1327_v40 }
0x107c   :  { %2317 = vmatmul.msk.bf16.vlgmr.msra.gmra.mxu1 %vm30_vm0, %v1325_v44 }
0x10e1   :  { %v3061_v53 = vpop.f32.mrf.mxu1 }
0x10e9   :  { %v1182_v45 = vpop.f32.mrf.mxu1 }
0x10f9   :  { %v1343_v46 = vpop.f32.mrf.mxu1 }
0x10fa   :  { %v1344_v54 = vadd.f32 %v3066_v47, %v1343_v46 }
0x10fc   :  { %v1348_v48 = vsel %vm206_vm8, %v1344_v54, -inf }
0x10fd   :  { %1349 = vmax.xlane.f32.xlu0 %v1348_v48 }
0x1101   :  { %v1345_v49 = vpop.f32.mrf.mxu1 }
0x1102   :  { %v1346_v51 = vadd.f32 %v3073_v50, %v1345_v49 }
0x1104   :  { %v1351_v52 = vsel %vm206_vm8, %v1346_v51, -inf }
0x1105   :  { %1352 = vmax.xlane.f32.xlu1 %v1351_v52 }
0x1170   :  { %v1350_v55 = vpop.xlane.xlu0 %1349 }
0x1171   :  { %v1354_v56 = vsub.f32 %v1344_v54, %v1350_v55 }
0x1173   :  { %v1356_v57 = vmul.f32 1.442695, %v1354_v56 }
0x1175   :  { %2647 = vpow2.f32 %v1356_v57  ;;  %v2565_v57 = vld [vmem:[%s3304_s5 + $0x1a] ss:$0 sm:$0xff] }
0x1178   :  { %v1353_v58 = vpop.xlane.xlu1 %1352 }
0x1179   :  { %v1355_v59 = vsub.f32 %v1346_v51, %v1353_v58 }
0x117b   :  { %v2648_v60 = vpop.eup %2647  ;;  %v1358_v61 = vmul.f32 1.442695, %v1355_v59 }
0x117c   :  { %v1360_v62 = vsel %vm206_vm8, %v2648_v60, 0.0 }
0x117d   :  { %2649 = vpow2.f32 %v1358_v61  ;;  %1361 = vadd.xlane.f32.xlu0 %v1360_v62  ;;  %v2566_v61 = vld [vmem:[%s3304_s5 + $0x1b] ss:$0 sm:$0xff] }
0x1183   :  { %v2650_v63 = vpop.eup %2649 }
0x1184   :  { %v1363_v0 = vsel %vm206_vm8, %v2650_v63, 0.0 }
0x1185   :  { %1364 = vadd.xlane.f32.xlu1 %v1363_v0 }
0x11f0   :  { %v1362_v1 = vpop.xlane.xlu0 %1361 }
0x11f1   :  { %2651 = vrcp.f32 %v1362_v1 }
0x11f7   :  { %v2652_v3 = vpop.eup %2651 }
0x11f8   :  { %v1365_v2 = vpop.xlane.xlu1 %1364  ;;  %v1368_v5 = vmul.f32 %v2652_v3, %v2648_v60 }
0x11f9   :  { %2653 = vrcp.f32 %v1365_v2 }
0x11ff   :  { %v2654_v4 = vpop.eup %2653 }
0x1200   :  { %v1369_v6 = vmul.f32 %v2654_v4, %v2650_v63  ;;  %v2505_v4 = vld [vmem:[%s3308_s4 + $0x58] sm:$0xff] }
0x1201   :  { %1561 = vmatpush.bf16.msrb.mxu1 %v2505_v4  ;;  %v2570_v4 = vld [vmem:[%s3304_s5 + $0x1d] ss:$0 sm:$0xff] }
0x1202   :  { %v1370_v7 = vpack.c.bf16 %v1369_v6, %v1368_v5  ;;  %v2504_v5 = vld [vmem:[%s3308_s4 + $0x50] sm:$0xff]  ;;  %v2503_v6 = vld [vmem:[%s3308_s4 + $0x48] sm:$0xff] }
0x1204   :  { %2318 = vmatmul.msk.bf16.vlgmr.msra.gmra.mxu2 %vm206_vm8, %v1370_v7  ;;  %v2502_v7 = vld [vmem:[%s3308_s4 + $0x40] sm:$0xff] }
0x1205   :  { %1562 = vmatpush.bf16.msrb.mxu1 %v2504_v5 }
0x1209   :  { %1563 = vmatpush.bf16.msrb.mxu1 %v2503_v6 }
0x120d   :  { %1564 = vmatpush.bf16.msrb.mxu1 %v2502_v7 }
0x1287   :  { %v1383_v12 = vpop.f32.mrf.mxu2 }
0x128f   :  { %v1385_v13 = vpop.f32.mrf.mxu2 }
0x1290   :  { %v1388_v14 = vpack.c.bf16 %v1385_v13, %v1383_v12 }
0x1292   :  { %2331 = vmatmul.msk.bf16.vlgmr.msra.gmra.mxu3 %vm30_vm0, %v1388_v14 }
0x1315   :  { %v1420_v18 = vpop.f32.mrf.mxu3 }
0x1316   :  { %v1421_v19 = vadd.f32 %v2564_v15, %v1420_v18 }
0x1318   :  { %v1425_v20 = vadd.f32 %v1421_v19, %v3030_v17 }
0x131a   :  { %v1429_v21 = vsel %vm30_vm0, %v1425_v20, 0.0 }
0x131b   :  { %1430 = vadd.xlane.f32.xlu2 %v1429_v21 }
0x131d   :  { %v1422_v22 = vpop.f32.mrf.mxu3 }
0x131e   :  { %v1423_v23 = vadd.f32 %v2564_v15, %v1422_v22 }
0x1320   :  { %v1426_v24 = vadd.f32 %v1423_v23, %v3028_v16  ;;  %v2501_v16 = vld [vmem:[%s3307_s3 + $0x28] sm:$0xff] }
0x1321   :  { %1508 = vmatpush.bf16.msrb.mxu0 %v2501_v16 }
0x1322   :  { %v1432_v37 = vsel %vm30_vm0, %v1426_v24, 0.0 }
0x1323   :  { %1433 = vadd.xlane.f32.xlu0 %v1432_v37 }
0x1325   :  { %1509 = vmatpush.bf16.msrb.mxu0 %v2500_v35  ;;  %v2507_v35 = vld [vmem:[%s3305_s2 + $0xc8] sm:$0xff] }
0x1326   :  { %1671 = vmatpush.bf16.msrb.mxu2 %v2507_v35 }
0x138e   :  { %v1431_v25 = vpop.xlane.xlu2 %1430 }
0x138f   :  { %v1435_v26 = vmul.f32 %v1431_v25, %v2734_v10 }
0x1391   :  { %v1437_v28 = vsub.f32 %v1425_v20, %v1435_v26  ;;  %v2568_v20 = vld [vmem:[%s3304_s5 + $0x1f] ss:$0 sm:$0xff] }
0x1393   :  { %v1439_v38 = vmul.f32 %v1437_v28, %v1437_v28 }
0x1395   :  { %v1441_v29 = vsel %vm30_vm0, %v1439_v38, 0.0 }
0x1396   :  { %v1434_v30 = vpop.xlane.xlu0 %1433  ;;  %1442 = vadd.xlane.f32.xlu1 %v1441_v29 }
0x1397   :  { %v1436_v17 = vmul.f32 %v1434_v30, %v2734_v10 }
0x1399   :  { %v1438_v31 = vsub.f32 %v1426_v24, %v1436_v17 }
0x139b   :  { %v1440_v32 = vmul.f32 %v1438_v31, %v1438_v31 }
0x139d   :  { %v1444_v27 = vsel %vm30_vm0, %v1440_v32, 0.0 }
0x139e   :  { %1445 = vadd.xlane.f32.xlu2 %v1444_v27 }
0x1409   :  { %v1443_v33 = vpop.xlane.xlu1 %1442 }
0x140a   :  { %v1447_v34 = vmul.f32 %v1443_v33, %v2734_v10 }
0x140c   :  { %v1449_v36 = vadd.f32 1e-05, %v1447_v34 }
0x140e   :  { %2655 = vrsqrt.f32 %v1449_v36  ;;  %vm1457_vm9 = vweird.f32 %v1449_v36 }
0x1411   :  { %v1446_v39 = vpop.xlane.xlu2 %1445 }
0x1412   :  { %v1448_v40 = vmul.f32 %v1446_v39, %v2734_v10  ;;  %v2511_v39 = vld [vmem:[%s3305_s2 + $0xe8] sm:$0xff] }
0x1413   :  { %1737 = vmatpush.bf16.msra.mxu0 %v2511_v39 }
0x1414   :  { %v2656_v41 = vpop.eup %2655  ;;  %v1450_v42 = vadd.f32 1e-05, %v1448_v40 }
0x1415   :  { %v1452_v43 = vmul.f32 %v2656_v41, %v1449_v36  ;;  %vm1458_vm7 = vweird.f32 %v2656_v41  ;;  %v2509_v36 = vld [vmem:[%s3305_s2 + $0xd8] sm:$0xff] }
0x1416   :  { %2657 = vrsqrt.f32 %v1450_v42  ;;  %vm1459_vm10 = vmor %vm1457_vm9, %vm1458_vm7  ;;  %vm1467_vm12 = vweird.f32 %v1450_v42  ;;  %1704 = vmatpush.bf16.msrb.mxu3 %v2509_v36 }
0x1417   :  { %v1453_v44 = vmul.f32 %v2656_v41, %v1452_v43  ;;  %v2508_v43 = vld [vmem:[%s3305_s2 + $0xd0] sm:$0xff] }
0x1419   :  { %v1454_v45 = vmul.f32 0.5, %v1453_v44  ;;  %v2510_v44 = vld [vmem:[%s3305_s2 + $0xe0] sm:$0xff] }
0x141a   :  { %1705 = vmatpush.bf16.msrb.mxu3 %v2508_v43  ;;  %1738 = vmatpush.bf16.msra.mxu0 %v2510_v44 }
0x141b   :  { %v1455_v46 = vsub.f32 1.5, %v1454_v45 }
0x141c   :  { %v2658_v54 = vpop.eup %2657 }
0x141d   :  { %v1456_v48 = vmul.f32 %v2656_v41, %v1455_v46  ;;  %v1462_v49 = vmul.f32 %v2658_v54, %v1450_v42  ;;  %vm1468_vm11 = vweird.f32 %v2658_v54  ;;  %v2506_v42 = vld [vmem:[%s3305_s2 + $0xc0] sm:$0xff] }
0x141e   :  { %vm1469_vm13 = vmor %vm1467_vm12, %vm1468_vm11  ;;  %1672 = vmatpush.bf16.msrb.mxu2 %v2506_v42 }
0x141f   :  { %v1463_v51 = vmul.f32 %v2658_v54, %v1462_v49  ;;  %v1460_v52 = vsel %vm1459_vm10, %v2656_v41, %v1456_v48 }
0x1420   :  { %v1471_v58 = vmul.f32 %v1460_v52, %v1437_v28 }
0x1421   :  { %v1464_v55 = vmul.f32 0.5, %v1463_v51 }
0x1422   :  { %v1474_v62 = vmul.f32 %v2565_v57, %v1471_v58 }
0x1423   :  { %v1465_v56 = vsub.f32 1.5, %v1464_v55 }
0x1424   :  { %v1477_v1 = vadd.f32 %v2566_v61, %v1474_v62 }
0x1425   :  { %v1466_v59 = vmul.f32 %v2658_v54, %v1465_v56 }
0x1427   :  { %v1470_v60 = vsel %vm1469_vm13, %v2658_v54, %v1466_v59 }
0x1428   :  { %v1472_v63 = vmul.f32 %v1470_v60, %v1438_v31 }
0x142a   :  { %v1475_v0 = vmul.f32 %v2565_v57, %v1472_v63 }
0x142c   :  { %v1478_v2 = vadd.f32 %v2566_v61, %v1475_v0  ;;  %v2569_v0 = vld [vmem:[%s3304_s5 + $0x1c] ss:$0 sm:$0xff] }
0x142e   :  { %v1479_v3 = vpack.c.bf16 %v1478_v2, %v1477_v1 }
0x1430   :  { %2344 = vmatmul.msk.bf16.vlgmr.msrb.gmra.mxu0 %vm30_vm0, %v1479_v3 }
0x14ad   :  { %v1511_v8 = vpop.f32.mrf.mxu0 }
0x14ae   :  { %v1512_v12 = vadd.f32 %v2567_v9, %v1511_v8 }
0x14b0   :  { %v1516_v15 = vmax.f32 %v1512_v12, 0.0 }
0x14b5   :  { %v1513_v13 = vpop.f32.mrf.mxu0 }
0x14b6   :  { %v1514_v14 = vadd.f32 %v2567_v9, %v1513_v13 }
0x14b8   :  { %v1517_v18 = vmax.f32 %v1514_v14, 0.0  ;;  %v2571_v14 = vld [vmem:[%s3304_s5 + $0x22] ss:$0 sm:$0xff] }
0x14ba   :  { %v1518_v19 = vpack.c.bf16 %v1517_v18, %v1516_v15 }
0x14bc   :  { %2369 = vmatmul.msk.bf16.vlgmr.msrb.gmra.mxu1 %vm530_vm15, %v1518_v19 }
0x1539   :  { %v1566_v21 = vpop.f32.mrf.mxu1 }
0x153a   :  { %v1567_v22 = vadd.f32 %v2568_v20, %v1566_v21 }
0x153c   :  { %v1571_v23 = vadd.f32 %v1567_v22, %v1477_v1  ;;  %v2573_v22 = vld [vmem:[%s3304_s5 + $0x21] ss:$0 sm:$0xff] }
0x153e   :  { %v1575_v24 = vsel %vm30_vm0, %v1571_v23, 0.0 }
0x153f   :  { %1576 = vadd.xlane.f32.xlu0 %v1575_v24 }
0x1541   :  { %v1568_v37 = vpop.f32.mrf.mxu1 }
0x1542   :  { %v1569_v25 = vadd.f32 %v2568_v20, %v1568_v37 }
0x1544   :  { %v1572_v26 = vadd.f32 %v1569_v25, %v1478_v2 }
0x1546   :  { %v1578_v28 = vsel %vm30_vm0, %v1572_v26, 0.0 }
0x1547   :  { %1579 = vadd.xlane.f32.xlu1 %v1578_v28 }
0x15b2   :  { %v1577_v38 = vpop.xlane.xlu0 %1576 }
0x15b3   :  { %v1581_v29 = vmul.f32 %v1577_v38, %v2734_v10  ;;  %v2572_v38 = vld [vmem:[%s3304_s5 + $0x20] ss:$0 sm:$0xff] }
0x15b5   :  { %v1583_v30 = vsub.f32 %v1571_v23, %v1581_v29 }
0x15b7   :  { %v1585_v17 = vmul.f32 %v1583_v30, %v1583_v30 }
0x15b9   :  { %v1587_v31 = vsel %vm30_vm0, %v1585_v17, 0.0 }
0x15ba   :  { %v1580_v32 = vpop.xlane.xlu1 %1579  ;;  %1588 = vadd.xlane.f32.xlu2 %v1587_v31 }
0x15bb   :  { %v1582_v27 = vmul.f32 %v1580_v32, %v2734_v10 }
0x15bd   :  { %v1584_v16 = vsub.f32 %v1572_v26, %v1582_v27 }
0x15bf   :  { %v1586_v33 = vmul.f32 %v1584_v16, %v1584_v16 }
0x15c1   :  { %v1590_v34 = vsel %vm30_vm0, %v1586_v33, 0.0 }
0x15c2   :  { %1591 = vadd.xlane.f32.xlu0 %v1590_v34 }
0x162d   :  { %v1589_v40 = vpop.xlane.xlu2 %1588 }
0x162e   :  { %v1593_v41 = vmul.f32 %v1589_v40, %v2734_v10 }
0x1630   :  { %v1595_v45 = vadd.f32 1e-05, %v1593_v41 }
0x1632   :  { %2659 = vrsqrt.f32 %v1595_v45  ;;  %vm1603_vm1 = vweird.f32 %v1595_v45 }
0x1635   :  { %v1592_v46 = vpop.xlane.xlu0 %1591 }
0x1636   :  { %v1594_v54 = vmul.f32 %v1592_v46, %v2734_v10 }
0x1638   :  { %v2660_v48 = vpop.eup %2659  ;;  %v1596_v49 = vadd.f32 1e-05, %v1594_v54 }
0x1639   :  { %v1598_v51 = vmul.f32 %v2660_v48, %v1595_v45  ;;  %vm1604_vm14 = vweird.f32 %v2660_v48 }
0x163a   :  { %2661 = vrsqrt.f32 %v1596_v49  ;;  %vm1605_vm2 = vmor %vm1603_vm1, %vm1604_vm14  ;;  %vm1613_vm4 = vweird.f32 %v1596_v49 }
0x163b   :  { %v1599_v52 = vmul.f32 %v2660_v48, %v1598_v51 }
0x163d   :  { %v1600_v55 = vmul.f32 0.5, %v1599_v52 }
0x163f   :  { %v1601_v56 = vsub.f32 1.5, %v1600_v55 }
0x1640   :  { %v2662_v57 = vpop.eup %2661 }
0x1641   :  { %v1602_v58 = vmul.f32 %v2660_v48, %v1601_v56  ;;  %v1608_v59 = vmul.f32 %v2662_v57, %v1596_v49  ;;  %vm1614_vm3 = vweird.f32 %v2662_v57  ;;  %v2513_v56 = vld [vmem:[%s3305_s2 + $0xf8] sm:$0xff] }
0x1642   :  { %vm1615_vm5 = vmor %vm1613_vm4, %vm1614_vm3  ;;  %1837 = vmatpush.bf16.msra.mxu3 %v2513_v56 }
0x1643   :  { %v1609_v60 = vmul.f32 %v2662_v57, %v1608_v59  ;;  %v1606_v61 = vsel %vm1605_vm2, %v2660_v48, %v1602_v58 }
0x1644   :  { %v1617_v1 = vmul.f32 %v1606_v61, %v1583_v30  ;;  %v2574_v61 = vld [vmem:[%s3304_s5 + $0x23] ss:$0 sm:$0xff] }
0x1645   :  { %v1610_v62 = vmul.f32 0.5, %v1609_v60 }
0x1646   :  { %v1620_v5 = vmul.f32 %v2569_v0, %v1617_v1 }
0x1647   :  { %v1611_v63 = vsub.f32 1.5, %v1610_v62 }
0x1648   :  { %v3164_v8 = vadd.f32 %v2570_v4, %v1620_v5 }
0x1649   :  { %v1612_v2 = vmul.f32 %v2662_v57, %v1611_v63 }
0x164b   :  { %v1616_v3 = vsel %vm1615_vm5, %v2662_v57, %v1612_v2  ;;  %v2512_v57 = vld [vmem:[%s3305_s2 + $0xf0] sm:$0xff] }
0x164c   :  { %v1618_v6 = vmul.f32 %v1616_v3, %v1584_v16  ;;  %1838 = vmatpush.bf16.msra.mxu3 %v2512_v57  ;;  %v2577_v57 = vld [vmem:[%s3304_s5 + $0x28] ss:$0 sm:$0xff] }
0x164e   :  { %v1621_v7 = vmul.f32 %v2569_v0, %v1618_v6 }
0x1650   :  { %v3166_v9 = vadd.f32 %v2570_v4, %v1621_v7 }
0x1652   :  { %v1642_v12 = vpack.c.bf16 %v3166_v9, %v3164_v8 }
0x1654   :  { %2382 = vmatmul.msk.bf16.vlgmr.msrb.gmra.mxu2 %vm30_vm0, %v1642_v12  ;;  %2395 = vmatmul.msk.bf16.vlgmr.msrb.gmra.mxu3 %vm30_vm0, %v1642_v12 }
0x1655   :  { %2408 = vmatmul.msk.bf16.vlgmr.msra.gmra.mxu0 %vm30_vm0, %v1642_v12 }
0x16d2   :  { %v1740_v13 = vpop.f32.mrf.mxu0 }
0x16d3   :  { %v1741_v20 = vadd.f32 %v2571_v14, %v1740_v13 }
0x16d7   :  { %v1707_v15 = vpop.f32.mrf.mxu3  ;;  %v1674_v18 = vpop.f32.mrf.mxu2 }
0x16d8   :  { %v1708_v37 = vadd.f32 %v2573_v22, %v1707_v15  ;;  %v1675_v17 = vadd.f32 %v2572_v38, %v1674_v18 }
0x16da   :  { %v1742_v19 = vpop.f32.mrf.mxu0 }
0x16db   :  { %v1743_v21 = vadd.f32 %v2571_v14, %v1742_v19 }
0x16dd   :  { %v1747_v23 = vpack.c.bf16 %v1743_v21, %v1741_v20 }
0x16df   :  { %1801 = vmatpush.bf16.msra.mxu2 %v1747_v23  ;;  %v1709_v24 = vpop.f32.mrf.mxu3  ;;  %v1676_v28 = vpop.f32.mrf.mxu2 }
0x16e0   :  { %v1710_v25 = vadd.f32 %v2573_v22, %v1709_v24  ;;  %v1677_v30 = vadd.f32 %v2572_v38, %v1676_v28  ;;  %v2515_v22 = vld [vmem:[%s3307_s3 + $0x38] sm:$0xff] }
0x16e1   :  { %1928 = vmatpush.bf16.msrb.mxu0 %v2515_v22 }
0x16e2   :  { %v1746_v26 = vpack.c.bf16 %v1710_v25, %v1708_v37  ;;  %v1745_v31 = vpack.c.bf16 %v1677_v30, %v1675_v17  ;;  %v2514_v25 = vld [vmem:[%s3307_s3 + $0x30] sm:$0xff] }
0x16e4   :  { %v1752_v29 = vsel %vm30_vm0, %v1746_v26, 0 }
0x16e5   :  { %1761 = vmatpush.bf16.xpose.msra.mxu1 %v1752_v29  ;;  %1929 = vmatpush.bf16.msrb.mxu0 %v2514_v25 }
0x16ec   :  { %2409 = vmatmul.msk.bf16.vlgmr.msra.gmra.mxu1 %vm30_vm0, %v1745_v31 }
0x1769   :  { %v1763_v32 = vpop.f32.mrf.mxu1 }
0x176a   :  { %v1764_v27 = vadd.f32 %v3066_v47, %v1763_v32 }
0x176c   :  { %v1768_v16 = vsel %vm206_vm8, %v1764_v27, -inf }
0x176d   :  { %1769 = vmax.xlane.f32.xlu1 %v1768_v16 }
0x1771   :  { %v1765_v33 = vpop.f32.mrf.mxu1 }
0x1772   :  { %v1766_v34 = vadd.f32 %v3073_v50, %v1765_v33 }
0x1774   :  { %v1771_v35 = vsel %vm206_vm8, %v1766_v34, -inf }
0x1775   :  { %1772 = vmax.xlane.f32.xlu2 %v1771_v35 }
0x17e0   :  { %v1770_v36 = vpop.xlane.xlu1 %1769 }
0x17e1   :  { %v1774_v39 = vsub.f32 %v1764_v27, %v1770_v36 }
0x17e3   :  { %v1776_v40 = vmul.f32 1.442695, %v1774_v39 }
0x17e5   :  { %2663 = vpow2.f32 %v1776_v40  ;;  %v2575_v40 = vld [vmem:[%s3304_s5 + $0x24] ss:$0 sm:$0xff] }
0x17e8   :  { %v1773_v41 = vpop.xlane.xlu2 %1772 }
0x17e9   :  { %v1775_v42 = vsub.f32 %v1766_v34, %v1773_v41 }
0x17eb   :  { %v2664_v43 = vpop.eup %2663  ;;  %v1778_v44 = vmul.f32 1.442695, %v1775_v42 }
0x17ec   :  { %v1780_v45 = vsel %vm206_vm8, %v2664_v43, 0.0 }
0x17ed   :  { %2665 = vpow2.f32 %v1778_v44  ;;  %1781 = vadd.xlane.f32.xlu0 %v1780_v45  ;;  %v2576_v44 = vld [vmem:[%s3304_s5 + $0x25] ss:$0 sm:$0xff] }
0x17f3   :  { %v2666_v47 = vpop.eup %2665 }
0x17f4   :  { %v1783_v46 = vsel %vm206_vm8, %v2666_v47, 0.0 }
0x17f5   :  { %1784 = vadd.xlane.f32.xlu1 %v1783_v46 }
0x1860   :  { %v1782_v50 = vpop.xlane.xlu0 %1781 }
0x1861   :  { %2667 = vrcp.f32 %v1782_v50 }
0x1867   :  { %v2668_v48 = vpop.eup %2667 }
0x1868   :  { %v1785_v54 = vpop.xlane.xlu1 %1784  ;;  %v1788_v51 = vmul.f32 %v2668_v48, %v2664_v43 }
0x1869   :  { %2669 = vrcp.f32 %v1785_v54 }
0x186f   :  { %v2670_v49 = vpop.eup %2669 }
0x1870   :  { %v1789_v52 = vmul.f32 %v2670_v49, %v2666_v47  ;;  %v2519_v49 = vld [vmem:[%s3308_s4 + $0x78] sm:$0xff] }
0x1871   :  { %1981 = vmatpush.bf16.msrb.mxu1 %v2519_v49 }
0x1872   :  { %v1790_v55 = vpack.c.bf16 %v1789_v52, %v1788_v51  ;;  %v2518_v51 = vld [vmem:[%s3308_s4 + $0x70] sm:$0xff]  ;;  %v2517_v52 = vld [vmem:[%s3308_s4 + $0x68] sm:$0xff] }
0x1874   :  { %2410 = vmatmul.msk.bf16.vlgmr.msra.gmra.mxu2 %vm206_vm8, %v1790_v55  ;;  %v2516_v55 = vld [vmem:[%s3308_s4 + $0x60] sm:$0xff] }
0x1875   :  { %1982 = vmatpush.bf16.msrb.mxu1 %v2518_v51 }
0x1879   :  { %1983 = vmatpush.bf16.msrb.mxu1 %v2517_v52 }
0x187d   :  { %1984 = vmatpush.bf16.msrb.mxu1 %v2516_v55 }
0x18f7   :  { %v1803_v58 = vpop.f32.mrf.mxu2 }
0x18ff   :  { %v1805_v59 = vpop.f32.mrf.mxu2 }
0x1900   :  { %v1808_v60 = vpack.c.bf16 %v1805_v59, %v1803_v58 }
0x1902   :  { %2423 = vmatmul.msk.bf16.vlgmr.msra.gmra.mxu3 %vm30_vm0, %v1808_v60 }
0x1985   :  { %v1840_v62 = vpop.f32.mrf.mxu3 }
0x1986   :  { %v1841_v63 = vadd.f32 %v2574_v61, %v1840_v62 }
0x1988   :  { %v1845_v0 = vadd.f32 %v1841_v63, %v3164_v8 }
0x198a   :  { %v1849_v1 = vsel %vm30_vm0, %v1845_v0, 0.0 }
0x198b   :  { %1850 = vadd.xlane.f32.xlu2 %v1849_v1 }
0x198d   :  { %v1842_v2 = vpop.f32.mrf.mxu3 }
0x198e   :  { %v1843_v3 = vadd.f32 %v2574_v61, %v1842_v2 }
0x1990   :  { %v1846_v4 = vadd.f32 %v1843_v3, %v3166_v9 }
0x1992   :  { %v1852_v5 = vsel %vm30_vm0, %v1846_v4, 0.0 }
0x1993   :  { %1853 = vadd.xlane.f32.xlu0 %v1852_v5 }
0x19fe   :  { %v1851_v6 = vpop.xlane.xlu2 %1850 }
0x19ff   :  { %v1855_v7 = vmul.f32 %v1851_v6, %v2734_v10 }
0x1a01   :  { %v1857_v12 = vsub.f32 %v1845_v0, %v1855_v7  ;;  %v2563_v0 = vld [vmem:[%s3304_s5 + $0x2a] ss:$0 sm:$0xff]  ;;  %v2578_v7 = vld [vmem:[%s3304_s5 + $0x29] ss:$0 sm:$0xff] }
0x1a02   :  { %v1181_v1 = vadd.f32 %v2563_v0, %v3061_v53 }
0x1a03   :  { %v1859_v13 = vmul.f32 %v1857_v12, %v1857_v12 }
0x1a04   :  { %v1184_v2 = vmul.f32 %v1181_v1, %v1181_v1 }
0x1a05   :  { %v1861_v14 = vsel %vm30_vm0, %v1859_v13, 0.0 }
0x1a06   :  { %v1854_v15 = vpop.xlane.xlu0 %1853  ;;  %1862 = vadd.xlane.f32.xlu1 %v1861_v14  ;;  %v1185_v3 = vmul.f32 %v1184_v2, %v1181_v1 }
0x1a07   :  { %v1856_v18 = vmul.f32 %v1854_v15, %v2734_v10 }
0x1a09   :  { %v1858_v19 = vsub.f32 %v1846_v4, %v1856_v18  ;;  %v1186_v4 = vmul.f32 0.044715, %v1185_v3 }
0x1a0b   :  { %v1860_v20 = vmul.f32 %v1858_v19, %v1858_v19  ;;  %v1187_v5 = vadd.f32 %v1186_v4, %v1181_v1 }
0x1a0d   :  { %v1864_v21 = vsel %vm30_vm0, %v1860_v20, 0.0  ;;  %v1188_v6 = vmul.f32 0.7978846, %v1187_v5 }
0x1a0e   :  { %1865 = vadd.xlane.f32.xlu2 %v1864_v21 }
0x1a79   :  { %v1863_v23 = vpop.xlane.xlu1 %1862 }
0x1a7a   :  { %v1867_v24 = vmul.f32 %v1863_v23, %v2734_v10 }
0x1a7c   :  { %v1869_v37 = vadd.f32 1e-05, %v1867_v24 }
0x1a7e   :  { %2671 = vrsqrt.f32 %v1869_v37  ;;  %vm1877_vm7 = vweird.f32 %v1869_v37 }
0x1a81   :  { %v1866_v26 = vpop.xlane.xlu2 %1865 }
0x1a82   :  { %v1868_v28 = vmul.f32 %v1866_v26, %v2734_v10 }
0x1a84   :  { %v2672_v38 = vpop.eup %2671  ;;  %v1870_v29 = vadd.f32 1e-05, %v1868_v28 }
0x1a85   :  { %v1872_v30 = vmul.f32 %v2672_v38, %v1869_v37  ;;  %vm1878_vm6 = vweird.f32 %v2672_v38  ;;  %v2579_v37 = vld [vmem:[%s3304_s5 + $0x2b] ss:$0 sm:$0xff] }
0x1a86   :  { %2673 = vrsqrt.f32 %v1870_v29  ;;  %vm1879_vm9 = vmor %vm1877_vm7, %vm1878_vm6  ;;  %vm1887_vm11 = vweird.f32 %v1870_v29 }
0x1a87   :  { %v1873_v17 = vmul.f32 %v2672_v38, %v1872_v30  ;;  %2675 = vtanh.f32 %v1188_v6 }
0x1a89   :  { %v1874_v31 = vmul.f32 0.5, %v1873_v17 }
0x1a8b   :  { %v1875_v32 = vsub.f32 1.5, %v1874_v31  ;;  %v2580_v31 = vld [vmem:[%s3304_s5 + $0x2c] ss:$0 sm:$0xff] }
0x1a8c   :  { %v2674_v27 = vpop.eup %2673 }
0x1a8d   :  { %v1876_v16 = vmul.f32 %v2672_v38, %v1875_v32  ;;  %v1882_v33 = vmul.f32 %v2674_v27, %v1870_v29  ;;  %vm1888_vm10 = vweird.f32 %v2674_v27  ;;  %v2676_v14 = vpop.eup %2675 }
0x1a8e   :  { %vm1889_vm12 = vmor %vm1887_vm11, %vm1888_vm10  ;;  %vm2066_vm10 = vcmask 1041409   ;;  %vm2083_vm11 = vcmask 138240  }
0x1a8f   :  { %v1883_v34 = vmul.f32 %v2674_v27, %v1882_v33  ;;  %v1880_v35 = vsel %vm1879_vm9, %v2672_v38, %v1876_v16  ;;  %v1627_v33 = vmul.f32 %v2580_v31, %v3164_v8 }
0x1a90   :  { %v1891_v41 = vmul.f32 %v1880_v35, %v1857_v12  ;;  %v2581_v35 = vld [vmem:[%s3304_s5 + $0x2e] ss:$0 sm:$0xff] }
0x1a91   :  { %v1884_v36 = vmul.f32 0.5, %v1883_v34 }
0x1a92   :  { %v1894_v45 = vmul.f32 %v2575_v40, %v1891_v41 }
0x1a93   :  { %v1885_v39 = vsub.f32 1.5, %v1884_v36 }
0x1a94   :  { %v1897_v50 = vadd.f32 %v2576_v44, %v1894_v45 }
0x1a95   :  { %v1886_v42 = vmul.f32 %v2674_v27, %v1885_v39  ;;  %v1629_v39 = vsel %vm30_vm0, %v1627_v33, 0.0 }
0x1a97   :  { %v1890_v43 = vsel %vm1889_vm12, %v2674_v27, %v1886_v42 }
0x1a98   :  { %v1892_v47 = vmul.f32 %v1890_v43, %v1858_v19  ;;  %v1190_v19 = vadd.f32 1.0, %v2676_v14  ;;  %v1628_v43 = vmul.f32 %v2580_v31, %v3166_v9 }
0x1a9a   :  { %v1895_v46 = vmul.f32 %v2575_v40, %v1892_v47  ;;  %v1191_v21 = vmul.f32 0.5, %v1190_v19  ;;  %v1635_v40 = vld [vmem:[%s3304_s5 + $0x2f] sm:$0x1] }
0x1a9b   :  { %2520 = vpush %v1635_v40 }
0x1a9c   :  { %v1898_v54 = vadd.f32 %v2576_v44, %v1895_v46  ;;  %v1192_v24 = vmul.f32 %v1191_v21, %v1181_v1  ;;  %v1632_v44 = vsel %vm30_vm0, %v1628_v43, 0.0 }
0x1a9e   :  { %v1899_v48 = vpack.c.bf16 %v1898_v54, %v1897_v50  ;;  %v1195_v25 = vmul.f32 %v2579_v37, %v1192_v24 }
0x1aa0   :  { %2436 = vmatmul.msk.bf16.vlgmr.msrb.gmra.mxu0 %vm30_vm0, %v1899_v48 }
0x1b1d   :  { %v1931_v56 = vpop.f32.mrf.mxu0 }
0x1b1e   :  { %v1932_v58 = vadd.f32 %v2577_v57, %v1931_v56 }
0x1b20   :  { %v1936_v61 = vmax.f32 %v1932_v58, 0.0 }
0x1b25   :  { %v1933_v59 = vpop.f32.mrf.mxu0 }
0x1b26   :  { %v1934_v60 = vadd.f32 %v2577_v57, %v1933_v59 }
0x1b28   :  { %v1937_v62 = vmax.f32 %v1934_v60, 0.0 }
0x1b2a   :  { %v1938_v63 = vpack.c.bf16 %v1937_v62, %v1936_v61  ;;  %v2055_v61 = vld [vmem:[%s3304_s5 + $0x30] sm:$0x1] }
0x1b2b   :  { %2522 = vpush %v2055_v61 }
0x1b2c   :  { %2461 = vmatmul.msk.bf16.vlgmr.msrb.gmra.mxu1 %vm530_vm15, %v1938_v63  ;;  %vm1196_vm15 = vcmask 254976  }
0x1b2d   :  { %v1197_v26 = vsel %vm1196_vm15, %v1195_v25, 0.0 }
0x1ba9   :  { %v1986_v12 = vpop.f32.mrf.mxu1 }
0x1baa   :  { %v1987_v13 = vadd.f32 %v2578_v7, %v1986_v12  ;;  %v2582_v12 = vld [vmem:[%s3304_s5 + $0x26] ss:$0 sm:$0xff] }
0x1bac   :  { %v1991_v15 = vadd.f32 %v1987_v13, %v1897_v50 }
0x1bae   :  { %v1995_v18 = vsel %vm30_vm0, %v1991_v15, 0.0 }
0x1baf   :  { %1996 = vadd.xlane.f32.xlu0 %v1995_v18 }
0x1bb1   :  { %v1988_v20 = vpop.f32.mrf.mxu1 }
0x1bb2   :  { %v1989_v53 = vadd.f32 %v2578_v7, %v1988_v20  ;;  %v2584_v20 = vld [vmem:[%s3304_s5 + $0x2d] ss:$0 sm:$0xff] }
0x1bb4   :  { %v1992_v22 = vadd.f32 %v1989_v53, %v1898_v54 }
0x1bb6   :  { %v1998_v23 = vsel %vm30_vm0, %v1992_v22, 0.0 }
0x1bb7   :  { %1999 = vadd.xlane.f32.xlu1 %v1998_v23 }
0x1bbf   :  { %1198 = vadd.xlane.f32.xlu1 %v1197_v26 }
0x1c22   :  { %v1997_v28 = vpop.xlane.xlu0 %1996 }
0x1c23   :  { %v2001_v38 = vmul.f32 %v1997_v28, %v2734_v10 }
0x1c25   :  { %v3253_v29 = vsub.f32 %v1991_v15, %v2001_v38  ;;  %v2583_v15 = vld [vmem:[%s3304_s5 + $0x27] ss:$0 sm:$0xff]  ;;  %s2521_s5 = spop %2520 }
0x1c26   :  { %s2523_s23 = spop %2522  ;;  %v1638_v31 = vstv %s2521_s5 }
0x1c27   :  { %v2005_v30 = vmul.f32 %v3253_v29, %v3253_v29 }
0x1c29   :  { %v2007_v17 = vsel %vm30_vm0, %v2005_v30, 0.0 }
0x1c2a   :  { %v2000_v32 = vpop.xlane.xlu1 %1999  ;;  %2008 = vadd.xlane.f32.xlu2 %v2007_v17 }
0x1c2b   :  { %v2002_v27 = vmul.f32 %v2000_v32, %v2734_v10  ;;  %v2058_v32 = vstv %s2523_s23 }
0x1c2d   :  { %v3262_v16 = vsub.f32 %v1992_v22, %v2002_v27 }
0x1c2f   :  { %v2006_v34 = vmul.f32 %v3262_v16, %v3262_v16 }
0x1c31   :  { %v2010_v36 = vsel %vm30_vm0, %v2006_v34, 0.0 }
0x1c32   :  { %2011 = vadd.xlane.f32.xlu0 %v2010_v36  ;;  %1630 = vadd.xlane.f32.xlu2 %v1629_v39  ;;  %v1199_v41 = vpop.xlane.xlu1 %1198 }
0x1c33   :  { %v1202_v8 = vadd.f32 %v2581_v35, %v1199_v41  ;;  %v2071_v35 = vadd.s32 4294967288, %v3022_v11 }
0x1c35   :  { %v2277_v42 = vmul.f32 -1.442695, %v1202_v8 }
0x1c37   :  { %2677 = vpow2.f32 %v2277_v42 }
0x1c3a   :  { %1633 = vadd.xlane.f32.xlu0 %v1632_v44 }
0x1c3d   :  { %v2678_v45 = vpop.eup %2677 }
0x1c3e   :  { %v1206_v47 = vadd.f32 1.0, %v2678_v45 }
0x1c40   :  { %2679 = vrcp.f32 %v1206_v47  ;;  %v1218_v48 = vand.u32 2147483648, %v1206_v47  ;;  %v1216_v51 = vand.u32 2147483647, %v1206_v47  ;;  %vm1212_vm14 = vweird.f32 %v1206_v47 }
0x1c42   :  { %v1219_v55 = vor.u32 1.1754944e-38, %v1218_v48  ;;  %vm1217_vm2 = vcmp.eq.f32.partialorder %v1216_v51, 8.507059e+37 }
0x1c46   :  { %v2680_v46 = vpop.eup %2679 }
0x1c47   :  { %v1208_v50 = vmul.f32 %v2680_v46, %v1206_v47  ;;  %vm1213_vm13 = vweird.f32 %v2680_v46 }
0x1c48   :  { %vm1214_vm1 = vmor %vm1212_vm14, %vm1213_vm13 }
0x1c49   :  { %v1209_v54 = vsub.f32 1.0, %v1208_v50 }
0x1c4b   :  { %v1210_v49 = vmul.f32 %v2680_v46, %v1209_v54 }
0x1c4d   :  { %v1211_v52 = vadd.f32 %v2680_v46, %v1210_v49 }
0x1c4f   :  { %v1215_v56 = vsel %vm1214_vm1, %v2680_v46, %v1211_v52 }
0x1c50   :  { %v1220_v9 = vsel %vm1217_vm2, %v1219_v55, %v1215_v56 }
0x1c51   :  { %2077 = vrot.lane.b32.xlu0 %v1220_v9, %s2689_s28 }
0x1c9d   :  { %v2009_v57 = vpop.xlane.xlu2 %2008 }
0x1c9e   :  { %v2013_v58 = vmul.f32 %v2009_v57, %v2734_v10 }
0x1ca0   :  { %v2015_v59 = vadd.f32 1e-05, %v2013_v58 }
0x1ca2   :  { %2681 = vrsqrt.f32 %v2015_v59  ;;  %vm2023_vm4 = vweird.f32 %v2015_v59 }
0x1ca5   :  { %v2012_v60 = vpop.xlane.xlu0 %2011  ;;  %v1631_v30 = vpop.xlane.xlu2 %1630 }
0x1ca6   :  { %v2014_v62 = vmul.f32 %v2012_v60, %v2734_v10  ;;  %v1640_v34 = vadd.f32 %v1638_v31, %v1631_v30 }
0x1ca8   :  { %v2682_v63 = vpop.eup %2681  ;;  %v2016_v0 = vadd.f32 1e-05, %v2014_v62  ;;  %v2064_v41 = vperm.slane %v1640_v34, %v3022_v11 }
0x1ca9   :  { %v2018_v1 = vmul.f32 %v2682_v63, %v2015_v59  ;;  %vm2024_vm3 = vweird.f32 %v2682_v63 }
0x1caa   :  { %2683 = vrsqrt.f32 %v2016_v0  ;;  %vm2025_vm5 = vmor %vm2023_vm4, %vm2024_vm3  ;;  %vm2033_vm7 = vweird.f32 %v2016_v0 }
0x1cab   :  { %v2019_v2 = vmul.f32 %v2682_v63, %v2018_v1 }
0x1cad   :  { %v2020_v3 = vmul.f32 0.5, %v2019_v2  ;;  %v1634_v17 = vpop.xlane.xlu0 %1633 }
0x1cae   :  { %v1641_v33 = vadd.f32 %v1638_v31, %v1634_v17 }
0x1caf   :  { %v2021_v4 = vsub.f32 1.5, %v2020_v3 }
0x1cb0   :  { %v2684_v5 = vpop.eup %2683  ;;  %v2065_v39 = vperm.slane %v1641_v33, %v3022_v11 }
0x1cb1   :  { %v2022_v6 = vmul.f32 %v2682_v63, %v2021_v4  ;;  %v2028_v7 = vmul.f32 %v2684_v5, %v2016_v0  ;;  %vm2034_vm6 = vweird.f32 %v2684_v5 }
0x1cb2   :  { %vm2035_vm9 = vmor %vm2033_vm7, %vm2034_vm6  ;;  %v2067_v43 = vsel %vm2066_vm10, %v2065_v39, %v2064_v41 }
0x1cb3   :  { %v2026_v13 = vsel %vm2025_vm5, %v2682_v63, %v2022_v6  ;;  %v2029_v10 = vmul.f32 %v2684_v5, %v2028_v7 }
0x1cb4   :  { %v2037_v14 = vmul.f32 %v2026_v13, %v3253_v29 }
0x1cb5   :  { %v2030_v18 = vmul.f32 0.5, %v2029_v10 }
0x1cb6   :  { %v2040_v19 = vmul.f32 %v2582_v12, %v2037_v14 }
0x1cb7   :  { %v2031_v53 = vsub.f32 1.5, %v2030_v18 }
0x1cb8   :  { %v2043_v21 = vadd.f32 %v2583_v15, %v2040_v19 }
0x1cb9   :  { %v2032_v22 = vmul.f32 %v2684_v5, %v2031_v53 }
0x1cba   :  { %v2047_v23 = vmul.f32 %v2584_v20, %v2043_v21 }
0x1cbb   :  { %v2036_v24 = vsel %vm2035_vm9, %v2684_v5, %v2032_v22 }
0x1cbc   :  { %v2049_v37 = vsel %vm30_vm0, %v2047_v23, 0.0  ;;  %v2038_v25 = vmul.f32 %v2036_v24, %v3262_v16 }
0x1cbd   :  { %2050 = vadd.xlane.f32.xlu1 %v2049_v37 }
0x1cbe   :  { %v2041_v26 = vmul.f32 %v2582_v12, %v2038_v25 }
0x1cc0   :  { %v2044_v28 = vadd.f32 %v2583_v15, %v2041_v26 }
0x1cc2   :  { %v2048_v38 = vmul.f32 %v2584_v20, %v2044_v28 }
0x1cc3   :  { %v2078_v45 = vpop.permute.xlu0 %2077 }
0x1cc4   :  { %v2052_v29 = vsel %vm30_vm0, %v2048_v38, 0.0  ;;  %vm2080_vm0 = vcmask 64512  }
0x1cc5   :  { %2053 = vadd.xlane.f32.xlu2 %v2052_v29 }
0x1d30   :  { %v2051_v27 = vpop.xlane.xlu1 %2050 }
0x1d31   :  { %v2060_v36 = vadd.f32 %v2058_v32, %v2051_v27 }
0x1d33   :  { %v2072_v8 = vperm.slane %v2060_v36, %v2071_v35 }
0x1d38   :  { %v2054_v16 = vpop.xlane.xlu2 %2053 }
0x1d39   :  { %v2061_v40 = vadd.f32 %v2058_v32, %v2054_v16 }
0x1d3b   :  { %v2073_v42 = vperm.slane %v2061_v40, %v2071_v35 }
0x1d3d   :  { %v2074_v44 = vsel %vm2066_vm10, %v2073_v42, %v2072_v8 }
0x1d3e   :  { %v2081_v47 = vsel %vm2080_vm0, %v2067_v43, %v2074_v44 }
0x1d3f   :  { %v2082_v46 = vsel %vm206_vm8, %v2081_v47, %v2078_v45 }
0x1d40   :  { %v2084_v50 = vsel %vm2083_vm11, %v2082_v46, 0.0 }
0x1d41   :  { %2085 = vst [vmem:[%s3309_s6] sm:$0x3] %v2084_v50 }

</bundles_post_ra>
